<compile_context>
chip_gen: v7x
topology: tpu7x:2x2x1
jax: 0.10.0
libtpu: 0.0.40
codegen_flags: <defaults>
</compile_context>

<pallas_src>
import functools

import jax
import jax.numpy as jnp
from jax.experimental import pallas as pl
from jax.experimental.pallas import tpu as pltpu

_EPS = 1e-5
_LANES = 128
_GUARD = 8  # zero-guard rows around the flattened halo scratch (sublane-aligned)
# Scoped-VMEM budget: per-step working set here is only a few MiB.  Keep <= ~48 MiB so it is
# safe on v7x (64 MiB physical); on v5e/v6e (128 MiB physical) this can be raised toward
# ~96 MiB together with a larger row tile if the conv ever becomes DMA-exposed.
_VMEM_LIMIT = 48 * 1024 * 1024


def _round_up(v, m):
    return (v + m - 1) // m * m


def _pick_tile_rows(h, wc):
    """Largest divisor of H keeping the flattened row block (TH*Wc matmul rows) modest, so the
    per-step working set stays a few MiB even on v7x's 64 MiB VMEM."""
    best = 1
    for th in range(1, h + 1):
        if h % th == 0 and th * wc <= 4096:
            best = th
    return best


# ----------------------------------------------------------------------------- kernels
def _conv3x3_kernel(up_ref, mid_ref, dn_ref, w_ref, s_ref, t_ref,
                    y_ref, stats_ref, hs_ref,
                    *, real_w, wc, th, apply_input_act):
    """3x3 'same' conv on one (sample, row-tile) + optional fused input BN/ReLU + BN stats.

    up_ref   : (1, 1, Wc, Cpi)  bf16  row above the tile (clamped; zeroed when tile is first)
    mid_ref  : (1, TH, Wc, Cpi) bf16  the tile's own rows
    dn_ref   : (1, 1, Wc, Cpi)  bf16  row below the tile (clamped; zeroed when tile is last)
    w_ref    : (9, Cpi, Cpo)    bf16  per-tap weights, tap index = kh*3 + kw
    s_ref    : (1, Cpi)         f32   per-channel scale of the *input* BN (stage 2 only)
    t_ref    : (1, Cpi)         f32   per-channel shift of the *input* BN (stage 2 only)
    y_ref    : (1, TH, Wc, Cpo) bf16  raw conv output (pre-BN), data in columns [0, W)
    stats_ref: (1, 1, 2, Cpo)   f32   per-(sample, tile) [sum, sum_sq] of the conv output
    hs_ref   : (2*G + (TH+2)*Wc, Cpi) bf16 scratch: flattened, zero-guarded halo'd tile
    """
    cpi = mid_ref.shape[3]
    m = th * wc
    g = _GUARD

    tile = pl.program_id(1)
    is_first = tile == 0
    is_last = tile == pl.num_programs(1) - 1

    # Valid-data column mask: columns [0, real_w) of each Wc-wide row are real data.
    colmask = jax.lax.broadcasted_iota(jnp.int32, (wc, 1), 0) < real_w

    def prep(v, zero_cond):
        # v: (..., Wc, Cpi) bf16 as stored in HBM.  Fuse the previous stage's BN+ReLU (f32
        # math), keep the zero pad columns zero, and cast ONCE to bf16.
        if apply_input_act:
            f = jnp.maximum(v.astype(jnp.float32) * s_ref[...] + t_ref[...], 0.0)
            v = jnp.where(colmask, f, 0.0).astype(hs_ref.dtype)
        if zero_cond is not None:
            v = jnp.where(zero_cond, jnp.zeros_like(v), v)
        return v

    # Assemble the flattened, zero-guarded halo tile.  Every store offset is a multiple of 8
    # (Wc % 8 == 0), so these are plain aligned lane-dense stores -- no relayouts, no
    # full-scratch zero fill (only the two tiny guard stores).
    zguard = jnp.zeros((g, cpi), hs_ref.dtype)
    hs_ref[pl.ds(0, g), :] = zguard                                   # leading guard
    hs_ref[pl.ds(g + (th + 2) * wc, g), :] = zguard                   # trailing guard
    hs_ref[pl.ds(g, wc), :] = prep(up_ref[0, 0], is_first)
    hs_ref[pl.ds(g + wc, m), :] = prep(mid_ref[0], None).reshape(m, cpi)
    hs_ref[pl.ds(g + (th + 1) * wc, wc), :] = prep(dn_ref[0, 0], is_last)

    # Output position m = h*Wc + w needs input element hs[g + (h+kh)*Wc + (w+kw-1)]
    #   = hs[(g + kh*Wc + kw - 1) + m], so each tap is one contiguous leading-dim window.
    # First tap initializes the accumulator (no zero-init); partials stay in a local value
    # (compiler-managed), not a VMEM read-modify-write.
    acc = jnp.dot(hs_ref[pl.ds(g - 1, m), :], w_ref[0],
                  preferred_element_type=jnp.float32)
    for tap in range(1, 9):
        kh, kw = divmod(tap, 3)
        start = g + kh * wc + kw - 1
        acc = acc + jnp.dot(hs_ref[pl.ds(start, m), :], w_ref[tap],
                            preferred_element_type=jnp.float32)

    # Columns [real_w, Wc) are discarded window positions: mask them for the writeback and
    # the BN statistics.
    keep = jax.lax.broadcasted_iota(jnp.int32, (m, 1), 0) % wc < real_w
    accm = jnp.where(keep, acc, 0.0)

    y_ref[0] = accm.reshape(th, wc, -1).astype(y_ref.dtype)
    # Two separate row stores (no concat relayout).
    # TODO(synk): E[x^2]-E[x]^2 in f32 can cancel for very large N*H*W; a mean-shifted or
    #             Welford-style two-level reduction would be more robust.
    stats_ref[0, 0, 0:1, :] = jnp.sum(accm, axis=0, keepdims=True)
    stats_ref[0, 0, 1:2, :] = jnp.sum(accm * accm, axis=0, keepdims=True)


def _bn_add_relu_kernel(y_ref, s_ref, t_ref, r_ref, o_ref, *, real_w):
    """Epilogue: out = relu(bn2(conv2_out) + residual).  f32 math, bf16 writeback of the
    real W columns only (the epilogue is purely HBM-bound)."""
    y = y_ref[0].astype(jnp.float32)
    r = r_ref[0].astype(jnp.float32)
    z = jnp.maximum(y * s_ref[...] + t_ref[...] + r, 0.0)
    o_ref[0] = z[:, :real_w, :].astype(o_ref.dtype)


# ----------------------------------------------------------------------------- wrappers
def _conv3x3(x, w9, scale, shift, *, th, real_w, apply_input_act):
    """x: (N, H, Wc, Cp) bf16 (column/channel padded); w9: (9, Cp, Cp) bf16;
    scale/shift: (1, Cp) f32.  Returns (y, stats): y raw conv output in the same layout and
    stats (N, HT, 2, Cp) per-(sample, row-tile) [sum, sum_sq]."""
    n, h, wc, cp = x.shape
    cpo = w9.shape[2]
    ht = h // th
    hsr = 2 * _GUARD + (th + 2) * wc
    kernel = functools.partial(_conv3x3_kernel, real_w=real_w, wc=wc, th=th,
                               apply_input_act=apply_input_act)
    return pl.pallas_call(
        kernel,
        grid=(n, ht),
        in_specs=[
            # halo row above the tile (clamped at the top border, zeroed in-kernel)
            pl.BlockSpec((1, 1, wc, cp), lambda b, i: (b, jnp.maximum(i * th - 1, 0), 0, 0)),
            # the tile's own TH rows
            pl.BlockSpec((1, th, wc, cp), lambda b, i: (b, i, 0, 0)),
            # halo row below the tile (clamped at the bottom border, zeroed in-kernel)
            pl.BlockSpec((1, 1, wc, cp),
                         lambda b, i: (b, jnp.minimum((i + 1) * th, h - 1), 0, 0)),
            pl.BlockSpec((9, cp, cpo), lambda b, i: (0, 0, 0)),
            pl.BlockSpec((1, cp), lambda b, i: (0, 0)),
            pl.BlockSpec((1, cp), lambda b, i: (0, 0)),
        ],
        out_specs=[
            pl.BlockSpec((1, th, wc, cpo), lambda b, i: (b, i, 0, 0)),
            pl.BlockSpec((1, 1, 2, cpo), lambda b, i: (b, i, 0, 0)),
        ],
        out_shape=(
            jax.ShapeDtypeStruct((n, h, wc, cpo), jnp.bfloat16),
            jax.ShapeDtypeStruct((n, ht, 2, cpo), jnp.float32),
        ),
        scratch_shapes=[pltpu.VMEM((hsr, cp), jnp.bfloat16)],
        compiler_params=pltpu.CompilerParams(
            dimension_semantics=("parallel", "parallel"),
            vmem_limit_bytes=_VMEM_LIMIT,
        ),
    )(x, x, x, w9, scale, shift)


def _bn_add_relu(y, scale, shift, res, *, th, real_w):
    n, h, wc, cp = y.shape
    ht = h // th
    kernel = functools.partial(_bn_add_relu_kernel, real_w=real_w)
    return pl.pallas_call(
        kernel,
        grid=(n, ht),
        in_specs=[
            pl.BlockSpec((1, th, wc, cp), lambda b, i: (b, i, 0, 0)),
            pl.BlockSpec((1, cp), lambda b, i: (0, 0)),
            pl.BlockSpec((1, cp), lambda b, i: (0, 0)),
            pl.BlockSpec((1, th, wc, cp), lambda b, i: (b, i, 0, 0)),
        ],
        out_specs=pl.BlockSpec((1, th, real_w, cp), lambda b, i: (b, i, 0, 0)),
        out_shape=jax.ShapeDtypeStruct((n, h, real_w, cp), jnp.bfloat16),
        compiler_params=pltpu.CompilerParams(
            dimension_semantics=("parallel", "parallel"),
            vmem_limit_bytes=_VMEM_LIMIT,
        ),
    )(y, scale, shift, res)


def _fold_bn(stats, gamma_p, beta_p, count):
    """Finish the cross-(sample, tile) BN reduction and fold into per-channel scale/shift."""
    tot = jnp.sum(stats, axis=(0, 1))                        # (2, Cp)
    mean = tot[0] / count
    var = jnp.maximum(tot[1] / count - mean * mean, 0.0)     # biased variance (PyTorch fwd)
    scale = gamma_p * jax.lax.rsqrt(var + _EPS)
    shift = beta_p - mean * scale
    return scale.reshape(1, -1), shift.reshape(1, -1)


def _pad_last(a, target):
    pad = target - a.shape[-1]
    if pad == 0:
        return a
    return jnp.pad(a, [(0, 0)] * (a.ndim - 1) + [(0, pad)])


def _prep_weight(w, cpi, cpo):
    """PyTorch conv weight (Cout, Cin, 3, 3) -> per-tap (9, Cpi, Cpo) bf16 matrices."""
    cout, cin = w.shape[0], w.shape[1]
    wt = jnp.transpose(w, (2, 3, 1, 0)).reshape(9, cin, cout)
    wt = jnp.pad(wt, ((0, 0), (0, cpi - cin), (0, cpo - cout)))
    return wt.astype(jnp.bfloat16)


@functools.partial(jax.jit, static_argnames=("tile_rows",))
def resblock_forward(x_nchw, w1, b1, g1, be1, w2, b2, g2, be2, *, tile_rows=None):
    """Forward pass of ResBlock (training-mode BN). x_nchw: (N, C, H, W) f32 -> (N, C, H, W)."""
    # A conv bias added before training-mode BN is exactly cancelled by the batch-mean
    # subtraction, so b1/b2 do not affect the forward output.
    del b1, b2

    x = jnp.transpose(x_nchw, (0, 2, 3, 1))                  # NCHW -> NHWC
    n, h, w, c = x.shape
    c_out = w1.shape[0]
    assert c_out == c and w2.shape[0] == c and w2.shape[1] == c_out, \
        "residual add requires in_channels == out_channels"

    cp = _round_up(c, _LANES)          # lane-dense channels
    wc = _round_up(w + 1, 8)           # column-padded width (>= W+1, multiple of 8)
    th = tile_rows if tile_rows is not None else _pick_tile_rows(h, wc)
    assert h % th == 0, f"tile_rows={th} must divide H={h}"
    count = n * h * w

    # Single channel/column-padded bf16 copy of x; it also serves as the residual.
    xp = jnp.pad(x.astype(jnp.bfloat16),
                 ((0, 0), (0, 0), (0, wc - w), (0, cp - c)))
    w1t = _prep_weight(w1, cp, cp)
    w2t = _prep_weight(w2, cp, cp)
    g1p, be1p = _pad_last(g1.astype(jnp.float32), cp), _pad_last(be1.astype(jnp.float32), cp)
    g2p, be2p = _pad_last(g2.astype(jnp.float32), cp), _pad_last(be2.astype(jnp.float32), cp)

    ones = jnp.ones((1, cp), jnp.float32)
    zeros = jnp.zeros((1, cp), jnp.float32)

    # Stage 1: conv1 + per-(sample, tile) BN partial stats.  BN1/ReLU1 fuse into stage 2.
    y1, st1 = _conv3x3(xp, w1t, ones, zeros, th=th, real_w=w, apply_input_act=False)
    s1, t1 = _fold_bn(st1, g1p, be1p, count)

    # Stage 2: (BN1 -> ReLU1 fused on the input path) -> conv2 + BN2 partial stats.
    y2, st2 = _conv3x3(y1, w2t, s1, t1, th=th, real_w=w, apply_input_act=True)
    s2, t2 = _fold_bn(st2, g2p, be2p, count)

    # Stage 3: BN2 -> +residual -> ReLU2 (bf16 writeback, real columns only).
    out = _bn_add_relu(y2, s2, t2, xp, th=th, real_w=w)      # (N, H, W, Cp) bf16

    return jnp.transpose(out[..., :c].astype(jnp.float32), (0, 3, 1, 2))


# ----------------------------------------------------------------------------- reference
def ref_resblock(x_nchw, w1, b1, g1, be1, w2, b2, g2, be2):
    """Pure-JAX f32 reference matching the PyTorch module (training-mode BN)."""
    def conv3x3(xn, w, b):
        nn_, hh, ww, _ = xn.shape
        xpd = jnp.pad(xn, ((0, 0), (1, 1), (1, 1), (0, 0)))
        out = jnp.zeros((nn_, hh, ww, w.shape[0]), jnp.float32)
        for kh in range(3):
            for kw in range(3):
                out = out + jnp.einsum(
                    "nhwc,oc->nhwo", xpd[:, kh:kh + hh, kw:kw + ww, :], w[:, :, kh, kw],
                    preferred_element_type=jnp.float32)
        return out + b

    def bn(z, g, be):
        mean = z.mean(axis=(0, 1, 2), keepdims=True)
        var = ((z - mean) ** 2).mean(axis=(0, 1, 2), keepdims=True)
        return (z - mean) * jax.lax.rsqrt(var + _EPS) * g + be

    x = jnp.transpose(x_nchw, (0, 2, 3, 1)).astype(jnp.float32)
    h1 = jnp.maximum(bn(conv3x3(x, w1, b1), g1, be1), 0.0)
    out = jnp.maximum(bn(conv3x3(h1, w2, b2), g2, be2) + x, 0.0)
    return jnp.transpose(out, (0, 3, 1, 2))


if __name__ == "__main__":
    # Small deterministic shapes: batch=2, channels=8, spatial=16x16.
    N, C, H, W = 2, 8, 16, 16  # residual add requires in_channels == out_channels

    key = jax.random.PRNGKey(0)
    kx, kw1, kb1, kw2, kb2, kg1, kg2, kbe1, kbe2 = jax.random.split(key, 9)
    x = jax.random.normal(kx, (N, C, H, W), jnp.float32)

    w1 = jax.random.normal(kw1, (C, C, 3, 3), jnp.float32) * 0.2
    b1 = jax.random.normal(kb1, (C,), jnp.float32) * 0.1
    w2 = jax.random.normal(kw2, (C, C, 3, 3), jnp.float32) * 0.2
    b2 = jax.random.normal(kb2, (C,), jnp.float32) * 0.1
    g1 = 1.0 + 0.1 * jax.random.normal(kg1, (C,), jnp.float32)
    be1 = 0.1 * jax.random.normal(kbe1, (C,), jnp.float32)
    g2 = 1.0 + 0.1 * jax.random.normal(kg2, (C,), jnp.float32)
    be2 = 0.1 * jax.random.normal(kbe2, (C,), jnp.float32)

    # tile_rows=8 -> grid=(2, 2): exercises the row tiling including top/bottom halo handling.
    y = resblock_forward(x, w1, b1, g1, be1, w2, b2, g2, be2, tile_rows=8)
    y = jax.block_until_ready(y)
    assert y.shape == (N, C, H, W), y.shape

    y_ref = ref_resblock(x, w1, b1, g1, be1, w2, b2, g2, be2)
    max_err = float(jnp.max(jnp.abs(y - y_ref)))
    # Tolerance covers bf16 activations through two conv layers plus the bf16 epilogue
    # writeback (all accumulation and BN/ReLU/residual math is f32); structural bugs would
    # produce O(1) errors.
    assert max_err < 7.5e-2, f"mismatch vs reference: {max_err}"

    print("KERNEL_OK")
</pallas_src>

<mosaic_0001>
module attributes {stable_mosaic.version = 11 : i64} {
  func.func @_conv3x3_kernel(%arg0: i32, %arg1: i32, %arg2: memref<1x1x24x128xbf16, #tpu.memory_space<vmem>>, %arg3: memref<1x8x24x128xbf16, #tpu.memory_space<vmem>>, %arg4: memref<1x1x24x128xbf16, #tpu.memory_space<vmem>>, %arg5: memref<9x128x128xbf16, #tpu.memory_space<vmem>>, %arg6: memref<1x128xf32, #tpu.memory_space<vmem>>, %arg7: memref<1x128xf32, #tpu.memory_space<vmem>>, %arg8: memref<1x8x24x128xbf16, #tpu.memory_space<vmem>>, %arg9: memref<1x1x2x128xf32, #tpu.memory_space<vmem>>, %arg10: memref<256x128xbf16, #tpu.memory_space<vmem>>) attributes {dimension_semantics = [#tpu.dimension_semantics<parallel>, #tpu.dimension_semantics<parallel>], iteration_bounds = array<i64: 2, 2>, scalar_prefetch = 0 : i64, scratch_operands = 1 : i64, tpu.core_type = #tpu.core_type<tc>, window_params = [{transform_indices = @transform_0, window_bounds = array<i64: 1, 1, 24, 128>}, {transform_indices = @transform_1, window_bounds = array<i64: 1, 8, 24, 128>}, {transform_indices = @transform_2, window_bounds = array<i64: 1, 1, 24, 128>}, {pipeline_mode = #tpu.pipeline_mode<synchronous>, transform_indices = @transform_3, window_bounds = array<i64: 9, 128, 128>}, {pipeline_mode = #tpu.pipeline_mode<synchronous>, transform_indices = @transform_4, window_bounds = array<i64: 1, 128>}, {pipeline_mode = #tpu.pipeline_mode<synchronous>, transform_indices = @transform_5, window_bounds = array<i64: 1, 128>}, {transform_indices = @transform_6, window_bounds = array<i64: 1, 8, 24, 128>}, {transform_indices = @transform_7, window_bounds = array<i64: 1, 1, 2, 128>}]} {
    %c0_i32 = arith.constant 0 : i32
    %0 = arith.cmpi eq, %arg1, %c0_i32 : i32
    %c1_i32 = arith.constant 1 : i32
    %1 = arith.cmpi eq, %arg1, %c1_i32 : i32
    %cst = arith.constant 0.000000e+00 : bf16
    %2 = vector.broadcast %cst : bf16 to vector<8x128xbf16>
    %c0 = arith.constant 0 : index
    %c0_0 = arith.constant 0 : index
    %3 = vector.load %arg10[%c0, %c0_0] : memref<256x128xbf16, #tpu.memory_space<vmem>>, vector<8x128xbf16>
    tpu.vector_store %arg10[%c0, %c0_0], %2 {strides = array<i32>} : memref<256x128xbf16, #tpu.memory_space<vmem>>, vector<8x128xbf16>,
    %c248 = arith.constant 248 : index
    %c0_1 = arith.constant 0 : index
    %4 = vector.load %arg10[%c248, %c0_1] : memref<256x128xbf16, #tpu.memory_space<vmem>>, vector<8x128xbf16>
    tpu.vector_store %arg10[%c248, %c0_1], %2 {strides = array<i32>} : memref<256x128xbf16, #tpu.memory_space<vmem>>, vector<8x128xbf16>,
    %c0_2 = arith.constant 0 : index
    %c0_3 = arith.constant 0 : index
    %c0_4 = arith.constant 0 : index
    %c0_5 = arith.constant 0 : index
    %5 = vector.load %arg2[%c0_2, %c0_3, %c0_4, %c0_5] : memref<1x1x24x128xbf16, #tpu.memory_space<vmem>>, vector<1x1x24x128xbf16>
    %6 = vector.shape_cast %5 : vector<1x1x24x128xbf16> to vector<24x128xbf16>
    %cst_6 = arith.constant 0.000000e+00 : bf16
    %7 = vector.broadcast %cst_6 : bf16 to vector<24x128xbf16>
    %8 = arith.select %0, %7, %6 : vector<24x128xbf16>
    %c8 = arith.constant 8 : index
    %c0_7 = arith.constant 0 : index
    %9 = vector.load %arg10[%c8, %c0_7] : memref<256x128xbf16, #tpu.memory_space<vmem>>, vector<24x128xbf16>
    tpu.vector_store %arg10[%c8, %c0_7], %8 {strides = array<i32>} : memref<256x128xbf16, #tpu.memory_space<vmem>>, vector<24x128xbf16>,
    %c0_8 = arith.constant 0 : index
    %c0_9 = arith.constant 0 : index
    %c0_10 = arith.constant 0 : index
    %c0_11 = arith.constant 0 : index
    %10 = vector.load %arg3[%c0_8, %c0_9, %c0_10, %c0_11] : memref<1x8x24x128xbf16, #tpu.memory_space<vmem>>, vector<1x8x24x128xbf16>
    %11 = vector.shape_cast %10 : vector<1x8x24x128xbf16> to vector<8x24x128xbf16>
    %12 = vector.shape_cast %11 : vector<8x24x128xbf16> to vector<192x128xbf16>
    %c32 = arith.constant 32 : index
    %c0_12 = arith.constant 0 : index
    %13 = vector.load %arg10[%c32, %c0_12] : memref<256x128xbf16, #tpu.memory_space<vmem>>, vector<192x128xbf16>
    tpu.vector_store %arg10[%c32, %c0_12], %12 {strides = array<i32>} : memref<256x128xbf16, #tpu.memory_space<vmem>>, vector<192x128xbf16>,
    %c0_13 = arith.constant 0 : index
    %c0_14 = arith.constant 0 : index
    %c0_15 = arith.constant 0 : index
    %c0_16 = arith.constant 0 : index
    %14 = vector.load %arg4[%c0_13, %c0_14, %c0_15, %c0_16] : memref<1x1x24x128xbf16, #tpu.memory_space<vmem>>, vector<1x1x24x128xbf16>
    %15 = vector.shape_cast %14 : vector<1x1x24x128xbf16> to vector<24x128xbf16>
    %cst_17 = arith.constant 0.000000e+00 : bf16
    %16 = vector.broadcast %cst_17 : bf16 to vector<24x128xbf16>
    %17 = arith.select %1, %16, %15 : vector<24x128xbf16>
    %c224 = arith.constant 224 : index
    %c0_18 = arith.constant 0 : index
    %18 = vector.load %arg10[%c224, %c0_18] : memref<256x128xbf16, #tpu.memory_space<vmem>>, vector<24x128xbf16>
    tpu.vector_store %arg10[%c224, %c0_18], %17 {strides = array<i32>} : memref<256x128xbf16, #tpu.memory_space<vmem>>, vector<24x128xbf16>,
    %c7 = arith.constant 7 : index
    %c0_19 = arith.constant 0 : index
    %19 = vector.load %arg10[%c7, %c0_19] : memref<256x128xbf16, #tpu.memory_space<vmem>>, vector<192x128xbf16>
    %c0_20 = arith.constant 0 : index
    %c0_21 = arith.constant 0 : index
    %c0_22 = arith.constant 0 : index
    %20 = vector.load %arg5[%c0_20, %c0_21, %c0_22] : memref<9x128x128xbf16, #tpu.memory_space<vmem>>, vector<1x128x128xbf16>
    %21 = vector.shape_cast %20 : vector<1x128x128xbf16> to vector<128x128xbf16>
    %cst_23 = arith.constant dense<0.000000e+00> : vector<192x128xf32>
    %22 = tpu.matmul %19, %21, %cst_23 {dimension_numbers = #tpu.dot_dimension_numbers<[1], [0], [0], [1], [0, 0, 1, 1], [], []>} : vector<192x128xbf16>, vector<128x128xbf16>, vector<192x128xf32> -> vector<192x128xf32>
    %c8_24 = arith.constant 8 : index
    %c0_25 = arith.constant 0 : index
    %23 = vector.load %arg10[%c8_24, %c0_25] : memref<256x128xbf16, #tpu.memory_space<vmem>>, vector<192x128xbf16>
    %c1 = arith.constant 1 : index
    %c0_26 = arith.constant 0 : index
    %c0_27 = arith.constant 0 : index
    %24 = vector.load %arg5[%c1, %c0_26, %c0_27] : memref<9x128x128xbf16, #tpu.memory_space<vmem>>, vector<1x128x128xbf16>
    %25 = vector.shape_cast %24 : vector<1x128x128xbf16> to vector<128x128xbf16>
    %cst_28 = arith.constant dense<0.000000e+00> : vector<192x128xf32>
    %26 = tpu.matmul %23, %25, %cst_28 {dimension_numbers = #tpu.dot_dimension_numbers<[1], [0], [0], [1], [0, 0, 1, 1], [], []>} : vector<192x128xbf16>, vector<128x128xbf16>, vector<192x128xf32> -> vector<192x128xf32>
    %27 = arith.addf %22, %26 : vector<192x128xf32>
    %c9 = arith.constant 9 : index
    %c0_29 = arith.constant 0 : index
    %28 = vector.load %arg10[%c9, %c0_29] : memref<256x128xbf16, #tpu.memory_space<vmem>>, vector<192x128xbf16>
    %c2 = arith.constant 2 : index
    %c0_30 = arith.constant 0 : index
    %c0_31 = arith.constant 0 : index
    %29 = vector.load %arg5[%c2, %c0_30, %c0_31] : memref<9x128x128xbf16, #tpu.memory_space<vmem>>, vector<1x128x128xbf16>
    %30 = vector.shape_cast %29 : vector<1x128x128xbf16> to vector<128x128xbf16>
    %cst_32 = arith.constant dense<0.000000e+00> : vector<192x128xf32>
    %31 = tpu.matmul %28, %30, %cst_32 {dimension_numbers = #tpu.dot_dimension_numbers<[1], [0], [0], [1], [0, 0, 1, 1], [], []>} : vector<192x128xbf16>, vector<128x128xbf16>, vector<192x128xf32> -> vector<192x128xf32>
    %32 = arith.addf %27, %31 : vector<192x128xf32>
    %c31 = arith.constant 31 : index
    %c0_33 = arith.constant 0 : index
    %33 = vector.load %arg10[%c31, %c0_33] : memref<256x128xbf16, #tpu.memory_space<vmem>>, vector<192x128xbf16>
    %c3 = arith.constant 3 : index
    %c0_34 = arith.constant 0 : index
    %c0_35 = arith.constant 0 : index
    %34 = vector.load %arg5[%c3, %c0_34, %c0_35] : memref<9x128x128xbf16, #tpu.memory_space<vmem>>, vector<1x128x128xbf16>
    %35 = vector.shape_cast %34 : vector<1x128x128xbf16> to vector<128x128xbf16>
    %cst_36 = arith.constant dense<0.000000e+00> : vector<192x128xf32>
    %36 = tpu.matmul %33, %35, %cst_36 {dimension_numbers = #tpu.dot_dimension_numbers<[1], [0], [0], [1], [0, 0, 1, 1], [], []>} : vector<192x128xbf16>, vector<128x128xbf16>, vector<192x128xf32> -> vector<192x128xf32>
    %37 = arith.addf %32, %36 : vector<192x128xf32>
    %c32_37 = arith.constant 32 : index
    %c0_38 = arith.constant 0 : index
    %38 = vector.load %arg10[%c32_37, %c0_38] : memref<256x128xbf16, #tpu.memory_space<vmem>>, vector<192x128xbf16>
    %c4 = arith.constant 4 : index
    %c0_39 = arith.constant 0 : index
    %c0_40 = arith.constant 0 : index
    %39 = vector.load %arg5[%c4, %c0_39, %c0_40] : memref<9x128x128xbf16, #tpu.memory_space<vmem>>, vector<1x128x128xbf16>
    %40 = vector.shape_cast %39 : vector<1x128x128xbf16> to vector<128x128xbf16>
    %cst_41 = arith.constant dense<0.000000e+00> : vector<192x128xf32>
    %41 = tpu.matmul %38, %40, %cst_41 {dimension_numbers = #tpu.dot_dimension_numbers<[1], [0], [0], [1], [0, 0, 1, 1], [], []>} : vector<192x128xbf16>, vector<128x128xbf16>, vector<192x128xf32> -> vector<192x128xf32>
    %42 = arith.addf %37, %41 : vector<192x128xf32>
    %c33 = arith.constant 33 : index
    %c0_42 = arith.constant 0 : index
    %43 = vector.load %arg10[%c33, %c0_42] : memref<256x128xbf16, #tpu.memory_space<vmem>>, vector<192x128xbf16>
    %c5 = arith.constant 5 : index
    %c0_43 = arith.constant 0 : index
    %c0_44 = arith.constant 0 : index
    %44 = vector.load %arg5[%c5, %c0_43, %c0_44] : memref<9x128x128xbf16, #tpu.memory_space<vmem>>, vector<1x128x128xbf16>
    %45 = vector.shape_cast %44 : vector<1x128x128xbf16> to vector<128x128xbf16>
    %cst_45 = arith.constant dense<0.000000e+00> : vector<192x128xf32>
    %46 = tpu.matmul %43, %45, %cst_45 {dimension_numbers = #tpu.dot_dimension_numbers<[1], [0], [0], [1], [0, 0, 1, 1], [], []>} : vector<192x128xbf16>, vector<128x128xbf16>, vector<192x128xf32> -> vector<192x128xf32>
    %47 = arith.addf %42, %46 : vector<192x128xf32>
    %c55 = arith.constant 55 : index
    %c0_46 = arith.constant 0 : index
    %48 = vector.load %arg10[%c55, %c0_46] : memref<256x128xbf16, #tpu.memory_space<vmem>>, vector<192x128xbf16>
    %c6 = arith.constant 6 : index
    %c0_47 = arith.constant 0 : index
    %c0_48 = arith.constant 0 : index
    %49 = vector.load %arg5[%c6, %c0_47, %c0_48] : memref<9x128x128xbf16, #tpu.memory_space<vmem>>, vector<1x128x128xbf16>
    %50 = vector.shape_cast %49 : vector<1x128x128xbf16> to vector<128x128xbf16>
    %cst_49 = arith.constant dense<0.000000e+00> : vector<192x128xf32>
    %51 = tpu.matmul %48, %50, %cst_49 {dimension_numbers = #tpu.dot_dimension_numbers<[1], [0], [0], [1], [0, 0, 1, 1], [], []>} : vector<192x128xbf16>, vector<128x128xbf16>, vector<192x128xf32> -> vector<192x128xf32>
    %52 = arith.addf %47, %51 : vector<192x128xf32>
    %c56 = arith.constant 56 : index
    %c0_50 = arith.constant 0 : index
    %53 = vector.load %arg10[%c56, %c0_50] : memref<256x128xbf16, #tpu.memory_space<vmem>>, vector<192x128xbf16>
    %c7_51 = arith.constant 7 : index
    %c0_52 = arith.constant 0 : index
    %c0_53 = arith.constant 0 : index
    %54 = vector.load %arg5[%c7_51, %c0_52, %c0_53] : memref<9x128x128xbf16, #tpu.memory_space<vmem>>, vector<1x128x128xbf16>
    %55 = vector.shape_cast %54 : vector<1x128x128xbf16> to vector<128x128xbf16>
    %cst_54 = arith.constant dense<0.000000e+00> : vector<192x128xf32>
    %56 = tpu.matmul %53, %55, %cst_54 {dimension_numbers = #tpu.dot_dimension_numbers<[1], [0], [0], [1], [0, 0, 1, 1], [], []>} : vector<192x128xbf16>, vector<128x128xbf16>, vector<192x128xf32> -> vector<192x128xf32>
    %57 = arith.addf %52, %56 : vector<192x128xf32>
    %c57 = arith.constant 57 : index
    %c0_55 = arith.constant 0 : index
    %58 = vector.load %arg10[%c57, %c0_55] : memref<256x128xbf16, #tpu.memory_space<vmem>>, vector<192x128xbf16>
    %c8_56 = arith.constant 8 : index
    %c0_57 = arith.constant 0 : index
    %c0_58 = arith.constant 0 : index
    %59 = vector.load %arg5[%c8_56, %c0_57, %c0_58] : memref<9x128x128xbf16, #tpu.memory_space<vmem>>, vector<1x128x128xbf16>
    %60 = vector.shape_cast %59 : vector<1x128x128xbf16> to vector<128x128xbf16>
    %cst_59 = arith.constant dense<0.000000e+00> : vector<192x128xf32>
    %61 = tpu.matmul %58, %60, %cst_59 {dimension_numbers = #tpu.dot_dimension_numbers<[1], [0], [0], [1], [0, 0, 1, 1], [], []>} : vector<192x128xbf16>, vector<128x128xbf16>, vector<192x128xf32> -> vector<192x128xf32>
    %62 = arith.addf %57, %61 : vector<192x128xf32>
    %63 = tpu.iota {dimensions = array<i32: 0>} : vector<192x1xi32>
    %c24_i32 = arith.constant 24 : i32
    %c0_i32_60 = arith.constant 0 : i32
    %64 = arith.cmpi eq, %c24_i32, %c0_i32_60 : i32
    %c1_i32_61 = arith.constant 1 : i32
    %65 = arith.select %64, %c1_i32_61, %c24_i32 : i32
    %66 = vector.broadcast %65 : i32 to vector<192x1xi32>
    %67 = arith.remsi %63, %66 : vector<192x1xi32>
    %c0_i32_62 = arith.constant 0 : i32
    %68 = vector.broadcast %c0_i32_62 : i32 to vector<192x1xi32>
    %69 = arith.cmpi ne, %67, %68 : vector<192x1xi32>
    %c0_i32_63 = arith.constant 0 : i32
    %70 = vector.broadcast %c0_i32_63 : i32 to vector<192x1xi32>
    %71 = arith.cmpi slt, %67, %70 : vector<192x1xi32>
    %c0_i32_64 = arith.constant 0 : i32
    %72 = arith.cmpi slt, %65, %c0_i32_64 : i32
    %73 = vector.broadcast %72 : i1 to vector<192x1xi1>
    %74 = vector.broadcast %73 : vector<192x1xi1> to vector<192x1xi1>
    %75 = arith.xori %71, %74 : vector<192x1xi1>
    %76 = arith.andi %75, %69 : vector<192x1xi1>
    %77 = vector.broadcast %65 : i32 to vector<192x1xi32>
    %78 = arith.addi %67, %77 : vector<192x1xi32>
    %79 = arith.select %76, %78, %67 : vector<192x1xi1>, vector<192x1xi32>
    %c16_i32 = arith.constant 16 : i32
    %80 = vector.broadcast %c16_i32 : i32 to vector<192x1xi32>
    %81 = arith.cmpi slt, %79, %80 : vector<192x1xi32>
    %cst_65 = arith.constant 0.000000e+00 : f32
    %82 = vector.shape_cast %81 : vector<192x1xi1> to vector<192x1xi1>
    %83 = vector.broadcast %82 : vector<192x1xi1> to vector<192x128xi1>
    %84 = vector.broadcast %cst_65 : f32 to vector<192x128xf32>
    %85 = arith.select %83, %62, %84 : vector<192x128xi1>, vector<192x128xf32>
    %86 = vector.shape_cast %85 : vector<192x128xf32> to vector<8x24x128xf32>
    %87 = arith.truncf %86 : vector<8x24x128xf32> to vector<8x24x128xbf16>
    %c0_66 = arith.constant 0 : index
    %c0_67 = arith.constant 0 : index
    %c0_68 = arith.constant 0 : index
    %c0_69 = arith.constant 0 : index
    %88 = vector.load %arg8[%c0_66, %c0_67, %c0_68, %c0_69] : memref<1x8x24x128xbf16, #tpu.memory_space<vmem>>, vector<1x8x24x128xbf16>
    %89 = vector.shape_cast %88 : vector<1x8x24x128xbf16> to vector<8x24x128xbf16>
    %90 = vector.shape_cast %87 : vector<8x24x128xbf16> to vector<1x8x24x128xbf16>
    tpu.vector_store %arg8[%c0_66, %c0_67, %c0_68, %c0_69], %90 {strides = array<i32>} : memref<1x8x24x128xbf16, #tpu.memory_space<vmem>>, vector<1x8x24x128xbf16>,
    %cst_70 = arith.constant dense<0.000000e+00> : vector<128xf32>
    %91 = vector.multi_reduction <add>, %85, %cst_70 [0] : vector<192x128xf32> to vector<128xf32>
    %92 = vector.shape_cast %91 : vector<128xf32> to vector<1x128xf32>
    %c0_71 = arith.constant 0 : index
    %c0_72 = arith.constant 0 : index
    %c0_73 = arith.constant 0 : index
    %c0_74 = arith.constant 0 : index
    %93 = vector.load %arg9[%c0_71, %c0_72, %c0_73, %c0_74] : memref<1x1x2x128xf32, #tpu.memory_space<vmem>>, vector<1x1x1x128xf32>
    %94 = vector.shape_cast %93 : vector<1x1x1x128xf32> to vector<1x128xf32>
    %95 = vector.shape_cast %92 : vector<1x128xf32> to vector<1x1x1x128xf32>
    tpu.vector_store %arg9[%c0_71, %c0_72, %c0_73, %c0_74], %95 {strides = array<i32>} : memref<1x1x2x128xf32, #tpu.memory_space<vmem>>, vector<1x1x1x128xf32>,
    %96 = arith.mulf %85, %85 : vector<192x128xf32>
    %cst_75 = arith.constant dense<0.000000e+00> : vector<128xf32>
    %97 = vector.multi_reduction <add>, %96, %cst_75 [0] : vector<192x128xf32> to vector<128xf32>
    %98 = vector.shape_cast %97 : vector<128xf32> to vector<1x128xf32>
    %c0_76 = arith.constant 0 : index
    %c0_77 = arith.constant 0 : index
    %c1_78 = arith.constant 1 : index
    %c0_79 = arith.constant 0 : index
    %99 = vector.load %arg9[%c0_76, %c0_77, %c1_78, %c0_79] : memref<1x1x2x128xf32, #tpu.memory_space<vmem>>, vector<1x1x1x128xf32>
    %100 = vector.shape_cast %99 : vector<1x1x1x128xf32> to vector<1x128xf32>
    %101 = vector.shape_cast %98 : vector<1x128xf32> to vector<1x1x1x128xf32>
    tpu.vector_store %arg9[%c0_76, %c0_77, %c1_78, %c0_79], %101 {strides = array<i32>} : memref<1x1x2x128xf32, #tpu.memory_space<vmem>>, vector<1x1x1x128xf32>,
    return
  }
  func.func @transform_0(%arg0: i32, %arg1: i32) -> (i32, i32, i32, i32) {
    %c8_i32 = arith.constant 8 : i32
    %0 = arith.muli %arg1, %c8_i32 : i32
    %c1_i32 = arith.constant 1 : i32
    %1 = arith.subi %0, %c1_i32 : i32
    %c0_i32 = arith.constant 0 : i32
    %2 = arith.maxsi %1, %c0_i32 : i32
    %c0_i32_0 = arith.constant 0 : i32
    %c0_i32_1 = arith.constant 0 : i32
    %c0_i32_2 = arith.constant 0 : i32
    return %arg0, %2, %c0_i32_0, %c0_i32_1 : i32, i32, i32, i32
  }
  func.func @transform_1(%arg0: i32, %arg1: i32) -> (i32, i32, i32, i32) {
    %c0_i32 = arith.constant 0 : i32
    %c0_i32_0 = arith.constant 0 : i32
    %c0_i32_1 = arith.constant 0 : i32
    return %arg0, %arg1, %c0_i32, %c0_i32_0 : i32, i32, i32, i32
  }
  func.func @transform_2(%arg0: i32, %arg1: i32) -> (i32, i32, i32, i32) {
    %c1_i32 = arith.constant 1 : i32
    %0 = arith.addi %arg1, %c1_i32 : i32
    %c8_i32 = arith.constant 8 : i32
    %1 = arith.muli %0, %c8_i32 : i32
    %c15_i32 = arith.constant 15 : i32
    %2 = arith.minsi %1, %c15_i32 : i32
    %c0_i32 = arith.constant 0 : i32
    %c0_i32_0 = arith.constant 0 : i32
    %c0_i32_1 = arith.constant 0 : i32
    return %arg0, %2, %c0_i32, %c0_i32_0 : i32, i32, i32, i32
  }
  func.func @transform_3(%arg0: i32, %arg1: i32) -> (i32, i32, i32) {
    %c0_i32 = arith.constant 0 : i32
    %c0_i32_0 = arith.constant 0 : i32
    %c0_i32_1 = arith.constant 0 : i32
    %c0_i32_2 = arith.constant 0 : i32
    return %c0_i32, %c0_i32_0, %c0_i32_1 : i32, i32, i32
  }
  func.func @transform_4(%arg0: i32, %arg1: i32) -> (i32, i32) {
    %c0_i32 = arith.constant 0 : i32
    %c0_i32_0 = arith.constant 0 : i32
    %c0_i32_1 = arith.constant 0 : i32
    return %c0_i32, %c0_i32_0 : i32, i32
  }
  func.func @transform_5(%arg0: i32, %arg1: i32) -> (i32, i32) {
    %c0_i32 = arith.constant 0 : i32
    %c0_i32_0 = arith.constant 0 : i32
    %c0_i32_1 = arith.constant 0 : i32
    return %c0_i32, %c0_i32_0 : i32, i32
  }
  func.func @transform_6(%arg0: i32, %arg1: i32) -> (i32, i32, i32, i32) {
    %c0_i32 = arith.constant 0 : i32
    %c0_i32_0 = arith.constant 0 : i32
    %c0_i32_1 = arith.constant 0 : i32
    return %arg0, %arg1, %c0_i32, %c0_i32_0 : i32, i32, i32, i32
  }
  func.func @transform_7(%arg0: i32, %arg1: i32) -> (i32, i32, i32, i32) {
    %c0_i32 = arith.constant 0 : i32
    %c0_i32_0 = arith.constant 0 : i32
    %c0_i32_1 = arith.constant 0 : i32
    return %arg0, %arg1, %c0_i32, %c0_i32_0 : i32, i32, i32, i32
  }
}

module attributes {stable_mosaic.version = 11 : i64} {
  func.func @_bn_add_relu_kernel(%arg0: i32, %arg1: i32, %arg2: memref<1x8x24x128xbf16, #tpu.memory_space<vmem>>, %arg3: memref<1x128xf32, #tpu.memory_space<vmem>>, %arg4: memref<1x128xf32, #tpu.memory_space<vmem>>, %arg5: memref<1x8x24x128xbf16, #tpu.memory_space<vmem>>, %arg6: memref<1x8x16x128xbf16, #tpu.memory_space<vmem>>) attributes {dimension_semantics = [#tpu.dimension_semantics<parallel>, #tpu.dimension_semantics<parallel>], iteration_bounds = array<i64: 2, 2>, scalar_prefetch = 0 : i64, scratch_operands = 0 : i64, tpu.core_type = #tpu.core_type<tc>, window_params = [{transform_indices = @transform_0, window_bounds = array<i64: 1, 8, 24, 128>}, {pipeline_mode = #tpu.pipeline_mode<synchronous>, transform_indices = @transform_1, window_bounds = array<i64: 1, 128>}, {pipeline_mode = #tpu.pipeline_mode<synchronous>, transform_indices = @transform_2, window_bounds = array<i64: 1, 128>}, {transform_indices = @transform_3, window_bounds = array<i64: 1, 8, 24, 128>}, {transform_indices = @transform_4, window_bounds = array<i64: 1, 8, 16, 128>}]} {
    %c0 = arith.constant 0 : index
    %c0_0 = arith.constant 0 : index
    %c0_1 = arith.constant 0 : index
    %c0_2 = arith.constant 0 : index
    %0 = vector.load %arg2[%c0, %c0_0, %c0_1, %c0_2] : memref<1x8x24x128xbf16, #tpu.memory_space<vmem>>, vector<1x8x24x128xbf16>
    %1 = vector.shape_cast %0 : vector<1x8x24x128xbf16> to vector<8x24x128xbf16>
    %2 = arith.extf %1 : vector<8x24x128xbf16> to vector<8x24x128xf32>
    %c0_3 = arith.constant 0 : index
    %c0_4 = arith.constant 0 : index
    %c0_5 = arith.constant 0 : index
    %c0_6 = arith.constant 0 : index
    %3 = vector.load %arg5[%c0_3, %c0_4, %c0_5, %c0_6] : memref<1x8x24x128xbf16, #tpu.memory_space<vmem>>, vector<1x8x24x128xbf16>
    %4 = vector.shape_cast %3 : vector<1x8x24x128xbf16> to vector<8x24x128xbf16>
    %5 = arith.extf %4 : vector<8x24x128xbf16> to vector<8x24x128xf32>
    %c0_7 = arith.constant 0 : index
    %c0_8 = arith.constant 0 : index
    %6 = vector.load %arg3[%c0_7, %c0_8] : memref<1x128xf32, #tpu.memory_space<vmem>>, vector<1x128xf32>
    %7 = vector.shape_cast %6 : vector<1x128xf32> to vector<1x1x128xf32>
    %8 = vector.broadcast %7 : vector<1x1x128xf32> to vector<8x24x128xf32>
    %9 = arith.mulf %2, %8 : vector<8x24x128xf32>
    %c0_9 = arith.constant 0 : index
    %c0_10 = arith.constant 0 : index
    %10 = vector.load %arg4[%c0_9, %c0_10] : memref<1x128xf32, #tpu.memory_space<vmem>>, vector<1x128xf32>
    %11 = vector.shape_cast %10 : vector<1x128xf32> to vector<1x1x128xf32>
    %12 = vector.broadcast %11 : vector<1x1x128xf32> to vector<8x24x128xf32>
    %13 = arith.addf %9, %12 : vector<8x24x128xf32>
    %14 = arith.addf %13, %5 : vector<8x24x128xf32>
    %cst = arith.constant 0.000000e+00 : f32
    %15 = vector.broadcast %cst : f32 to vector<8x24x128xf32>
    %16 = arith.maximumf %14, %15 : vector<8x24x128xf32>
    %17 = vector.extract_strided_slice %16 {offsets = [0, 0, 0], sizes = [8, 16, 128], strides = [1, 1, 1]} : vector<8x24x128xf32> to vector<8x16x128xf32>
    %18 = arith.truncf %17 : vector<8x16x128xf32> to vector<8x16x128xbf16>
    %c0_11 = arith.constant 0 : index
    %c0_12 = arith.constant 0 : index
    %c0_13 = arith.constant 0 : index
    %c0_14 = arith.constant 0 : index
    %19 = vector.load %arg6[%c0_11, %c0_12, %c0_13, %c0_14] : memref<1x8x16x128xbf16, #tpu.memory_space<vmem>>, vector<1x8x16x128xbf16>
    %20 = vector.shape_cast %19 : vector<1x8x16x128xbf16> to vector<8x16x128xbf16>
    %21 = vector.shape_cast %18 : vector<8x16x128xbf16> to vector<1x8x16x128xbf16>
    tpu.vector_store %arg6[%c0_11, %c0_12, %c0_13, %c0_14], %21 {strides = array<i32>} : memref<1x8x16x128xbf16, #tpu.memory_space<vmem>>, vector<1x8x16x128xbf16>,
    return
  }
  func.func @transform_0(%arg0: i32, %arg1: i32) -> (i32, i32, i32, i32) {
    %c0_i32 = arith.constant 0 : i32
    %c0_i32_0 = arith.constant 0 : i32
    %c0_i32_1 = arith.constant 0 : i32
    return %arg0, %arg1, %c0_i32, %c0_i32_0 : i32, i32, i32, i32
  }
  func.func @transform_1(%arg0: i32, %arg1: i32) -> (i32, i32) {
    %c0_i32 = arith.constant 0 : i32
    %c0_i32_0 = arith.constant 0 : i32
    %c0_i32_1 = arith.constant 0 : i32
    return %c0_i32, %c0_i32_0 : i32, i32
  }
  func.func @transform_2(%arg0: i32, %arg1: i32) -> (i32, i32) {
    %c0_i32 = arith.constant 0 : i32
    %c0_i32_0 = arith.constant 0 : i32
    %c0_i32_1 = arith.constant 0 : i32
    return %c0_i32, %c0_i32_0 : i32, i32
  }
  func.func @transform_3(%arg0: i32, %arg1: i32) -> (i32, i32, i32, i32) {
    %c0_i32 = arith.constant 0 : i32
    %c0_i32_0 = arith.constant 0 : i32
    %c0_i32_1 = arith.constant 0 : i32
    return %arg0, %arg1, %c0_i32, %c0_i32_0 : i32, i32, i32, i32
  }
  func.func @transform_4(%arg0: i32, %arg1: i32) -> (i32, i32, i32, i32) {
    %c0_i32 = arith.constant 0 : i32
    %c0_i32_0 = arith.constant 0 : i32
    %c0_i32_1 = arith.constant 0 : i32
    return %arg0, %arg1, %c0_i32, %c0_i32_0 : i32, i32, i32, i32
  }
}

module attributes {stable_mosaic.version = 11 : i64} {
  func.func @_conv3x3_kernel(%arg0: i32, %arg1: i32, %arg2: memref<1x1x24x128xbf16, #tpu.memory_space<vmem>>, %arg3: memref<1x8x24x128xbf16, #tpu.memory_space<vmem>>, %arg4: memref<1x1x24x128xbf16, #tpu.memory_space<vmem>>, %arg5: memref<9x128x128xbf16, #tpu.memory_space<vmem>>, %arg6: memref<1x128xf32, #tpu.memory_space<vmem>>, %arg7: memref<1x128xf32, #tpu.memory_space<vmem>>, %arg8: memref<1x8x24x128xbf16, #tpu.memory_space<vmem>>, %arg9: memref<1x1x2x128xf32, #tpu.memory_space<vmem>>, %arg10: memref<256x128xbf16, #tpu.memory_space<vmem>>) attributes {dimension_semantics = [#tpu.dimension_semantics<parallel>, #tpu.dimension_semantics<parallel>], iteration_bounds = array<i64: 2, 2>, scalar_prefetch = 0 : i64, scratch_operands = 1 : i64, tpu.core_type = #tpu.core_type<tc>, window_params = [{transform_indices = @transform_0, window_bounds = array<i64: 1, 1, 24, 128>}, {transform_indices = @transform_1, window_bounds = array<i64: 1, 8, 24, 128>}, {transform_indices = @transform_2, window_bounds = array<i64: 1, 1, 24, 128>}, {pipeline_mode = #tpu.pipeline_mode<synchronous>, transform_indices = @transform_3, window_bounds = array<i64: 9, 128, 128>}, {pipeline_mode = #tpu.pipeline_mode<synchronous>, transform_indices = @transform_4, window_bounds = array<i64: 1, 128>}, {pipeline_mode = #tpu.pipeline_mode<synchronous>, transform_indices = @transform_5, window_bounds = array<i64: 1, 128>}, {transform_indices = @transform_6, window_bounds = array<i64: 1, 8, 24, 128>}, {transform_indices = @transform_7, window_bounds = array<i64: 1, 1, 2, 128>}]} {
    %c0_i32 = arith.constant 0 : i32
    %0 = arith.cmpi eq, %arg1, %c0_i32 : i32
    %c1_i32 = arith.constant 1 : i32
    %1 = arith.cmpi eq, %arg1, %c1_i32 : i32
    %2 = tpu.iota {dimensions = array<i32: 0>} : vector<24x1xi32>
    %c16_i32 = arith.constant 16 : i32
    %3 = vector.broadcast %c16_i32 : i32 to vector<24x1xi32>
    %4 = arith.cmpi slt, %2, %3 : vector<24x1xi32>
    %cst = arith.constant 0.000000e+00 : bf16
    %5 = vector.broadcast %cst : bf16 to vector<8x128xbf16>
    %c0 = arith.constant 0 : index
    %c0_0 = arith.constant 0 : index
    %6 = vector.load %arg10[%c0, %c0_0] : memref<256x128xbf16, #tpu.memory_space<vmem>>, vector<8x128xbf16>
    tpu.vector_store %arg10[%c0, %c0_0], %5 {strides = array<i32>} : memref<256x128xbf16, #tpu.memory_space<vmem>>, vector<8x128xbf16>,
    %c248 = arith.constant 248 : index
    %c0_1 = arith.constant 0 : index
    %7 = vector.load %arg10[%c248, %c0_1] : memref<256x128xbf16, #tpu.memory_space<vmem>>, vector<8x128xbf16>
    tpu.vector_store %arg10[%c248, %c0_1], %5 {strides = array<i32>} : memref<256x128xbf16, #tpu.memory_space<vmem>>, vector<8x128xbf16>,
    %c0_2 = arith.constant 0 : index
    %c0_3 = arith.constant 0 : index
    %c0_4 = arith.constant 0 : index
    %c0_5 = arith.constant 0 : index
    %8 = vector.load %arg2[%c0_2, %c0_3, %c0_4, %c0_5] : memref<1x1x24x128xbf16, #tpu.memory_space<vmem>>, vector<1x1x24x128xbf16>
    %9 = vector.shape_cast %8 : vector<1x1x24x128xbf16> to vector<24x128xbf16>
    %10 = arith.extf %9 : vector<24x128xbf16> to vector<24x128xf32>
    %c0_6 = arith.constant 0 : index
    %c0_7 = arith.constant 0 : index
    %11 = vector.load %arg6[%c0_6, %c0_7] : memref<1x128xf32, #tpu.memory_space<vmem>>, vector<1x128xf32>
    %12 = vector.broadcast %11 : vector<1x128xf32> to vector<24x128xf32>
    %13 = arith.mulf %10, %12 : vector<24x128xf32>
    %c0_8 = arith.constant 0 : index
    %c0_9 = arith.constant 0 : index
    %14 = vector.load %arg7[%c0_8, %c0_9] : memref<1x128xf32, #tpu.memory_space<vmem>>, vector<1x128xf32>
    %15 = vector.broadcast %14 : vector<1x128xf32> to vector<24x128xf32>
    %16 = arith.addf %13, %15 : vector<24x128xf32>
    %cst_10 = arith.constant 0.000000e+00 : f32
    %17 = vector.broadcast %cst_10 : f32 to vector<24x128xf32>
    %18 = arith.maximumf %16, %17 : vector<24x128xf32>
    %cst_11 = arith.constant 0.000000e+00 : f32
    %19 = vector.shape_cast %4 : vector<24x1xi1> to vector<24x1xi1>
    %20 = vector.broadcast %19 : vector<24x1xi1> to vector<24x128xi1>
    %21 = vector.broadcast %cst_11 : f32 to vector<24x128xf32>
    %22 = arith.select %20, %18, %21 : vector<24x128xi1>, vector<24x128xf32>
    %23 = arith.truncf %22 : vector<24x128xf32> to vector<24x128xbf16>
    %cst_12 = arith.constant 0.000000e+00 : bf16
    %24 = vector.broadcast %cst_12 : bf16 to vector<24x128xbf16>
    %25 = arith.select %0, %24, %23 : vector<24x128xbf16>
    %c8 = arith.constant 8 : index
    %c0_13 = arith.constant 0 : index
    %26 = vector.load %arg10[%c8, %c0_13] : memref<256x128xbf16, #tpu.memory_space<vmem>>, vector<24x128xbf16>
    tpu.vector_store %arg10[%c8, %c0_13], %25 {strides = array<i32>} : memref<256x128xbf16, #tpu.memory_space<vmem>>, vector<24x128xbf16>,
    %c0_14 = arith.constant 0 : index
    %c0_15 = arith.constant 0 : index
    %c0_16 = arith.constant 0 : index
    %c0_17 = arith.constant 0 : index
    %27 = vector.load %arg3[%c0_14, %c0_15, %c0_16, %c0_17] : memref<1x8x24x128xbf16, #tpu.memory_space<vmem>>, vector<1x8x24x128xbf16>
    %28 = vector.shape_cast %27 : vector<1x8x24x128xbf16> to vector<8x24x128xbf16>
    %29 = arith.extf %28 : vector<8x24x128xbf16> to vector<8x24x128xf32>
    %c0_18 = arith.constant 0 : index
    %c0_19 = arith.constant 0 : index
    %30 = vector.load %arg6[%c0_18, %c0_19] : memref<1x128xf32, #tpu.memory_space<vmem>>, vector<1x128xf32>
    %31 = vector.shape_cast %30 : vector<1x128xf32> to vector<1x1x128xf32>
    %32 = vector.broadcast %31 : vector<1x1x128xf32> to vector<8x24x128xf32>
    %33 = arith.mulf %29, %32 : vector<8x24x128xf32>
    %c0_20 = arith.constant 0 : index
    %c0_21 = arith.constant 0 : index
    %34 = vector.load %arg7[%c0_20, %c0_21] : memref<1x128xf32, #tpu.memory_space<vmem>>, vector<1x128xf32>
    %35 = vector.shape_cast %34 : vector<1x128xf32> to vector<1x1x128xf32>
    %36 = vector.broadcast %35 : vector<1x1x128xf32> to vector<8x24x128xf32>
    %37 = arith.addf %33, %36 : vector<8x24x128xf32>
    %cst_22 = arith.constant 0.000000e+00 : f32
    %38 = vector.broadcast %cst_22 : f32 to vector<8x24x128xf32>
    %39 = arith.maximumf %37, %38 : vector<8x24x128xf32>
    %cst_23 = arith.constant 0.000000e+00 : f32
    %40 = vector.shape_cast %4 : vector<24x1xi1> to vector<1x24x1xi1>
    %41 = vector.broadcast %40 : vector<1x24x1xi1> to vector<8x24x128xi1>
    %42 = vector.broadcast %cst_23 : f32 to vector<8x24x128xf32>
    %43 = arith.select %41, %39, %42 : vector<8x24x128xi1>, vector<8x24x128xf32>
    %44 = arith.truncf %43 : vector<8x24x128xf32> to vector<8x24x128xbf16>
    %45 = vector.shape_cast %44 : vector<8x24x128xbf16> to vector<192x128xbf16>
    %c32 = arith.constant 32 : index
    %c0_24 = arith.constant 0 : index
    %46 = vector.load %arg10[%c32, %c0_24] : memref<256x128xbf16, #tpu.memory_space<vmem>>, vector<192x128xbf16>
    tpu.vector_store %arg10[%c32, %c0_24], %45 {strides = array<i32>} : memref<256x128xbf16, #tpu.memory_space<vmem>>, vector<192x128xbf16>,
    %c0_25 = arith.constant 0 : index
    %c0_26 = arith.constant 0 : index
    %c0_27 = arith.constant 0 : index
    %c0_28 = arith.constant 0 : index
    %47 = vector.load %arg4[%c0_25, %c0_26, %c0_27, %c0_28] : memref<1x1x24x128xbf16, #tpu.memory_space<vmem>>, vector<1x1x24x128xbf16>
    %48 = vector.shape_cast %47 : vector<1x1x24x128xbf16> to vector<24x128xbf16>
    %49 = arith.extf %48 : vector<24x128xbf16> to vector<24x128xf32>
    %c0_29 = arith.constant 0 : index
    %c0_30 = arith.constant 0 : index
    %50 = vector.load %arg6[%c0_29, %c0_30] : memref<1x128xf32, #tpu.memory_space<vmem>>, vector<1x128xf32>
    %51 = vector.broadcast %50 : vector<1x128xf32> to vector<24x128xf32>
    %52 = arith.mulf %49, %51 : vector<24x128xf32>
    %c0_31 = arith.constant 0 : index
    %c0_32 = arith.constant 0 : index
    %53 = vector.load %arg7[%c0_31, %c0_32] : memref<1x128xf32, #tpu.memory_space<vmem>>, vector<1x128xf32>
    %54 = vector.broadcast %53 : vector<1x128xf32> to vector<24x128xf32>
    %55 = arith.addf %52, %54 : vector<24x128xf32>
    %cst_33 = arith.constant 0.000000e+00 : f32
    %56 = vector.broadcast %cst_33 : f32 to vector<24x128xf32>
    %57 = arith.maximumf %55, %56 : vector<24x128xf32>
    %cst_34 = arith.constant 0.000000e+00 : f32
    %58 = vector.shape_cast %4 : vector<24x1xi1> to vector<24x1xi1>
    %59 = vector.broadcast %58 : vector<24x1xi1> to vector<24x128xi1>
    %60 = vector.broadcast %cst_34 : f32 to vector<24x128xf32>
    %61 = arith.select %59, %57, %60 : vector<24x128xi1>, vector<24x128xf32>
    %62 = arith.truncf %61 : vector<24x128xf32> to vector<24x128xbf16>
    %cst_35 = arith.constant 0.000000e+00 : bf16
    %63 = vector.broadcast %cst_35 : bf16 to vector<24x128xbf16>
    %64 = arith.select %1, %63, %62 : vector<24x128xbf16>
    %c224 = arith.constant 224 : index
    %c0_36 = arith.constant 0 : index
    %65 = vector.load %arg10[%c224, %c0_36] : memref<256x128xbf16, #tpu.memory_space<vmem>>, vector<24x128xbf16>
    tpu.vector_store %arg10[%c224, %c0_36], %64 {strides = array<i32>} : memref<256x128xbf16, #tpu.memory_space<vmem>>, vector<24x128xbf16>,
    %c7 = arith.constant 7 : index
    %c0_37 = arith.constant 0 : index
    %66 = vector.load %arg10[%c7, %c0_37] : memref<256x128xbf16, #tpu.memory_space<vmem>>, vector<192x128xbf16>
    %c0_38 = arith.constant 0 : index
    %c0_39 = arith.constant 0 : index
    %c0_40 = arith.constant 0 : index
    %67 = vector.load %arg5[%c0_38, %c0_39, %c0_40] : memref<9x128x128xbf16, #tpu.memory_space<vmem>>, vector<1x128x128xbf16>
    %68 = vector.shape_cast %67 : vector<1x128x128xbf16> to vector<128x128xbf16>
    %cst_41 = arith.constant dense<0.000000e+00> : vector<192x128xf32>
    %69 = tpu.matmul %66, %68, %cst_41 {dimension_numbers = #tpu.dot_dimension_numbers<[1], [0], [0], [1], [0, 0, 1, 1], [], []>} : vector<192x128xbf16>, vector<128x128xbf16>, vector<192x128xf32> -> vector<192x128xf32>
    %c8_42 = arith.constant 8 : index
    %c0_43 = arith.constant 0 : index
    %70 = vector.load %arg10[%c8_42, %c0_43] : memref<256x128xbf16, #tpu.memory_space<vmem>>, vector<192x128xbf16>
    %c1 = arith.constant 1 : index
    %c0_44 = arith.constant 0 : index
    %c0_45 = arith.constant 0 : index
    %71 = vector.load %arg5[%c1, %c0_44, %c0_45] : memref<9x128x128xbf16, #tpu.memory_space<vmem>>, vector<1x128x128xbf16>
    %72 = vector.shape_cast %71 : vector<1x128x128xbf16> to vector<128x128xbf16>
    %cst_46 = arith.constant dense<0.000000e+00> : vector<192x128xf32>
    %73 = tpu.matmul %70, %72, %cst_46 {dimension_numbers = #tpu.dot_dimension_numbers<[1], [0], [0], [1], [0, 0, 1, 1], [], []>} : vector<192x128xbf16>, vector<128x128xbf16>, vector<192x128xf32> -> vector<192x128xf32>
    %74 = arith.addf %69, %73 : vector<192x128xf32>
    %c9 = arith.constant 9 : index
    %c0_47 = arith.constant 0 : index
    %75 = vector.load %arg10[%c9, %c0_47] : memref<256x128xbf16, #tpu.memory_space<vmem>>, vector<192x128xbf16>
    %c2 = arith.constant 2 : index
    %c0_48 = arith.constant 0 : index
    %c0_49 = arith.constant 0 : index
    %76 = vector.load %arg5[%c2, %c0_48, %c0_49] : memref<9x128x128xbf16, #tpu.memory_space<vmem>>, vector<1x128x128xbf16>
    %77 = vector.shape_cast %76 : vector<1x128x128xbf16> to vector<128x128xbf16>
    %cst_50 = arith.constant dense<0.000000e+00> : vector<192x128xf32>
    %78 = tpu.matmul %75, %77, %cst_50 {dimension_numbers = #tpu.dot_dimension_numbers<[1], [0], [0], [1], [0, 0, 1, 1], [], []>} : vector<192x128xbf16>, vector<128x128xbf16>, vector<192x128xf32> -> vector<192x128xf32>
    %79 = arith.addf %74, %78 : vector<192x128xf32>
    %c31 = arith.constant 31 : index
    %c0_51 = arith.constant 0 : index
    %80 = vector.load %arg10[%c31, %c0_51] : memref<256x128xbf16, #tpu.memory_space<vmem>>, vector<192x128xbf16>
    %c3 = arith.constant 3 : index
    %c0_52 = arith.constant 0 : index
    %c0_53 = arith.constant 0 : index
    %81 = vector.load %arg5[%c3, %c0_52, %c0_53] : memref<9x128x128xbf16, #tpu.memory_space<vmem>>, vector<1x128x128xbf16>
    %82 = vector.shape_cast %81 : vector<1x128x128xbf16> to vector<128x128xbf16>
    %cst_54 = arith.constant dense<0.000000e+00> : vector<192x128xf32>
    %83 = tpu.matmul %80, %82, %cst_54 {dimension_numbers = #tpu.dot_dimension_numbers<[1], [0], [0], [1], [0, 0, 1, 1], [], []>} : vector<192x128xbf16>, vector<128x128xbf16>, vector<192x128xf32> -> vector<192x128xf32>
    %84 = arith.addf %79, %83 : vector<192x128xf32>
    %c32_55 = arith.constant 32 : index
    %c0_56 = arith.constant 0 : index
    %85 = vector.load %arg10[%c32_55, %c0_56] : memref<256x128xbf16, #tpu.memory_space<vmem>>, vector<192x128xbf16>
    %c4 = arith.constant 4 : index
    %c0_57 = arith.constant 0 : index
    %c0_58 = arith.constant 0 : index
    %86 = vector.load %arg5[%c4, %c0_57, %c0_58] : memref<9x128x128xbf16, #tpu.memory_space<vmem>>, vector<1x128x128xbf16>
    %87 = vector.shape_cast %86 : vector<1x128x128xbf16> to vector<128x128xbf16>
    %cst_59 = arith.constant dense<0.000000e+00> : vector<192x128xf32>
    %88 = tpu.matmul %85, %87, %cst_59 {dimension_numbers = #tpu.dot_dimension_numbers<[1], [0], [0], [1], [0, 0, 1, 1], [], []>} : vector<192x128xbf16>, vector<128x128xbf16>, vector<192x128xf32> -> vector<192x128xf32>
    %89 = arith.addf %84, %88 : vector<192x128xf32>
    %c33 = arith.constant 33 : index
    %c0_60 = arith.constant 0 : index
    %90 = vector.load %arg10[%c33, %c0_60] : memref<256x128xbf16, #tpu.memory_space<vmem>>, vector<192x128xbf16>
    %c5 = arith.constant 5 : index
    %c0_61 = arith.constant 0 : index
    %c0_62 = arith.constant 0 : index
    %91 = vector.load %arg5[%c5, %c0_61, %c0_62] : memref<9x128x128xbf16, #tpu.memory_space<vmem>>, vector<1x128x128xbf16>
    %92 = vector.shape_cast %91 : vector<1x128x128xbf16> to vector<128x128xbf16>
    %cst_63 = arith.constant dense<0.000000e+00> : vector<192x128xf32>
    %93 = tpu.matmul %90, %92, %cst_63 {dimension_numbers = #tpu.dot_dimension_numbers<[1], [0], [0], [1], [0, 0, 1, 1], [], []>} : vector<192x128xbf16>, vector<128x128xbf16>, vector<192x128xf32> -> vector<192x128xf32>
    %94 = arith.addf %89, %93 : vector<192x128xf32>
    %c55 = arith.constant 55 : index
    %c0_64 = arith.constant 0 : index
    %95 = vector.load %arg10[%c55, %c0_64] : memref<256x128xbf16, #tpu.memory_space<vmem>>, vector<192x128xbf16>
    %c6 = arith.constant 6 : index
    %c0_65 = arith.constant 0 : index
    %c0_66 = arith.constant 0 : index
    %96 = vector.load %arg5[%c6, %c0_65, %c0_66] : memref<9x128x128xbf16, #tpu.memory_space<vmem>>, vector<1x128x128xbf16>
    %97 = vector.shape_cast %96 : vector<1x128x128xbf16> to vector<128x128xbf16>
    %cst_67 = arith.constant dense<0.000000e+00> : vector<192x128xf32>
    %98 = tpu.matmul %95, %97, %cst_67 {dimension_numbers = #tpu.dot_dimension_numbers<[1], [0], [0], [1], [0, 0, 1, 1], [], []>} : vector<192x128xbf16>, vector<128x128xbf16>, vector<192x128xf32> -> vector<192x128xf32>
    %99 = arith.addf %94, %98 : vector<192x128xf32>
    %c56 = arith.constant 56 : index
    %c0_68 = arith.constant 0 : index
    %100 = vector.load %arg10[%c56, %c0_68] : memref<256x128xbf16, #tpu.memory_space<vmem>>, vector<192x128xbf16>
    %c7_69 = arith.constant 7 : index
    %c0_70 = arith.constant 0 : index
    %c0_71 = arith.constant 0 : index
    %101 = vector.load %arg5[%c7_69, %c0_70, %c0_71] : memref<9x128x128xbf16, #tpu.memory_space<vmem>>, vector<1x128x128xbf16>
    %102 = vector.shape_cast %101 : vector<1x128x128xbf16> to vector<128x128xbf16>
    %cst_72 = arith.constant dense<0.000000e+00> : vector<192x128xf32>
    %103 = tpu.matmul %100, %102, %cst_72 {dimension_numbers = #tpu.dot_dimension_numbers<[1], [0], [0], [1], [0, 0, 1, 1], [], []>} : vector<192x128xbf16>, vector<128x128xbf16>, vector<192x128xf32> -> vector<192x128xf32>
    %104 = arith.addf %99, %103 : vector<192x128xf32>
    %c57 = arith.constant 57 : index
    %c0_73 = arith.constant 0 : index
    %105 = vector.load %arg10[%c57, %c0_73] : memref<256x128xbf16, #tpu.memory_space<vmem>>, vector<192x128xbf16>
    %c8_74 = arith.constant 8 : index
    %c0_75 = arith.constant 0 : index
    %c0_76 = arith.constant 0 : index
    %106 = vector.load %arg5[%c8_74, %c0_75, %c0_76] : memref<9x128x128xbf16, #tpu.memory_space<vmem>>, vector<1x128x128xbf16>
    %107 = vector.shape_cast %106 : vector<1x128x128xbf16> to vector<128x128xbf16>
    %cst_77 = arith.constant dense<0.000000e+00> : vector<192x128xf32>
    %108 = tpu.matmul %105, %107, %cst_77 {dimension_numbers = #tpu.dot_dimension_numbers<[1], [0], [0], [1], [0, 0, 1, 1], [], []>} : vector<192x128xbf16>, vector<128x128xbf16>, vector<192x128xf32> -> vector<192x128xf32>
    %109 = arith.addf %104, %108 : vector<192x128xf32>
    %110 = tpu.iota {dimensions = array<i32: 0>} : vector<192x1xi32>
    %c24_i32 = arith.constant 24 : i32
    %c0_i32_78 = arith.constant 0 : i32
    %111 = arith.cmpi eq, %c24_i32, %c0_i32_78 : i32
    %c1_i32_79 = arith.constant 1 : i32
    %112 = arith.select %111, %c1_i32_79, %c24_i32 : i32
    %113 = vector.broadcast %112 : i32 to vector<192x1xi32>
    %114 = arith.remsi %110, %113 : vector<192x1xi32>
    %c0_i32_80 = arith.constant 0 : i32
    %115 = vector.broadcast %c0_i32_80 : i32 to vector<192x1xi32>
    %116 = arith.cmpi ne, %114, %115 : vector<192x1xi32>
    %c0_i32_81 = arith.constant 0 : i32
    %117 = vector.broadcast %c0_i32_81 : i32 to vector<192x1xi32>
    %118 = arith.cmpi slt, %114, %117 : vector<192x1xi32>
    %c0_i32_82 = arith.constant 0 : i32
    %119 = arith.cmpi slt, %112, %c0_i32_82 : i32
    %120 = vector.broadcast %119 : i1 to vector<192x1xi1>
    %121 = vector.broadcast %120 : vector<192x1xi1> to vector<192x1xi1>
    %122 = arith.xori %118, %121 : vector<192x1xi1>
    %123 = arith.andi %122, %116 : vector<192x1xi1>
    %124 = vector.broadcast %112 : i32 to vector<192x1xi32>
    %125 = arith.addi %114, %124 : vector<192x1xi32>
    %126 = arith.select %123, %125, %114 : vector<192x1xi1>, vector<192x1xi32>
    %c16_i32_83 = arith.constant 16 : i32
    %127 = vector.broadcast %c16_i32_83 : i32 to vector<192x1xi32>
    %128 = arith.cmpi slt, %126, %127 : vector<192x1xi32>
    %cst_84 = arith.constant 0.000000e+00 : f32
    %129 = vector.shape_cast %128 : vector<192x1xi1> to vector<192x1xi1>
    %130 = vector.broadcast %129 : vector<192x1xi1> to vector<192x128xi1>
    %131 = vector.broadcast %cst_84 : f32 to vector<192x128xf32>
    %132 = arith.select %130, %109, %131 : vector<192x128xi1>, vector<192x128xf32>
    %133 = vector.shape_cast %132 : vector<192x128xf32> to vector<8x24x128xf32>
    %134 = arith.truncf %133 : vector<8x24x128xf32> to vector<8x24x128xbf16>
    %c0_85 = arith.constant 0 : index
    %c0_86 = arith.constant 0 : index
    %c0_87 = arith.constant 0 : index
    %c0_88 = arith.constant 0 : index
    %135 = vector.load %arg8[%c0_85, %c0_86, %c0_87, %c0_88] : memref<1x8x24x128xbf16, #tpu.memory_space<vmem>>, vector<1x8x24x128xbf16>
    %136 = vector.shape_cast %135 : vector<1x8x24x128xbf16> to vector<8x24x128xbf16>
    %137 = vector.shape_cast %134 : vector<8x24x128xbf16> to vector<1x8x24x128xbf16>
    tpu.vector_store %arg8[%c0_85, %c0_86, %c0_87, %c0_88], %137 {strides = array<i32>} : memref<1x8x24x128xbf16, #tpu.memory_space<vmem>>, vector<1x8x24x128xbf16>,
    %cst_89 = arith.constant dense<0.000000e+00> : vector<128xf32>
    %138 = vector.multi_reduction <add>, %132, %cst_89 [0] : vector<192x128xf32> to vector<128xf32>
    %139 = vector.shape_cast %138 : vector<128xf32> to vector<1x128xf32>
    %c0_90 = arith.constant 0 : index
    %c0_91 = arith.constant 0 : index
    %c0_92 = arith.constant 0 : index
    %c0_93 = arith.constant 0 : index
    %140 = vector.load %arg9[%c0_90, %c0_91, %c0_92, %c0_93] : memref<1x1x2x128xf32, #tpu.memory_space<vmem>>, vector<1x1x1x128xf32>
    %141 = vector.shape_cast %140 : vector<1x1x1x128xf32> to vector<1x128xf32>
    %142 = vector.shape_cast %139 : vector<1x128xf32> to vector<1x1x1x128xf32>
    tpu.vector_store %arg9[%c0_90, %c0_91, %c0_92, %c0_93], %142 {strides = array<i32>} : memref<1x1x2x128xf32, #tpu.memory_space<vmem>>, vector<1x1x1x128xf32>,
    %143 = arith.mulf %132, %132 : vector<192x128xf32>
    %cst_94 = arith.constant dense<0.000000e+00> : vector<128xf32>
    %144 = vector.multi_reduction <add>, %143, %cst_94 [0] : vector<192x128xf32> to vector<128xf32>
    %145 = vector.shape_cast %144 : vector<128xf32> to vector<1x128xf32>
    %c0_95 = arith.constant 0 : index
    %c0_96 = arith.constant 0 : index
    %c1_97 = arith.constant 1 : index
    %c0_98 = arith.constant 0 : index
    %146 = vector.load %arg9[%c0_95, %c0_96, %c1_97, %c0_98] : memref<1x1x2x128xf32, #tpu.memory_space<vmem>>, vector<1x1x1x128xf32>
    %147 = vector.shape_cast %146 : vector<1x1x1x128xf32> to vector<1x128xf32>
    %148 = vector.shape_cast %145 : vector<1x128xf32> to vector<1x1x1x128xf32>
    tpu.vector_store %arg9[%c0_95, %c0_96, %c1_97, %c0_98], %148 {strides = array<i32>} : memref<1x1x2x128xf32, #tpu.memory_space<vmem>>, vector<1x1x1x128xf32>,
    return
  }
  func.func @transform_0(%arg0: i32, %arg1: i32) -> (i32, i32, i32, i32) {
    %c8_i32 = arith.constant 8 : i32
    %0 = arith.muli %arg1, %c8_i32 : i32
    %c1_i32 = arith.constant 1 : i32
    %1 = arith.subi %0, %c1_i32 : i32
    %c0_i32 = arith.constant 0 : i32
    %2 = arith.maxsi %1, %c0_i32 : i32
    %c0_i32_0 = arith.constant 0 : i32
    %c0_i32_1 = arith.constant 0 : i32
    %c0_i32_2 = arith.constant 0 : i32
    return %arg0, %2, %c0_i32_0, %c0_i32_1 : i32, i32, i32, i32
  }
  func.func @transform_1(%arg0: i32, %arg1: i32) -> (i32, i32, i32, i32) {
    %c0_i32 = arith.constant 0 : i32
    %c0_i32_0 = arith.constant 0 : i32
    %c0_i32_1 = arith.constant 0 : i32
    return %arg0, %arg1, %c0_i32, %c0_i32_0 : i32, i32, i32, i32
  }
  func.func @transform_2(%arg0: i32, %arg1: i32) -> (i32, i32, i32, i32) {
    %c1_i32 = arith.constant 1 : i32
    %0 = arith.addi %arg1, %c1_i32 : i32
    %c8_i32 = arith.constant 8 : i32
    %1 = arith.muli %0, %c8_i32 : i32
    %c15_i32 = arith.constant 15 : i32
    %2 = arith.minsi %1, %c15_i32 : i32
    %c0_i32 = arith.constant 0 : i32
    %c0_i32_0 = arith.constant 0 : i32
    %c0_i32_1 = arith.constant 0 : i32
    return %arg0, %2, %c0_i32, %c0_i32_0 : i32, i32, i32, i32
  }
  func.func @transform_3(%arg0: i32, %arg1: i32) -> (i32, i32, i32) {
    %c0_i32 = arith.constant 0 : i32
    %c0_i32_0 = arith.constant 0 : i32
    %c0_i32_1 = arith.constant 0 : i32
    %c0_i32_2 = arith.constant 0 : i32
    return %c0_i32, %c0_i32_0, %c0_i32_1 : i32, i32, i32
  }
  func.func @transform_4(%arg0: i32, %arg1: i32) -> (i32, i32) {
    %c0_i32 = arith.constant 0 : i32
    %c0_i32_0 = arith.constant 0 : i32
    %c0_i32_1 = arith.constant 0 : i32
    return %c0_i32, %c0_i32_0 : i32, i32
  }
  func.func @transform_5(%arg0: i32, %arg1: i32) -> (i32, i32) {
    %c0_i32 = arith.constant 0 : i32
    %c0_i32_0 = arith.constant 0 : i32
    %c0_i32_1 = arith.constant 0 : i32
    return %c0_i32, %c0_i32_0 : i32, i32
  }
  func.func @transform_6(%arg0: i32, %arg1: i32) -> (i32, i32, i32, i32) {
    %c0_i32 = arith.constant 0 : i32
    %c0_i32_0 = arith.constant 0 : i32
    %c0_i32_1 = arith.constant 0 : i32
    return %arg0, %arg1, %c0_i32, %c0_i32_0 : i32, i32, i32, i32
  }
  func.func @transform_7(%arg0: i32, %arg1: i32) -> (i32, i32, i32, i32) {
    %c0_i32 = arith.constant 0 : i32
    %c0_i32_0 = arith.constant 0 : i32
    %c0_i32_1 = arith.constant 0 : i32
    return %arg0, %arg1, %c0_i32, %c0_i32_0 : i32, i32, i32, i32
  }
}

</mosaic_0001>

<bundles_post_ra>
// kernel: resblock_forward.5
= control target key start
LH: loop header
LB: loop body
LE: loop exit
PB: predicated region body
PF: predicated region fallthrough
CT: control target
= control target key end

     0   :  { %s864_s15 = smov 0   ;;  %s866_s16 = smov 0   ;;  %s1001_s0 = inlined_call_operand.vmem [shape: bf16[2,16,24,128], index: 0, kind: input, shape index: {}]   ;;  %s1002_s1 = inlined_call_operand.vmem [shape: f32[1,128], index: 1, kind: input, shape index: {}]   ;;  %s1003_s2 = inlined_call_operand.vmem [shape: f32[1,128], index: 2, kind: input, shape index: {}]   ;;  %s1004_s3 = inlined_call_operand.vmem [shape: bf16[2,16,24,128], index: 3, kind: input, shape index: {}]   ;;  %s1005_s4 = inlined_call_operand.vmem [shape: bf16[2,16,16,128], index: 4, kind: output, shape index: {}]  }
   0x1   :  { %s868_s17 = smov 0   ;;  %s870_s18 = smov 0  }
   0x2   :  { %s872_s19 = smov 0  }
   0x3 LB: > { %s23_s20 = sadd.s32 1, %s829_s17  ;;  %s26_s21 = sadd.s32 1, %s833_s18  ;;  %s837_s19 = sphi %s872_s19, %s14_s19   ;;  %s833_s18 = sphi %s870_s18, %s1009_s18   ;;  %s829_s17 = sphi %s868_s17, %s1008_s17   ;;  %s825_s16 = sphi %s866_s16, %s1007_s16   ;;  %s821_s15 = sphi %s864_s15, %s1006_s15  }
   0x4   : > { %p24_p0 = scmp.ge.s32.totalorder %s23_s20, 2  ;;  %p627_p1 = scmp.ge.s32.totalorder %s837_s19, 1 }
   0x5   : > { %p202_p2 = scmp.lt.s32.totalorder %s837_s19, 5 }
   0x6   : > { %s1011_s20 = smov (%p24_p0, %s23_s20), 0  ;;  %s1013_s21 = smov (!%p24_p0, %s26_s21), %s833_s18 }
   0x7   : > { %p203_p3 = pnand %p627_p1, %p202_p2  ;;  %p28_p4 = scmp.ge.s32.totalorder %s1013_s21, 2 }
   0x8   : > { %s628_s22 = sshll.u32 (!%p203_p3), %s821_s15, 3  ;;  %p249_p5 = scmp.lt.s32.totalorder (!%p203_p3), %s825_s16, 1  ;;  %v913_v0 = vld [vmem:[%s1002_s1] ss:$0 sm:$0xff] (!%p203_p3) }
   0x9   : > { %s1015_s21 = smov (%p28_p4, %s1013_s21), 0  ;;  %206 = sbr.rel (%p203_p3) target bundleno = 57 (0x39), region = 36 }
   0xa   : > { %p251_p6 = scmp.lt.s32.totalorder (!%p203_p3), %s628_s22, 15  ;;  %v926_v11 = vld [vmem:[%s1003_s2] ss:$0 sm:$0xff] (!%p203_p3) }
  0x10   : > { %s1017_s16 = smov (!%p249_p5, %s825_s16), 1  ;;  %s1019_s22 = smov (!%p251_p6, %s628_s22), 15 }
  0x11   : > { %s758_s23 = smul.u32 48, %s1017_s16  ;;  %s633_s9 = sshll.u32 %s1019_s22, 1 }
  0x12   : > { %s757_s24 = smul.u32 3, %s1019_s22  ;;  %s634_s10 = sshll.u32 %s1017_s16, 5 }
  0x13   : > { %s931_s13 = sadd.s32 %s634_s10, %s633_s9 }
  0x14   : > { %s255_s25 = sadd.s32 %s758_s23, %s757_s24  ;;  %s635_s14 = sshll.u32 %s931_s13, 2 }
  0x15   : > { %s629_s26 = sshll.u32 %s255_s25, 2  ;;  %s949_s22 = scalar_lea.vmem %s1005_s4, %s635_s14 }
  0x16   : > { %s903_s29 = scalar_lea.vmem %s1001_s0, %s629_s26  ;;  %s908_s6 = scalar_lea.vmem %s1004_s3, %s629_s26 }
  0x17   : > { %v673_v1 = vld [vmem:[%s903_s29] sm:$0xff]   ;;  %v283_v3 = vld [vmem:[%s903_s29 + $0xc] sm:$0xff]   ;;  %v744_v9 = vld [vmem:[%s903_s29 + $0x18] sm:$0xff]  }
  0x18   : > { %v689_v2 = vld [vmem:[%s908_s6] sm:$0xff]   ;;  %v674_v4 = vunpack.c.l.bf16 %v673_v1  ;;  %v675_v5 = vunpack.c.h.bf16 %v673_v1  ;;  %v315_v8 = vld [vmem:[%s908_s6 + $0xc] sm:$0xff]   ;;  %v747_v10 = vld [vmem:[%s908_s6 + $0x18] sm:$0xff]   ;;  %v299_v12 = vunpack.c.l.bf16 %v283_v3  ;;  %v300_v13 = vunpack.c.h.bf16 %v283_v3 }
  0x19   : > { %v690_v6 = vunpack.c.l.bf16 %v689_v2  ;;  %v691_v7 = vunpack.c.h.bf16 %v689_v2  ;;  %v331_v14 = vunpack.c.l.bf16 %v315_v8  ;;  %v332_v15 = vunpack.c.h.bf16 %v315_v8  ;;  %v287_v20 = vld [vmem:[%s903_s29 + $0x24] sm:$0xff]   ;;  %v745_v42 = vld [vmem:[%s903_s29 + $0x30] sm:$0xff]   ;;  %v291_v56 = vld [vmem:[%s903_s29 + $0x3c] sm:$0xff]  }
  0x1a   : > { %v352_v16 = vmul.f32 %v674_v4, %v913_v0  ;;  %v353_v17 = vmul.f32 %v675_v5, %v913_v0  ;;  %v678_v18 = vunpack.c.l.bf16 %v744_v9  ;;  %v679_v19 = vunpack.c.h.bf16 %v744_v9  ;;  %v319_v29 = vld [vmem:[%s908_s6 + $0x24] sm:$0xff]   ;;  %v748_v51 = vld [vmem:[%s908_s6 + $0x30] sm:$0xff]   ;;  %v323_v61 = vld [vmem:[%s908_s6 + $0x3c] sm:$0xff]  }
  0x1b   : > { %v354_v21 = vmul.f32 %v913_v0, %v299_v12  ;;  %v355_v22 = vmul.f32 %v913_v0, %v300_v13  ;;  %v694_v23 = vunpack.c.l.bf16 %v747_v10  ;;  %v695_v24 = vunpack.c.h.bf16 %v747_v10  ;;  %v749_v13 = vld [vmem:[%s908_s6 + $0x48] sm:$0xff]  }
  0x1c   : > { %v375_v25 = vadd.f32 %v926_v11, %v352_v16  ;;  %v376_v26 = vadd.f32 %v926_v11, %v353_v17  ;;  %v356_v27 = vmul.f32 %v678_v18, %v913_v0  ;;  %v357_v28 = vmul.f32 %v679_v19, %v913_v0 }
  0x1d   : > { %v377_v30 = vadd.f32 %v926_v11, %v354_v21  ;;  %v378_v31 = vadd.f32 %v926_v11, %v355_v22  ;;  %v303_v32 = vunpack.c.l.bf16 %v287_v20  ;;  %v304_v33 = vunpack.c.h.bf16 %v287_v20  ;;  %v295_v22 = vld [vmem:[%s903_s29 + $0x54] sm:$0xff]  }
  0x1e   : > { %v391_v34 = vadd.f32 %v690_v6, %v375_v25  ;;  %v392_v35 = vadd.f32 %v691_v7, %v376_v26  ;;  %v379_v36 = vadd.f32 %v926_v11, %v356_v27  ;;  %v380_v37 = vadd.f32 %v926_v11, %v357_v28  ;;  %v746_v7 = vld [vmem:[%s903_s29 + $0x48] sm:$0xff]   ;;  %v327_v27 = vld [vmem:[%s908_s6 + $0x54] sm:$0xff]  }
  0x1f   : > { %v393_v38 = vadd.f32 %v377_v30, %v331_v14  ;;  %v394_v39 = vadd.f32 %v378_v31, %v332_v15  ;;  %v335_v40 = vunpack.c.l.bf16 %v319_v29  ;;  %v336_v41 = vunpack.c.h.bf16 %v319_v29 }
  0x20   : > { %v407_v43 = vmax.f32 %v391_v34, 0.0  ;;  %v408_v44 = vmax.f32 %v392_v35, 0.0  ;;  %v395_v45 = vadd.f32 %v694_v23, %v379_v36  ;;  %v396_v46 = vadd.f32 %v695_v24, %v380_v37 }
  0x21   : > { %v409_v47 = vmax.f32 %v393_v38, 0.0  ;;  %v410_v48 = vmax.f32 %v394_v39, 0.0  ;;  %v358_v49 = vmul.f32 %v913_v0, %v303_v32  ;;  %v359_v50 = vmul.f32 %v913_v0, %v304_v33 }
  0x22   : > { %v707_v52 = vpack.c.bf16 %v408_v44, %v407_v43  ;;  %v411_v53 = vmax.f32 %v395_v45, 0.0  ;;  %v412_v54 = vmax.f32 %v396_v46, 0.0  ;;  %v682_v55 = vunpack.c.l.bf16 %v745_v42 }
  0x23   : > { %v712_v57 = vpack.c.bf16 %v410_v48, %v409_v47  ;;  %v381_v58 = vadd.f32 %v926_v11, %v358_v49  ;;  %v382_v59 = vadd.f32 %v926_v11, %v359_v50  ;;  %v683_v60 = vunpack.c.h.bf16 %v745_v42 }
  0x24   : > { %708 = vst [vmem:[%s949_s22] sm:$0xff] %v707_v52   ;;  %v717_v62 = vpack.c.bf16 %v412_v54, %v411_v53  ;;  %v698_v63 = vunpack.c.l.bf16 %v748_v51  ;;  %v699_v1 = vunpack.c.h.bf16 %v748_v51  ;;  %v360_v2 = vmul.f32 %v682_v55, %v913_v0 }
  0x25   : > { %750 = vst [vmem:[%s949_s22 + $0x8] sm:$0xff] %v712_v57   ;;  %v397_v3 = vadd.f32 %v381_v58, %v335_v40  ;;  %v398_v4 = vadd.f32 %v382_v59, %v336_v41  ;;  %v361_v5 = vmul.f32 %v683_v60, %v913_v0  ;;  %v307_v6 = vunpack.c.l.bf16 %v291_v56 }
  0x26   : > { %751 = vst [vmem:[%s949_s22 + $0x10] sm:$0xff] %v717_v62   ;;  %v383_v8 = vadd.f32 %v926_v11, %v360_v2  ;;  %v308_v9 = vunpack.c.h.bf16 %v291_v56  ;;  %v339_v10 = vunpack.c.l.bf16 %v323_v61  ;;  %v340_v12 = vunpack.c.h.bf16 %v323_v61 }
  0x27   : > { %v413_v14 = vmax.f32 %v397_v3, 0.0  ;;  %v414_v15 = vmax.f32 %v398_v4, 0.0  ;;  %v384_v16 = vadd.f32 %v926_v11, %v361_v5  ;;  %v362_v17 = vmul.f32 %v913_v0, %v307_v6 }
  0x28   : > { %v399_v18 = vadd.f32 %v698_v63, %v383_v8  ;;  %v363_v19 = vmul.f32 %v913_v0, %v308_v9  ;;  %v686_v20 = vunpack.c.l.bf16 %v746_v7  ;;  %v687_v21 = vunpack.c.h.bf16 %v746_v7 }
  0x29   : > { %v722_v23 = vpack.c.bf16 %v414_v15, %v413_v14  ;;  %v400_v24 = vadd.f32 %v699_v1, %v384_v16  ;;  %v385_v25 = vadd.f32 %v926_v11, %v362_v17  ;;  %v702_v26 = vunpack.c.l.bf16 %v749_v13 }
  0x2a   : > { %v415_v28 = vmax.f32 %v399_v18, 0.0  ;;  %v386_v29 = vadd.f32 %v926_v11, %v363_v19  ;;  %v703_v30 = vunpack.c.h.bf16 %v749_v13  ;;  %v364_v31 = vmul.f32 %v686_v20, %v913_v0 }
  0x2b   : > { %752 = vst [vmem:[%s949_s22 + $0x18] sm:$0xff] %v722_v23   ;;  %v416_v32 = vmax.f32 %v400_v24, 0.0  ;;  %v401_v33 = vadd.f32 %v385_v25, %v339_v10  ;;  %v365_v34 = vmul.f32 %v687_v21, %v913_v0  ;;  %v311_v35 = vunpack.c.l.bf16 %v295_v22 }
  0x2c   : > { %v402_v36 = vadd.f32 %v386_v29, %v340_v12  ;;  %v387_v37 = vadd.f32 %v926_v11, %v364_v31  ;;  %v312_v38 = vunpack.c.h.bf16 %v295_v22  ;;  %v343_v39 = vunpack.c.l.bf16 %v327_v27 }
  0x2d   : > { %v727_v40 = vpack.c.bf16 %v416_v32, %v415_v28  ;;  %v417_v41 = vmax.f32 %v401_v33, 0.0  ;;  %v388_v42 = vadd.f32 %v926_v11, %v365_v34  ;;  %v344_v43 = vunpack.c.h.bf16 %v327_v27 }
  0x2e   : > { %v418_v44 = vmax.f32 %v402_v36, 0.0  ;;  %v403_v45 = vadd.f32 %v702_v26, %v387_v37  ;;  %v366_v46 = vmul.f32 %v913_v0, %v311_v35  ;;  %v367_v47 = vmul.f32 %v913_v0, %v312_v38 }
  0x2f   : > { %753 = vst [vmem:[%s949_s22 + $0x20] sm:$0xff] %v727_v40   ;;  %v404_v48 = vadd.f32 %v703_v30, %v388_v42 }
  0x30   : > { %v732_v49 = vpack.c.bf16 %v418_v44, %v417_v41  ;;  %v419_v50 = vmax.f32 %v403_v45, 0.0  ;;  %v389_v51 = vadd.f32 %v926_v11, %v366_v46  ;;  %v390_v52 = vadd.f32 %v926_v11, %v367_v47 }
  0x31   : > { %v420_v53 = vmax.f32 %v404_v48, 0.0 }
  0x32   : > { %754 = vst [vmem:[%s949_s22 + $0x28] sm:$0xff] %v732_v49   ;;  %v405_v54 = vadd.f32 %v389_v51, %v343_v39  ;;  %v406_v55 = vadd.f32 %v390_v52, %v344_v43 }
  0x33   : > { %v737_v56 = vpack.c.bf16 %v420_v53, %v419_v50 }
  0x34   : > { %v421_v57 = vmax.f32 %v405_v54, 0.0  ;;  %v422_v58 = vmax.f32 %v406_v55, 0.0 }
  0x35   : > { %755 = vst [vmem:[%s949_s22 + $0x30] sm:$0xff] %v737_v56  }
  0x36   : > { %v742_v59 = vpack.c.bf16 %v422_v58, %v421_v57 }
  0x38   : > { %756 = vst [vmem:[%s949_s22 + $0x38] sm:$0xff] %v742_v59  }
  0x39 PF: > { %s14_s19 = sadd.s32 1, %s837_s19   ;;  %s1006_s15 = smov %s829_s17 }
  0x3a   : > { %p11_p7 = scmp.ge.s32.totalorder %s14_s19, 6   ;;  %s1007_s16 = smov %s833_s18 }
  0x3b   : > { %s1008_s17 = smov %s1011_s20  ;;  %s1009_s18 = smov %s1015_s21 }
  0x3c   :  { %13 = sbr.rel (!%p11_p7) target bundleno = 3 (0x3), region = 69 }

// kernel: resblock_forward.3
= control target key start
LH: loop header
LB: loop body
LE: loop exit
PB: predicated region body
PF: predicated region fallthrough
CT: control target
= control target key end

     0   :  { %s5617_s24 = smov 0   ;;  %s5619_s25 = smov 0   ;;  %s7448_s0 = inlined_call_operand.vmem [shape: bf16[2,16,24,128], index: 0, kind: input, shape index: {}, may-alias: {0,1,2}]   ;;  %s7449_s1 = inlined_call_operand.vmem [shape: bf16[2,16,24,128], index: 1, kind: input, shape index: {}, may-alias: {0,1,2}]   ;;  %s7450_s2 = inlined_call_operand.vmem [shape: bf16[2,16,24,128], index: 2, kind: input, shape index: {}, may-alias: {0,1,2}]   ;;  %s7451_s3 = inlined_call_operand.vmem [shape: bf16[9,128,128], index: 3, kind: input, shape index: {}]   ;;  %s7452_s4 = inlined_call_operand.vmem [shape: f32[1,128], index: 4, kind: input, shape index: {}]   ;;  %s7453_s5 = inlined_call_operand.vmem [shape: f32[1,128], index: 5, kind: input, shape index: {}]   ;;  %s7454_s6 = inlined_call_operand.vmem [shape: bf16[2,16,24,128], index: 6, kind: output, shape index: {0}]   ;;  %s7455_s7 = inlined_call_operand.vmem [shape: f32[2,2,2,128], index: 7, kind: output, shape index: {1}]  }
   0x1   :  { %s5621_s26 = smov 0   ;;  %s5623_s27 = smov 0  }
   0x2   :  { %s5625_s28 = smov 0  }
   0x3 LB: > { %s27_s4 = sadd.s32 1, %s5566_s26  ;;  %s30_s5 = sadd.s32 1, %s5570_s27  ;;  %s5574_s28 = sphi %s5625_s28, %s18_s28   ;;  %s5570_s27 = sphi %s5623_s27, %s7684_s27   ;;  %s5566_s26 = sphi %s5621_s26, %s7683_s26   ;;  %s5562_s25 = sphi %s5619_s25, %s7682_s25   ;;  %s5558_s24 = sphi %s5617_s24, %s7681_s24  }
   0x4   : > { %p28_p0 = scmp.ge.s32.totalorder %s27_s4, 2  ;;  %p4238_p1 = scmp.ge.s32.totalorder %s5574_s28, 1 }
   0x5   : > { %p328_p2 = scmp.lt.s32.totalorder %s5574_s28, 5 }
   0x6   : > { %s7686_s4 = smov (%p28_p0, %s27_s4), 0  ;;  %s7688_s5 = smov (!%p28_p0, %s30_s5), %s5570_s27 }
   0x7   : > { %p329_p3 = pnand %p4238_p1, %p328_p2  ;;  %p32_p4 = scmp.ge.s32.totalorder %s7688_s5, 2 }
   0x9   : > { %s7690_s5 = smov (%p32_p4, %s7688_s5), 0  ;;  %332 = sbr.rel (%p329_p3) target bundleno = 533 (0x215), region = 44 }
  0x10   : > { %v5444_v0 = vld [vmem:[%s7451_s3 + $0x40] sm:$0xff]   ;;  %s5655_s8 = sshll.u32 %s5558_s24, 3  ;;  %v5446_v2 = vld [vmem:[%s7451_s3 + $0x48] sm:$0xff]   ;;  %p408_p6 = scmp.lt.s32.totalorder %s5562_s25, 1  ;;  %v5448_v4 = vld [vmem:[%s7451_s3 + $0x50] sm:$0xff]   ;;  %v5576_v17 = vmov 0  }
  0x11   : > { %v5445_v1 = vld [vmem:[%s7451_s3 + $0x100] sm:$0xff]   ;;  %s4240_s11 = sadd.s32 4294967295, %s5655_s8  ;;  %4783 = vmatprep.subr.bf16.mxu1 %v5444_v0  ;;  %v5447_v3 = vld [vmem:[%s7451_s3 + $0x108] sm:$0xff]   ;;  %v5449_v5 = vld [vmem:[%s7451_s3 + $0x110] sm:$0xff]   ;;  %p424_p8 = scmp.lt.s32.totalorder %s5655_s8, 15  ;;  %vm683_vm1 = vcmask 1043456  }
  0x12   : > { %p406_p5 = scmp.gt.s32.totalorder %s4240_s11, 0  ;;  %4943 = vmatprep.subr.bf16.mxu0 %v5445_v1  ;;  %4784 = vmatpush3.bf16.msra.mxu1 %v5444_v0  ;;  %s7692_s25 = smov (!%p408_p6, %s5562_s25), 1  ;;  %v5450_v6 = vld [vmem:[%s7451_s3 + $0x58] sm:$0xff]   ;;  %v5452_v8 = vld [vmem:[%s7451_s3 + $0x60] sm:$0xff]   ;;  %v5454_v10 = vld [vmem:[%s7451_s3 + $0x68] sm:$0xff]  }
  0x13   : > { %4944 = vmatpush3.bf16.msra.mxu0 %v5445_v1  ;;  %4785 = vmatprep.subr.bf16.mxu1 %v5446_v2  ;;  %p4241_p7 = scmp.lt.s32.totalorder %s4240_s11, 15  ;;  %s5678_s21 = smul.u32 48, %s7692_s25  ;;  %v5451_v7 = vld [vmem:[%s7451_s3 + $0x118] sm:$0xff]   ;;  %v5453_v9 = vld [vmem:[%s7451_s3 + $0x120] sm:$0xff]   ;;  %v5455_v11 = vld [vmem:[%s7451_s3 + $0x128] sm:$0xff]  }
  0x14   : > { %s407_s18 = scalar_select %p406_p5, %s4240_s11, 0  ;;  %4945 = vmatprep.subr.bf16.mxu0 %v5447_v3  ;;  %v5456_v12 = vld [vmem:[%s7451_s3 + $0x70] sm:$0xff]   ;;  %471 = vst [vmem:[#allocation2] sm:$0xf] %v5576_v17  ;;  %472 = vst [vmem:[#allocation2 + $0x78] sm:$0xf0] %v5576_v17 }
  0x15   : > { %s425_s10 = scalar_select %p424_p8, %s5655_s8, 15  ;;  %v5457_v16 = vld [vmem:[%s7451_s3 + $0x130] sm:$0xff]   ;;  %v5458_v21 = vld [vmem:[%s7451_s3 + $0x78] sm:$0xff]   ;;  %v5468_v39 = vld [vmem:[%s7451_s3] sm:$0xff]   ;;  %vm2089_vm2 = vsmask.f32 7424 }
  0x16   : > { %4786 = vmatpush3.bf16.msra.mxu1 %v5446_v2  ;;  %s7694_s18 = smov (!%p4241_p7, %s407_s18), 15  ;;  %p469_p9 = scmp.eq.s32.totalorder %s5558_s24, 0  ;;  %v5459_v33 = vld [vmem:[%s7451_s3 + $0x138] sm:$0xff]   ;;  %v5462_v41 = vld [vmem:[%s7451_s3 + $0x140] sm:$0xff]   ;;  %v5463_v44 = vld [vmem:[%s7451_s3 + $0x148] sm:$0xff]  }
  0x17   : > { %4946 = vmatpush3.bf16.msra.mxu0 %v5447_v3  ;;  %4787 = vmatprep.subr.bf16.mxu1 %v5448_v4  ;;  %s5351_s9 = smul.u32 3, %s7694_s18  ;;  %v5471_v50 = vld [vmem:[%s7451_s3 + $0x8] sm:$0xff]   ;;  %v5466_v54 = vld [vmem:[%s7451_s3 + $0x150] sm:$0xff]   ;;  %v5470_v56 = vld [vmem:[%s7451_s3 + $0x158] sm:$0xff]   ;;  %p470_p11 = scmp.eq.s32.totalorder %s5558_s24, 1 }
  0x18   : > { %4947 = vmatprep.subr.bf16.mxu0 %v5449_v5  ;;  %s5353_s17 = smul.u32 3, %s425_s10  ;;  %v5473_v59 = vld [vmem:[%s7451_s3 + $0x10] sm:$0xff]   ;;  %v5476_v63 = vld [vmem:[%s7451_s3 + $0x18] sm:$0xff]   ;;  %v5475_v0 = vld [vmem:[%s7451_s3 + $0x160] sm:$0xff]   ;;  %vm898_vm3 = vsmask.f32 4352 }
  0x19   : > { %s414_s13 = sadd.s32 %s5678_s21, %s5351_s9  ;;  %v5477_v3 = vld [vmem:[%s7451_s3 + $0x168] sm:$0xff]   ;;  %v5487_v17 = vld [vmem:[%s7451_s3 + $0x38] sm:$0xff]   ;;  %vm1527_vm5 = vsmask.f32 256  ;;  %vm1222_vm6 = vsmask.f32 3328 }
  0x1a   : > { %4788 = vmatpush3.bf16.msra.mxu1 %v5448_v4  ;;  %s4246_s16 = sshll.u32 %s414_s13, 2  ;;  %s5703_s29 = sadd.s32 %s5353_s17, %s5678_s21 }
  0x1b   : > { %4948 = vmatpush3.bf16.msra.mxu0 %v5449_v5  ;;  %4789 = vmatprep.subr.bf16.mxu1 %v5450_v6  ;;  %s416_s20 = scalar_lea.vmem %s7448_s0, %s4246_s16  ;;  %s4248_s10 = sshll.u32 %s5703_s29, 2  ;;  %v5479_v5 = vld [vmem:[%s7451_s3 + $0x20] sm:$0xff]  }
  0x1c   : > { %4949 = vmatprep.subr.bf16.mxu0 %v5451_v7  ;;  %s5717_s15 = scalar_lea.vmem %s7449_s1, %s4248_s10  ;;  %v473_v13 = vld [vmem:[%s416_s20] sm:$0xf]  ;;  %v474_v14 = vld [vmem:[%s416_s20 + $0x4] sm:$0xf]  ;;  %v475_v15 = vld [vmem:[%s416_s20 + $0x8] sm:$0xf]  ;;  %s7192_s9 = scalar_lea.vmem %s7454_s6, %s4248_s10 }
  0x1d   : > { %s476_s19 = scalar_select %p469_p9, 1, 0  ;;  %v5725_v18 = vld [vmem:[%s5717_s15] sm:$0xff]   ;;  %v5728_v20 = vld [vmem:[%s5717_s15 + $0x8] sm:$0xff]   ;;  %v5738_v23 = vld [vmem:[%s5717_s15 + $0x10] sm:$0xff]  }
  0x1e   : > { %4790 = vmatpush3.bf16.msra.mxu1 %v5450_v6  ;;  %v5734_v22 = vshrl.u32 %v5725_v18, 16  ;;  %4959 = vmatprep.mubr.bf16.mxu0 %v5725_v18  ;;  %v5741_v24 = vld [vmem:[%s5717_s15 + $0x18] sm:$0xff]   ;;  %591 = vst [vmem:[#allocation2 + $0x18] sm:$0xff] %v5728_v20  ;;  %v5745_v28 = vshrl.u32 %v5728_v20, 16  ;;  %v5751_v32 = vshll.u32 %v5725_v18, 16  ;;  %592 = vst [vmem:[#allocation2 + $0x20] sm:$0xff] %v5738_v23 }
  0x1f   : > { %4950 = vmatpush3.bf16.msra.mxu0 %v5451_v7  ;;  %4791 = vmatprep.subr.bf16.mxu1 %v5452_v8  ;;  %v477_v19 = vstv %s476_s19  ;;  %593 = vst [vmem:[#allocation2 + $0x28] sm:$0xff] %v5741_v24  ;;  %v5760_v35 = vshll.u32 %v5728_v20, 16  ;;  %v5774_v38 = vld [vmem:[%s5717_s15 + $0x20] sm:$0xff]   ;;  %v5780_v40 = vld [vmem:[%s5717_s15 + $0x28] sm:$0xff]   ;;  %v687_v43 = vrot.slane %v5725_v18, 4  ;;  %v689_v45 = vrot.slane %v5728_v20, 4 }
  0x20   : > { %4951 = vmatprep.subr.bf16.mxu0 %v5453_v9  ;;  %vm478_vm0 = vcmp.eq.s32.totalorder %v477_v19, 1  ;;  %v7459_v31 = vrot.slane %v5734_v22, 7  ;;  %v7456_v34 = vrot.slane %v5745_v28, 7  ;;  %594 = vst [vmem:[#allocation2 + $0x30] sm:$0xff] %v5774_v38  ;;  %595 = vst [vmem:[#allocation2 + $0x38] sm:$0xff] %v5780_v40  ;;  %v5796_v47 = vld [vmem:[%s5717_s15 + $0x30] sm:$0xff]  }
  0x21   : > { %v479_v25 = vsel %vm478_vm0, 0, %v473_v13  ;;  %v480_v26 = vsel %vm478_vm0, 0, %v474_v14  ;;  %v481_v27 = vsel %vm478_vm0, 0, %v475_v15  ;;  %596 = vst [vmem:[#allocation2 + $0x40] sm:$0xff] %v5796_v47  ;;  %v5806_v51 = vld [vmem:[%s5717_s15 + $0x38] sm:$0xff]   ;;  %v690_v53 = vsel %vm683_vm1, %v687_v43, %v689_v45  ;;  %v5821_v58 = vld [vmem:[%s5717_s15 + $0x40] sm:$0xff]  }
  0x22   : > { %4792 = vmatpush3.bf16.msra.mxu1 %v5452_v8  ;;  %v4258_v29 = vcombine.low %v479_v25, %v479_v25  ;;  %v5747_v30 = vcombine.low %v480_v26, %v481_v27  ;;  %v5766_v36 = vor.u32 %v5751_v32, %v7459_v31  ;;  %v5771_v37 = vor.u32 %v5760_v35, %v7456_v34  ;;  %v5828_v60 = vld [vmem:[%s5717_s15 + $0x48] sm:$0xff]   ;;  %v5842_v1 = vld [vmem:[%s5717_s15 + $0x50] sm:$0xff]   ;;  %v5854_v6 = vld [vmem:[%s5717_s15 + $0x58] sm:$0xff]   ;;  %s4507_s17 = sadd.s32 8, %s5655_s8  ;;  %p462_p12 = scmp.lt.s32.totalorder %s5558_s24, 1 }
  0x23   : > { %4952 = vmatpush3.bf16.msra.mxu0 %v5453_v9  ;;  %4793 = vmatprep.subr.bf16.mxu1 %v5454_v10  ;;  %597 = vst [vmem:[#allocation2 + $0x48] sm:$0xff] %v5806_v51  ;;  %v691_v55 = vrot.slane %v5738_v23, 4  ;;  %v693_v57 = vrot.slane %v5741_v24, 4  ;;  %598 = vst [vmem:[#allocation2 + $0x50] sm:$0xff] %v5821_v58  ;;  %v695_v2 = vrot.slane %v5774_v38, 4  ;;  %v697_v4 = vrot.slane %v5780_v40, 4 }
  0x24   : > { %4953 = vmatprep.subr.bf16.mxu0 %v5455_v11  ;;  %492 = vst [vmem:[#allocation2] sm:$0xf0] %v4258_v29  ;;  %493 = vst [vmem:[#allocation2 + $0x8] sm:$0xff] %v5747_v30  ;;  %v685_v42 = vrot.slane %v5747_v30, 4  ;;  %v5481_v9 = vld [vmem:[%s7451_s3 + $0x28] sm:$0xff]   ;;  %v5484_v13 = vld [vmem:[%s7451_s3 + $0x30] sm:$0xff]  }
  0x25   : > { %7476 = vst [vmem:[#allocation3_spill] sm:$0xff] %v5766_v36  ;;  %v692_v61 = vsel %vm683_vm1, %v689_v45, %v691_v55  ;;  %v694_v62 = vsel %vm683_vm1, %v691_v55, %v693_v57  ;;  %599 = vst [vmem:[#allocation2 + $0x58] sm:$0xff] %v5828_v60  ;;  %v696_v7 = vsel %vm683_vm1, %v693_v57, %v695_v2  ;;  %v5486_v14 = vld [vmem:[%s7451_s3 + $0x178] sm:$0xff]   ;;  %v5884_v19 = vld [vmem:[%s7451_s3 + $0x180] sm:$0xff]   ;;  %v703_v25 = vrot.slane %v5821_v58, 4  ;;  %p5898_p10 = scmp.lt.s32.totalorder %s4507_s17, 15 }
  0x26   : > { %4794 = vmatpush3.bf16.msra.mxu1 %v5454_v10  ;;  %v688_v49 = vsel %vm683_vm1, %v685_v42, %v687_v43  ;;  %7477 = vst [vmem:[#allocation4_spill] sm:$0xff] %v5842_v1  ;;  %600 = vst [vmem:[#allocation2 + $0x60] sm:$0xff] %v5842_v1  ;;  %v698_v8 = vsel %vm683_vm1, %v695_v2, %v697_v4  ;;  %v5482_v10 = vld [vmem:[%s7451_s3 + $0x170] sm:$0xff]   ;;  %v705_v29 = vrot.slane %v5828_v60, 4  ;;  %s605_s20 = scalar_select %p470_p11, 1, 0 }
  0x27   : > { %4954 = vmatpush3.bf16.msra.mxu0 %v5455_v11  ;;  %4795 = vmatprep.subr.bf16.mxu1 %v5456_v12  ;;  %v699_v11 = vrot.slane %v5796_v47, 4  ;;  %s7696_s17 = smov (!%p5898_p10, %s4507_s17), 15  ;;  %v5925_v57 = vshrl.u32 %v5738_v23, 16  ;;  %s7700_s24 = smov (!%p462_p12, %s5558_s24), 1 }
  0x28   : > { %4955 = vmatprep.subr.bf16.mxu0 %v5457_v16  ;;  %s7698_s17 = smov (!%p5898_p10, %s7696_s17), 15  ;;  %s4256_s29 = sshll.u32 %s7692_s25, 1 }
  0x29   : > { %v700_v15 = vsel %vm683_vm1, %v697_v4, %v699_v11  ;;  %s5354_s22 = smul.u32 3, %s7698_s17  ;;  %s465_s10 = sadd.s32 %s4256_s29, %s7700_s24 }
  0x2a   : > { %4796 = vmatpush3.bf16.msra.mxu1 %v5456_v12  ;;  %v701_v12 = vrot.slane %v5806_v51, 4  ;;  %s4257_s11 = sshll.u32 %s465_s10, 1 }
  0x2b   : > { %4956 = vmatpush3.bf16.msra.mxu0 %v5457_v16  ;;  %4797 = vmatprep.subr.bf16.mxu1 %v5458_v21  ;;  %v5793_v46 = vld [vmem:[#allocation2] sm:$0xf0]  ;;  %s442_s15 = sadd.s32 %s5354_s22, %s5678_s21  ;;  %s467_s14 = scalar_lea.vmem %s7455_s7, %s4257_s11 }
  0x2c   : > { %4957 = vmatprep.subr.bf16.mxu0 %v5459_v33  ;;  %v684_v48 = vrot.slane %v5793_v46, 4  ;;  %v702_v16 = vsel %vm683_vm1, %v699_v11, %v701_v12  ;;  %v623_v18 = vld [vmem:[#allocation2] sm:$0xf8]  ;;  %s4253_s23 = sshll.u32 %s442_s15, 2  ;;  %v5953_v11 = vshll.u32 %v5774_v38, 16 }
  0x2d   : > { %v900_v26 = vshrl.u32 %v623_v18, 16  ;;  %v903_v27 = vshll.u32 %v623_v18, 16  ;;  %s5950_s21 = scalar_lea.vmem %s7450_s2, %s4253_s23 }
  0x2e   : > { %4798 = vmatpush3.bf16.msra.mxu1 %v5458_v21  ;;  %v686_v52 = vsel %vm683_vm1, %v684_v48, %v685_v42  ;;  %v7457_v21 = vshll.u32 %v5747_v30, 16  ;;  %v704_v42 = vsel %vm683_vm1, %v701_v12, %v703_v25  ;;  %v706_v48 = vsel %vm683_vm1, %v703_v25, %v705_v29  ;;  %v602_v12 = vld [vmem:[%s5950_s21] sm:$0xf] }
  0x2f   : > { %4958 = vmatpush3.bf16.msra.mxu0 %v5459_v33  ;;  %4823 = vmatprep.subr.bf16.mxu1 %v5468_v39  ;;  %v5894_v33 = vld [vmem:[%s7451_s3 + $0x80] sm:$0xff]   ;;  %v902_v43 = vrot.slane %v900_v26, 3 }
  0x30   : > { %4983 = vmatprep.subr.bf16.mxu0 %v5462_v41  ;;  %4799 = vmatprep.mubr.bf16.mxu1 %v686_v52  ;;  %v913_v45 = vrot.slane %v7457_v21, 4  ;;  %v2100_v52 = vrot.slane %v5760_v35, 1 }
  0x31   : > { %4800 = vmatmul.mubr.bf16.vlgmr.msra.gmra.mrb[0].mxu1 %v688_v49  ;;  %v5910_v49 = vld [vmem:[#allocation2 + $0x60] sm:$0xf] }
  0x32   : > { %4960 = vmatmul.mubr.bf16.vlgmr.msra.gmra.mrb[0].mxu0 %v5728_v20  ;;  %4803 = vmatprep.mubr.bf16.mxu1 %v690_v53  ;;  %v7458_v20 = vshrl.u32 %v5747_v30, 16  ;;  %v5918_v53 = vshll.u32 %v5738_v23, 16  ;;  %v2104_v2 = vor.u32 %v2100_v52, %v5745_v28 }
  0x33   : > { %4984 = vmatpush3.bf16.msra.mxu0 %v5462_v41  ;;  %4963 = vmatprep.mubr.bf16.mxu0 %v5738_v23 }
  0x34   : > { %4985 = vmatprep.subr.bf16.mxu0 %v5463_v44  ;;  %4824 = vmatpush3.bf16.msra.mxu1 %v5468_v39  ;;  %v2095_v39 = vrot.slane %v5751_v32, 1  ;;  %v910_v41 = vrot.slane %v7458_v20, 3  ;;  %v2108_v23 = vrot.slane %v5918_v53, 1 }
  0x35   : > { %4825 = vmatprep.subr.bf16.mxu1 %v5471_v50 }
  0x36   : > { %v2109_v18 = vsel %vm2089_vm2, %v2104_v2, %v2108_v23 }
  0x37   : > { %4986 = vmatpush3.bf16.msra.mxu0 %v5463_v44  ;;  %v905_v44 = vrot.slane %v903_v27, 4  ;;  %v5968_v27 = vshrl.u32 %v5774_v38, 16 }
  0x38   : > { %4987 = vmatprep.subr.bf16.mxu0 %v5466_v54  ;;  %4826 = vmatpush3.bf16.msra.mxu1 %v5471_v50  ;;  %v2096_v50 = vor.u32 %v2095_v39, %v5734_v22  ;;  %v5489_v39 = vld [vmem:[%s7451_s3 + $0x188] sm:$0xff]  }
  0x39   : > { %4827 = vmatprep.subr.bf16.mxu1 %v5473_v59  ;;  %4804 = vmatmul.mubr.bf16.gmra.mrb[4].mxu1 %v692_v61  ;;  %v906_v55 = vor.u32 %v905_v44, %v902_v43  ;;  %v940_v43 = vrot.slane %v5918_v53, 4 }
  0x3a   : > { %4964 = vmatmul.mubr.bf16.gmra.mrb[4].mxu0 %v5741_v24  ;;  %4807 = vmatprep.mubr.bf16.mxu1 %v694_v62  ;;  %v2101_v61 = vsel %vm2089_vm2, %v2096_v50, %v2100_v52  ;;  %v919_v62 = vrot.slane %v5734_v22, 3  ;;  %v5493_v52 = vld [vmem:[%s7451_s3 + $0x88] sm:$0xff]  }
  0x3b   : > { %4988 = vmatpush3.bf16.msra.mxu0 %v5466_v54  ;;  %4967 = vmatprep.mubr.bf16.mxu0 %v5774_v38  ;;  %v707_v54 = vrot.slane %v5910_v49, 4  ;;  %v2124_v38 = vrot.slane %v5953_v11, 1 }
  0x3c   : > { %4989 = vmatprep.subr.bf16.mxu0 %v5470_v56  ;;  %4828 = vmatpush3.bf16.msra.mxu1 %v5473_v59  ;;  %v5928_v59 = vshll.u32 %v5741_v24, 16 }
  0x3d   : > { %4829 = vmatprep.subr.bf16.mxu1 %v5476_v63 }
  0x3e   : > { %v949_v50 = vrot.slane %v5928_v59, 4 }
  0x3f   : > { %4990 = vmatpush3.bf16.msra.mxu0 %v5470_v56  ;;  %v914_v56 = vor.u32 %v913_v45, %v910_v41 }
  0x40   : > { %4991 = vmatprep.subr.bf16.mxu0 %v5475_v0  ;;  %4830 = vmatpush3.bf16.msra.mxu1 %v5476_v63  ;;  %v606_v63 = vstv %s605_s20 }
  0x41   : > { %4831 = vmatprep.subr.bf16.mxu1 %v5479_v5  ;;  %4808 = vmatmul.mubr.bf16.gmra.mrb[8].mxu1 %v696_v7  ;;  %v915_v4 = vsel %vm898_vm3, %v906_v55, %v914_v56  ;;  %v931_v7 = vrot.slane %v5760_v35, 4  ;;  %vm5941_vm4 = vcmp.eq.s32.totalorder %v606_v63, 1  ;;  %v6005_v63 = vshrl.u32 %v5796_v47, 16 }
  0x42   : > { %4968 = vmatmul.mubr.bf16.gmra.mrb[8].mxu0 %v5780_v40  ;;  %4811 = vmatprep.mubr.bf16.mxu1 %v698_v8 }
  0x43   : > { %4971 = vmatprep.mubr.bf16.mxu0 %v5796_v47  ;;  %4992 = vmatpush3.bf16.msra.mxu0 %v5475_v0  ;;  %v708_v0 = vsel %vm683_vm1, %v705_v29, %v707_v54  ;;  %v5971_v29 = vshll.u32 %v5780_v40, 16  ;;  %v5490_v54 = vld [vmem:[%s7451_s3 + $0x190] sm:$0xff]  }
  0x44   : > { %4993 = vmatprep.subr.bf16.mxu0 %v5477_v3  ;;  %4832 = vmatpush3.bf16.msra.mxu1 %v5479_v5  ;;  %v928_v5 = vrot.slane %v5745_v28, 3 }
  0x45   : > { %4833 = vmatprep.subr.bf16.mxu1 %v5481_v9  ;;  %v2132_v55 = vrot.slane %v5971_v29, 1 }
  0x46   : > { %v932_v25 = vor.u32 %v931_v7, %v928_v5  ;;  %v6021_v5 = vshrl.u32 %v5806_v51, 16  ;;  %v6024_v7 = vshrl.u32 %v5821_v58, 16 }
  0x47   : > { %4994 = vmatpush3.bf16.msra.mxu0 %v5477_v3  ;;  %v922_v3 = vrot.slane %v5751_v32, 4 }
  0x48   : > { %4995 = vmatprep.subr.bf16.mxu0 %v5482_v10  ;;  %4834 = vmatpush3.bf16.msra.mxu1 %v5481_v9  ;;  %v2112_v9 = vor.u32 %v2108_v23, %v5925_v57 }
  0x49   : > { %4835 = vmatprep.subr.bf16.mxu1 %v5484_v13  ;;  %4812 = vmatmul.mubr.bf16.gmra.mrb[12].mxu1 %v700_v15  ;;  %v608_v15 = vsel %vm5941_vm4, 0, %v602_v12 }
  0x4a   : > { %4972 = vmatmul.mubr.bf16.gmra.mrb[12].mxu0 %v5806_v51  ;;  %4815 = vmatprep.mubr.bf16.mxu1 %v702_v16 }
  0x4b   : > { %4975 = vmatprep.mubr.bf16.mxu0 %v5821_v58  ;;  %4996 = vmatpush3.bf16.msra.mxu0 %v5482_v10  ;;  %v2116_v10 = vrot.slane %v5928_v59, 1 }
  0x4c   : > { %4997 = vmatprep.subr.bf16.mxu0 %v5486_v14  ;;  %4836 = vmatpush3.bf16.msra.mxu1 %v5484_v13  ;;  %v603_v13 = vld [vmem:[%s5950_s21 + $0x4] sm:$0xf] }
  0x4d   : > { %4837 = vmatprep.subr.bf16.mxu1 %v5487_v17  ;;  %v609_v16 = vsel %vm5941_vm4, 0, %v603_v13  ;;  %v2117_v41 = vsel %vm2089_vm2, %v2112_v9, %v2116_v10 }
  0x4e   : > { %v5965_v26 = vcombine.low %v608_v15, %v609_v16  ;;  %v5496_v15 = vld [vmem:[%s7451_s3 + $0x98] sm:$0xff]   ;;  %v6040_v16 = vshll.u32 %v5821_v58, 16  ;;  %v6054_v58 = vshrl.u32 %v5842_v1, 16 }
  0x4f   : > { %4998 = vmatpush3.bf16.msra.mxu0 %v5486_v14  ;;  %v923_v14 = vor.u32 %v922_v3, %v919_v62  ;;  %v6002_v62 = vshrl.u32 %v5780_v40, 16  ;;  %v6009_v3 = vshll.u32 %v5806_v51, 16  ;;  %v5492_v40 = vld [vmem:[%s7451_s3 + $0x198] sm:$0xff]  }
  0x50   : > { %5023 = vmatprep.subr.bf16.mxu0 %v5884_v19  ;;  %4838 = vmatpush3.bf16.msra.mxu1 %v5487_v17  ;;  %v5962_v17 = vshrl.u32 %v5741_v24, 16  ;;  %v937_v24 = vrot.slane %v5925_v57, 3  ;;  %621 = vst [vmem:[#allocation2 + $0x70] sm:$0xff] %v5965_v26 }
  0x51   : > { %4863 = vmatprep.subr.bf16.mxu1 %v5894_v33  ;;  %4816 = vmatmul.mubr.bf16.gmra.mrb[16].mxu1 %v704_v42  ;;  %v924_v42 = vsel %vm898_vm3, %v914_v56, %v923_v14  ;;  %v933_v44 = vsel %vm898_vm3, %v923_v14, %v932_v25  ;;  %v5996_v56 = vshll.u32 %v5796_v47, 16  ;;  %v5494_v47 = vld [vmem:[%s7451_s3 + $0x90] sm:$0xff]   ;;  %v2136_v13 = vor.u32 %v2132_v55, %v6002_v62 }
  0x52   : > { %4976 = vmatmul.mubr.bf16.gmra.mrb[16].mxu0 %v5828_v60  ;;  %4819 = vmatprep.mubr.bf16.mxu1 %v706_v48  ;;  %v2120_v45 = vor.u32 %v2116_v10, %v5962_v17  ;;  %v946_v48 = vrot.slane %v5962_v17, 3  ;;  %v964_v51 = vrot.slane %v6002_v62, 3  ;;  %v967_v14 = vrot.slane %v5971_v29, 4 }
  0x53   : > { %4979 = vmatprep.mubr.bf16.mxu0 %v5842_v1  ;;  %v2140_v10 = vrot.slane %v5996_v56, 1 }
  0x54   : > { %v950_v2 = vor.u32 %v949_v50, %v946_v48  ;;  %v968_v48 = vor.u32 %v967_v14, %v964_v51  ;;  %v973_v50 = vrot.slane %v6005_v63, 3  ;;  %v7461_v51 = vshll.u32 %v5965_v26, 16 }
  0x59   : > { %4820 = vmatmul.mubr.bf16.gmra.mrb[20].mxu1 %v708_v0  ;;  %v2125_v0 = vsel %vm2089_vm2, %v2120_v45, %v2124_v38  ;;  %v2141_v45 = vsel %vm2089_vm2, %v2136_v13, %v2140_v10  ;;  %v7460_v13 = vshrl.u32 %v5965_v26, 16 }
  0x5a   : > { %4980 = vmatmul.mubr.bf16.gmra.mrb[20].mxu0 %v5854_v6  ;;  %4839 = vmatprep.mubr.bf16.mxu1 %v915_v4  ;;  %v955_v4 = vrot.slane %v5968_v27, 3 }
  0x5b   : > { %4999 = vmatprep.mubr.bf16.mxu0 %v2101_v61  ;;  %v5998_v61 = vor.u32 %v940_v43, %v937_v24  ;;  %v6048_v24 = vshrl.u32 %v5828_v60, 16  ;;  %v6057_v43 = vshll.u32 %v5842_v1, 16  ;;  %v2534_v34 = vrot.slane %v7460_v13, 3  ;;  %v5501_v13 = vld [vmem:[%s7451_s3 + $0xb0] sm:$0xff]  }
  0x5d   : > { %v942_v9 = vsel %vm898_vm3, %v932_v25, %v5998_v61  ;;  %v6031_v12 = vsel %vm898_vm3, %v5998_v61, %v950_v2  ;;  %v2144_v25 = vor.u32 %v2140_v10, %v6005_v63  ;;  %v2172_v36 = vrot.slane %v6057_v43, 1 }
  0x61   : > { %4840 = vmatmul.mubr.bf16.vlgmr.msra.gmra.mrb[0].mxu1 %v924_v42  ;;  %v6051_v42 = vshll.u32 %v5828_v60, 16  ;;  %v5497_v60 = vld [vmem:[%s7451_s3 + $0x1a8] sm:$0xff]  }
  0x62   : > { %5000 = vmatmul.mubr.bf16.vlgmr.msra.gmra.mrb[0].mxu0 %v2109_v18  ;;  %4843 = vmatprep.mubr.bf16.mxu1 %v933_v44  ;;  %v6063_v44 = vshll.u32 %v5854_v6, 16 }
  0x63   : > { %5024 = vmatpush3.bf16.msra.mxu0 %v5884_v19  ;;  %5003 = vmatprep.mubr.bf16.mxu0 %v2117_v41  ;;  %v2128_v19 = vor.u32 %v2124_v38, %v5968_v27  ;;  %v5495_v41 = vld [vmem:[%s7451_s3 + $0x1a0] sm:$0xff]   ;;  %v6060_v38 = vshrl.u32 %v5854_v6, 16 }
  0x64   : > { %5025 = vmatprep.subr.bf16.mxu0 %v5489_v39  ;;  %4864 = vmatpush3.bf16.msra.mxu1 %v5894_v33  ;;  %v958_v33 = vrot.slane %v5953_v11, 4  ;;  %v2528_v10 = vrot.slane %v6063_v44, 4 }
  0x65   : > { %4865 = vmatprep.subr.bf16.mxu1 %v5493_v52  ;;  %v2133_v23 = vsel %vm2089_vm2, %v2128_v19, %v2132_v55  ;;  %v976_v55 = vrot.slane %v5996_v56, 4 }
  0x66   : > { %v959_v18 = vor.u32 %v958_v33, %v955_v4  ;;  %v982_v4 = vrot.slane %v6021_v5, 3  ;;  %v985_v33 = vrot.slane %v6009_v3, 4 }
  0x67   : > { %5026 = vmatpush3.bf16.msra.mxu0 %v5489_v39  ;;  %v2148_v39 = vrot.slane %v6009_v3, 1 }
  0x68   : > { %5027 = vmatprep.subr.bf16.mxu0 %v5490_v54  ;;  %4866 = vmatpush3.bf16.msra.mxu1 %v5493_v52  ;;  %v5498_v52 = vld [vmem:[%s7451_s3 + $0xa0] sm:$0xff]   ;;  %v6093_v14 = vsel %vm898_vm3, %v959_v18, %v968_v48  ;;  %v986_v20 = vor.u32 %v985_v33, %v982_v4  ;;  %v2180_v33 = vrot.slane %v6063_v44, 1 }
  0x69   : > { %4867 = vmatprep.subr.bf16.mxu1 %v5494_v47  ;;  %4844 = vmatmul.mubr.bf16.gmra.mrb[4].mxu1 %v942_v9  ;;  %v2149_v19 = vsel %vm2089_vm2, %v2144_v25, %v2148_v39  ;;  %v2525_v9 = vrot.slane %v6060_v38, 3 }
  0x6a   : > { %5004 = vmatmul.mubr.bf16.gmra.mrb[4].mxu0 %v2125_v0  ;;  %4847 = vmatprep.mubr.bf16.mxu1 %v6031_v12  ;;  %v2156_v0 = vrot.slane %v6040_v16, 1 }
  0x6b   : > { %5028 = vmatpush3.bf16.msra.mxu0 %v5490_v54  ;;  %5007 = vmatprep.mubr.bf16.mxu0 %v2133_v23  ;;  %v6075_v54 = vsel %vm898_vm3, %v950_v2, %v959_v18  ;;  %v2152_v23 = vor.u32 %v2148_v39, %v6021_v5  ;;  %v5499_v2 = vld [vmem:[%s7451_s3 + $0xa8] sm:$0xff]   ;;  %v991_v39 = vrot.slane %v6024_v7, 3  ;;  %v2537_v18 = vrot.slane %v7461_v51, 4 }
  0x6c   : > { %5029 = vmatprep.subr.bf16.mxu0 %v5492_v40  ;;  %4868 = vmatpush3.bf16.msra.mxu1 %v5494_v47  ;;  %v604_v47 = vld [vmem:[%s5950_s21 + $0x8] sm:$0xf]  ;;  %v2160_v25 = vor.u32 %v2156_v0, %v6024_v7  ;;  %v6114_v51 = vor.u32 %v2528_v10, %v2525_v9 }
  0x6d   : > { %4869 = vmatprep.subr.bf16.mxu1 %v5496_v15  ;;  %v2157_v21 = vsel %vm2089_vm2, %v2152_v23, %v2156_v0  ;;  %v6116_v8 = vor.u32 %v2537_v18, %v2534_v34  ;;  %v1000_v0 = vrot.slane %v6048_v24, 3  ;;  %v7482_v23 = vrot.slane %v5734_v22, 7 }
  0x6e   : > { %7481 = vst [vmem:[#allocation5_spill] sm:$0xff] %v6114_v51 }
  0x6f   : > { %5030 = vmatpush3.bf16.msra.mxu0 %v5492_v40  ;;  %v2164_v40 = vrot.slane %v6051_v42, 1  ;;  %v6128_v34 = vsel %vm1527_vm5, %v7482_v23, %v5771_v37  ;;  %v2812_v23 = vrot.slane %v5854_v6, 4  ;;  %v2814_v6 = vrot.slane %v5965_v26, 4 }
  0x70   : > { %5031 = vmatprep.subr.bf16.mxu0 %v5495_v41  ;;  %4870 = vmatpush3.bf16.msra.mxu1 %v5496_v15  ;;  %v5500_v15 = vld [vmem:[%s7451_s3 + $0x1b0] sm:$0xff]   ;;  %7483 = vst [vmem:[#allocation6_spill] sm:$0xff] %v6128_v34 }
  0x71   : > { %4871 = vmatprep.subr.bf16.mxu1 %v5498_v52  ;;  %4848 = vmatmul.mubr.bf16.gmra.mrb[8].mxu1 %v6075_v54 }
  0x72   : > { %5008 = vmatmul.mubr.bf16.gmra.mrb[8].mxu0 %v2141_v45  ;;  %v994_v45 = vrot.slane %v6040_v16, 4  ;;  %4851 = vmatprep.mubr.bf16.mxu1 %v6093_v14 }
  0x73   : > { %5011 = vmatprep.mubr.bf16.mxu0 %v2149_v19  ;;  %5032 = vmatpush3.bf16.msra.mxu0 %v5495_v41  ;;  %v610_v41 = vsel %vm5941_vm4, 0, %v604_v47  ;;  %v977_v19 = vor.u32 %v976_v55, %v973_v50  ;;  %v2165_v50 = vsel %vm2089_vm2, %v2160_v25, %v2164_v40  ;;  %v2168_v55 = vor.u32 %v2164_v40, %v6048_v24 }
  0x74   : > { %5033 = vmatprep.subr.bf16.mxu0 %v5497_v60  ;;  %v4273_v31 = vcombine.low %v610_v41, %v610_v41  ;;  %4872 = vmatpush3.bf16.msra.mxu1 %v5498_v52  ;;  %v5502_v52 = vld [vmem:[%s7451_s3 + $0x1b8] sm:$0xff]   ;;  %v995_v4 = vor.u32 %v994_v45, %v991_v39  ;;  %v6135_v40 = vsel %vm898_vm3, %v6114_v51, %v6116_v8  ;;  %v1007_v25 = vshrl.u32 %v5910_v49, 16  ;;  %v2071_v45 = vld [vmem:[#allocation2 + $0x70] sm:$0x1] }
  0x75   : > { %4873 = vmatprep.subr.bf16.mxu1 %v5499_v2  ;;  %7484 = vst [vmem:[#allocation7_spill] sm:$0xff] %v6135_v40  ;;  %v2176_v47 = vor.u32 %v2172_v36, %v6054_v58  ;;  %v6139_v9 = vsel %vm898_vm3, %v968_v48, %v977_v19  ;;  %v6142_v37 = vsel %vm898_vm3, %v977_v19, %v986_v20  ;;  %v5503_v39 = vld [vmem:[%s7451_s3 + $0xb8] sm:$0xff]   ;;  %v6152_v48 = vld [vmem:[%s7451_s3 + $0x1c0] sm:$0xff]   ;;  %v1010_v41 = vshll.u32 %v5910_v49, 16 }
  0x76   : > { %622 = vst [vmem:[#allocation2 + $0x78] sm:$0xf] %v4273_v31  ;;  %v2403_v31 = vld [vmem:[#allocation2 + $0x18] sm:$0xf8]  ;;  %v2173_v10 = vsel %vm2089_vm2, %v2168_v55, %v2172_v36  ;;  %v2184_v19 = vor.u32 %v2180_v33, %v6060_v38  ;;  %v1227_v55 = vshll.u32 %v5793_v46, 16  ;;  %v6173_v49 = vld [vmem:[%s7451_s3 + $0xc0] sm:$0xff]  }
  0x77   : > { %5034 = vmatpush3.bf16.msra.mxu0 %v5497_v60  ;;  %v1003_v60 = vrot.slane %v6051_v42, 4  ;;  %v2434_v36 = vshrl.u32 %v2403_v31, 16  ;;  %v2181_v18 = vsel %vm2089_vm2, %v2176_v47, %v2180_v33 }
  0x78   : > { %5035 = vmatprep.subr.bf16.mxu0 %v5500_v15  ;;  %4874 = vmatpush3.bf16.msra.mxu1 %v5499_v2 }
  0x79   : > { %v6157_v2 = vor.u32 %v1003_v60, %v1000_v0  ;;  %4875 = vmatprep.subr.bf16.mxu1 %v5501_v13  ;;  %4852 = vmatmul.mubr.bf16.gmra.mrb[12].mxu1 %v6139_v9  ;;  %v2186_v60 = vshll.u32 %v2071_v45, 16  ;;  %v2436_v47 = vrot.slane %v2434_v36, 3  ;;  %v1012_v45 = vrot.slane %v1010_v41, 4 }
  0x7a   : > { %5012 = vmatmul.mubr.bf16.gmra.mrb[12].mxu0 %v2157_v21  ;;  %v6155_v21 = vsel %vm898_vm3, %v986_v20, %v995_v4  ;;  %4855 = vmatprep.mubr.bf16.mxu1 %v6142_v37  ;;  %v1224_v20 = vshrl.u32 %v5793_v46, 16  ;;  %v7486_v36 = vshrl.u32 %v5747_v30, 16 }
  0x7b   : > { %5015 = vmatprep.mubr.bf16.mxu0 %v2165_v50  ;;  %5036 = vmatpush3.bf16.msra.mxu0 %v5500_v15  ;;  %v2437_v15 = vshll.u32 %v2403_v31, 16  ;;  %v7465_v50 = vrot.slane %v5842_v1, 4  ;;  %v6186_v51 = vsel %vm898_vm3, %v995_v4, %v6157_v2 }
  0x7c   : > { %5037 = vmatprep.subr.bf16.mxu0 %v5502_v52  ;;  %4876 = vmatpush3.bf16.msra.mxu1 %v5501_v13  ;;  %v1226_v41 = vrot.slane %v1224_v20, 4 }
  0x7d   : > { %v6167_v0 = vld [vmem:[#allocation2 + $0x78] sm:$0xf]  ;;  %4877 = vmatprep.subr.bf16.mxu1 %v5503_v39  ;;  %v2439_v31 = vrot.slane %v2437_v15, 4  ;;  %v6181_v46 = vsel %vm683_vm1, %v7465_v50, %v2812_v23  ;;  %v1231_v15 = vrot.slane %v7486_v36, 4  ;;  %v6195_v50 = vsel %vm683_vm1, %v2812_v23, %v2814_v6 }
  0x7e   : > { %7485 = vst [vmem:[#allocation8_spill] sm:$0xff] %v6167_v0  ;;  %v2541_v33 = vshrl.u32 %v6167_v0, 16  ;;  %v2544_v13 = vshll.u32 %v6167_v0, 16  ;;  %v7487_v0 = vshll.u32 %v5747_v30, 16 }
  0x7f   : > { %5038 = vmatpush3.bf16.msra.mxu0 %v5502_v52  ;;  %v1009_v52 = vrot.slane %v1007_v25, 3  ;;  %v2188_v25 = vrot.slane %v2186_v60, 1  ;;  %v1240_v60 = vrot.slane %v5760_v35, 5 }
  0x80   : > { %5063 = vmatprep.subr.bf16.mxu0 %v6152_v48  ;;  %v2543_v34 = vrot.slane %v2541_v33, 3  ;;  %v2546_v40 = vrot.slane %v2544_v13, 4  ;;  %4878 = vmatpush3.bf16.msra.mxu1 %v5503_v39  ;;  %v1232_v1 = vrot.slane %v7487_v0, 5  ;;  %v2440_v33 = vor.u32 %v2439_v31, %v2436_v47  ;;  %v3031_v13 = vld [vmem:[#allocation2 + $0x78] sm:$0x1f] }
  0x81   : > { %4903 = vmatprep.subr.bf16.mxu1 %v6173_v49  ;;  %4856 = vmatmul.mubr.bf16.gmra.mrb[16].mxu1 %v6155_v21  ;;  %v1013_v39 = vor.u32 %v1012_v45, %v1009_v52  ;;  %v2189_v23 = vsel %vm2089_vm2, %v2184_v19, %v2188_v25  ;;  %v3094_v19 = vrot.slane %v6063_v44, 5  ;;  %v3102_v45 = vshrl.u32 %v3031_v13, 16 }
  0x82   : > { %5016 = vmatmul.mubr.bf16.gmra.mrb[16].mxu0 %v2173_v10  ;;  %v1229_v10 = vrot.slane %v1227_v55, 5  ;;  %v2547_v4 = vor.u32 %v2546_v40, %v2543_v34  ;;  %4859 = vmatprep.mubr.bf16.mxu1 %v6186_v51  ;;  %v1233_v0 = vor.u32 %v1232_v1, %v1231_v15  ;;  %v2449_v20 = vsel %vm898_vm3, %v2440_v33, %v5998_v61 }
  0x83   : > { %5019 = vmatprep.mubr.bf16.mxu0 %v2181_v18  ;;  %v1014_v34 = vsel %vm898_vm3, %v6157_v2, %v1013_v39  ;;  %v1235_v40 = vrot.slane %v5734_v22, 4  ;;  %v1236_v55 = vrot.slane %v5751_v32, 5  ;;  %v3093_v1 = vrot.slane %v6060_v38, 4 }
  0x84   : > { %v6201_v30 = vsel %vm898_vm3, %v6116_v8, %v2547_v4  ;;  %v1230_v18 = vor.u32 %v1229_v10, %v1226_v41  ;;  %v1239_v8 = vrot.slane %v5745_v28, 4  ;;  %v7488_v61 = vshrl.u32 %v5965_v26, 16  ;;  %v5505_v4 = vld [vmem:[%s7451_s3 + $0x1c8] sm:$0xff]  }
  0x85   : > { %v7489_v22 = vshll.u32 %v5965_v26, 16  ;;  %v1237_v32 = vor.u32 %v1236_v55, %v1235_v40  ;;  %v3105_v36 = vshll.u32 %v3031_v13, 16  ;;  %v6220_v15 = vor.u32 %v3094_v19, %v3093_v1  ;;  %v5510_v1 = vld [vmem:[%s7451_s3 + $0xd0] sm:$0xff]  }
  0x86   : > { %v1234_v47 = vsel %vm1222_vm6, %v1230_v18, %v1233_v0  ;;  %v3097_v31 = vrot.slane %v7488_v61, 4  ;;  %v1241_v35 = vor.u32 %v1240_v60, %v1239_v8  ;;  %v3104_v41 = vrot.slane %v3102_v45, 4  ;;  %v5506_v8 = vld [vmem:[%s7451_s3 + $0x1d0] sm:$0xff]   ;;  %v5508_v60 = vld [vmem:[%s7451_s3 + $0x1d8] sm:$0xff]  }
  0x87   : > { %v3098_v52 = vrot.slane %v7489_v22, 5  ;;  %v3107_v10 = vrot.slane %v3105_v36, 5  ;;  %v1247_v40 = vrot.slane %v5962_v17, 4  ;;  %v1248_v55 = vrot.slane %v5928_v59, 5  ;;  %v5511_v22 = vld [vmem:[%s7451_s3 + $0x1e0] sm:$0xff]  }
  0x88   : > { %v1242_v18 = vsel %vm1222_vm6, %v1237_v32, %v1241_v35  ;;  %v1251_v13 = vrot.slane %v5968_v27, 4  ;;  %v1255_v61 = vrot.slane %v6002_v62, 4  ;;  %v2516_v45 = vrot.slane %v6054_v58, 3 }
  0x89   : > { %4860 = vmatmul.mubr.bf16.gmra.mrb[20].mxu1 %v1014_v34  ;;  %v3099_v25 = vor.u32 %v3098_v52, %v3097_v31  ;;  %v3108_v39 = vor.u32 %v3107_v10, %v3104_v41  ;;  %v1244_v34 = vrot.slane %v5918_v53, 5  ;;  %v1256_v31 = vrot.slane %v5971_v29, 5 }
  0x8a   : > { %5020 = vmatmul.mubr.bf16.gmra.mrb[20].mxu0 %v2189_v23  ;;  %4879 = vmatprep.mubr.bf16.mxu1 %v1234_v47  ;;  %v1238_v23 = vsel %vm1222_vm6, %v1233_v0, %v1237_v32  ;;  %v5509_v0 = vld [vmem:[%s7451_s3 + $0xc8] sm:$0xff]   ;;  %v2519_v36 = vrot.slane %v6057_v43, 4  ;;  %v1259_v41 = vrot.slane %v6005_v63, 4  ;;  %v1260_v10 = vrot.slane %v5996_v56, 5 }
  0x8b   : > { %5039 = vmatprep.mubr.bf16.mxu0 %v2449_v20  ;;  %v6227_v33 = vsel %vm1222_vm6, %v6220_v15, %v3099_v25  ;;  %v1243_v20 = vrot.slane %v5925_v57, 4  ;;  %v5513_v32 = vld [vmem:[%s7451_s3 + $0x1e8] sm:$0xff]  }
  0x91   : > { %4880 = vmatmul.mubr.bf16.vlgmr.msra.gmra.mrb[0].mxu1 %v1238_v23  ;;  %v1264_v23 = vrot.slane %v6009_v3, 5 }
  0x92   : > { %5040 = vmatmul.mubr.bf16.vlgmr.msra.gmra.mrb[0].mxu0 %v6031_v12  ;;  %v6242_v12 = vsel %vm1222_vm6, %v3099_v25, %v3108_v39  ;;  %4883 = vmatprep.mubr.bf16.mxu1 %v1242_v18  ;;  %v1263_v39 = vrot.slane %v6021_v5, 4  ;;  %v5515_v18 = vld [vmem:[%s7451_s3 + $0xe8] sm:$0xff]  }
  0x93   : > { %5064 = vmatpush3.bf16.msra.mxu0 %v6152_v48  ;;  %5043 = vmatprep.mubr.bf16.mxu0 %v6075_v54  ;;  %v6247_v48 = vor.u32 %v1244_v34, %v1243_v20  ;;  %v1249_v54 = vor.u32 %v1248_v55, %v1247_v40  ;;  %v5516_v20 = vld [vmem:[%s7451_s3 + $0x1f0] sm:$0xff]  }
  0x94   : > { %5065 = vmatprep.subr.bf16.mxu0 %v5505_v4  ;;  %4904 = vmatpush3.bf16.msra.mxu1 %v6173_v49  ;;  %v1252_v49 = vrot.slane %v5953_v11, 5  ;;  %v1265_v34 = vor.u32 %v1264_v23, %v1263_v39  ;;  %v5517_v55 = vld [vmem:[%s7451_s3 + $0xf0] sm:$0xff]   ;;  %v7491_v39 = vld [vmem:[#allocation7_spill] sm:$0xff] }
  0x95   : > { %4905 = vmatprep.subr.bf16.mxu1 %v5509_v0  ;;  %v1246_v19 = vsel %vm1222_vm6, %v1241_v35, %v6247_v48  ;;  %v6263_v47 = vsel %vm1222_vm6, %v6247_v48, %v1249_v54  ;;  %v5514_v35 = vld [vmem:[%s7451_s3 + $0xe0] sm:$0xff]  }
  0x96   : > { %v1253_v52 = vor.u32 %v1252_v49, %v1251_v13  ;;  %v1204_v13 = vld [vmem:[#allocation2 + $0x60] sm:$0x1f]  ;;  %v5519_v49 = vld [vmem:[%s7451_s3 + $0xf8] sm:$0xff]  }
  0x97   : > { %5066 = vmatpush3.bf16.msra.mxu0 %v5505_v4 }
  0x98   : > { %5067 = vmatprep.subr.bf16.mxu0 %v5506_v8  ;;  %4906 = vmatpush3.bf16.msra.mxu1 %v5509_v0  ;;  %v6284_v25 = vsel %vm1222_vm6, %v1249_v54, %v1253_v52  ;;  %v5518_v0 = vld [vmem:[%s7451_s3 + $0x1f8] sm:$0xff]   ;;  %v1267_v54 = vrot.slane %v6024_v7, 4 }
  0x99   : > { %4907 = vmatprep.subr.bf16.mxu1 %v5510_v1  ;;  %4884 = vmatmul.mubr.bf16.gmra.mrb[4].mxu1 %v1246_v19  ;;  %v1272_v19 = vrot.slane %v6051_v42, 5 }
  0x9a   : > { %5044 = vmatmul.mubr.bf16.gmra.mrb[4].mxu0 %v6093_v14  ;;  %v5512_v14 = vld [vmem:[%s7451_s3 + $0xd8] sm:$0xff]   ;;  %4887 = vmatprep.mubr.bf16.mxu1 %v6263_v47 }
  0x9b   : > { %5068 = vmatpush3.bf16.msra.mxu0 %v5506_v8  ;;  %5047 = vmatprep.mubr.bf16.mxu0 %v6139_v9  ;;  %v1257_v9 = vor.u32 %v1256_v31, %v1255_v61  ;;  %v1276_v31 = vshrl.u32 %v1204_v13, 16 }
  0x9c   : > { %5069 = vmatprep.subr.bf16.mxu0 %v5508_v60  ;;  %4908 = vmatpush3.bf16.msra.mxu1 %v5510_v1  ;;  %v1271_v1 = vrot.slane %v6048_v24, 4 }
  0x9d   : > { %4909 = vmatprep.subr.bf16.mxu1 %v5512_v14  ;;  %v6290_v4 = vsel %vm1222_vm6, %v1253_v52, %v1257_v9 }
  0x9f   : > { %5070 = vmatpush3.bf16.msra.mxu0 %v5508_v60  ;;  %v1268_v60 = vrot.slane %v6040_v16, 5 }
  0xa0   : > { %5071 = vmatprep.subr.bf16.mxu0 %v5511_v22  ;;  %4910 = vmatpush3.bf16.msra.mxu1 %v5512_v14  ;;  %v1279_v14 = vshll.u32 %v1204_v13, 16  ;;  %v5530_v13 = vld [vmem:[#allocation2 + $0x30] sm:$0xff] }
  0xa1   : > { %4911 = vmatprep.subr.bf16.mxu1 %v5514_v35  ;;  %4888 = vmatmul.mubr.bf16.gmra.mrb[8].mxu1 %v6284_v25  ;;  %v1269_v61 = vor.u32 %v1268_v60, %v1267_v54  ;;  %v7492_v54 = vld [vmem:[#allocation3_spill] sm:$0xff] }
  0xa2   : > { %5048 = vmatmul.mubr.bf16.gmra.mrb[8].mxu0 %v6142_v37  ;;  %v2520_v37 = vor.u32 %v2519_v36, %v2516_v45  ;;  %4891 = vmatprep.mubr.bf16.mxu1 %v6290_v4  ;;  %v6334_v45 = vld [vmem:[#allocation2 + $0x18] sm:$0xf0] }
  0xa3   : > { %5051 = vmatprep.mubr.bf16.mxu0 %v6155_v21  ;;  %5072 = vmatpush3.bf16.msra.mxu0 %v5511_v22  ;;  %v1261_v21 = vor.u32 %v1260_v10, %v1259_v41  ;;  %v7490_v22 = vld [vmem:[#allocation5_spill] sm:$0xff]  ;;  %v6337_v36 = vsel %vm1222_vm6, %v1265_v34, %v1269_v61  ;;  %v1281_v41 = vrot.slane %v1279_v14, 5  ;;  %v1559_v14 = vrot.slane %v5962_v17, 7 }
  0xa4   : > { %5073 = vmatprep.subr.bf16.mxu0 %v5513_v32  ;;  %4912 = vmatpush3.bf16.msra.mxu1 %v5514_v35  ;;  %v2521_v40 = vsel %vm898_vm3, %v6157_v2, %v2520_v37  ;;  %v2530_v52 = vsel %vm898_vm3, %v2520_v37, %v7490_v22  ;;  %v1278_v35 = vrot.slane %v1276_v31, 4  ;;  %v5528_v37 = vld [vmem:[#allocation2 + $0x20] sm:$0xff]  ;;  %v1567_v22 = vrot.slane %v5968_v27, 7 }
  0xa5   : > { %4913 = vmatprep.subr.bf16.mxu1 %v5515_v18  ;;  %v6312_v8 = vsel %vm1222_vm6, %v1257_v9, %v1261_v21  ;;  %v6318_v2 = vsel %vm1222_vm6, %v1261_v21, %v1265_v34  ;;  %v6332_v9 = vor.u32 %v1272_v19, %v1271_v1  ;;  %v5529_v1 = vld [vmem:[#allocation2 + $0x28] sm:$0xff]  ;;  %v1562_v17 = vor.u32 %v5928_v59, %v1559_v14 }
  0xa6   : > { %v1282_v21 = vor.u32 %v1281_v41, %v1278_v35  ;;  %v2796_v19 = vrot.slane %v5529_v1, 4  ;;  %v5522_v41 = vld [vmem:[%s7451_s3 + $0x210] sm:$0xff]   ;;  %v1583_v59 = vrot.slane %v6005_v63, 7 }
  0xa7   : > { %5074 = vmatpush3.bf16.msra.mxu0 %v5513_v32  ;;  %v1497_v32 = vld [vmem:[#allocation2 + $0x8] sm:$0x80]  ;;  %v6341_v10 = vsel %vm1222_vm6, %v1269_v61, %v6332_v9 }
  0xa8   : > { %5075 = vmatprep.subr.bf16.mxu0 %v5516_v20  ;;  %4914 = vmatpush3.bf16.msra.mxu1 %v5515_v18  ;;  %v1529_v23 = vshrl.u32 %v1497_v32, 16  ;;  %v2793_v18 = vrot.slane %v6334_v45, 4  ;;  %v1586_v63 = vor.u32 %v5996_v56, %v1583_v59 }
  0xa9   : > { %4915 = vmatprep.subr.bf16.mxu1 %v5517_v55  ;;  %4892 = vmatmul.mubr.bf16.gmra.mrb[12].mxu1 %v6312_v8 }
  0xaa   : > { %5052 = vmatmul.mubr.bf16.gmra.mrb[12].mxu0 %v6186_v51  ;;  %v5520_v51 = vld [vmem:[%s7451_s3 + $0x200] sm:$0xff]   ;;  %4895 = vmatprep.mubr.bf16.mxu1 %v6318_v2  ;;  %v1531_v34 = vrot.slane %v1529_v23, 7 }
  0xab   : > { %5055 = vmatprep.mubr.bf16.mxu0 %v2521_v40  ;;  %5076 = vmatpush3.bf16.msra.mxu0 %v5516_v20  ;;  %v2794_v20 = vrot.slane %v5528_v37, 4 }
  0xac   : > { %5077 = vmatprep.subr.bf16.mxu0 %v5518_v0  ;;  %4916 = vmatpush3.bf16.msra.mxu1 %v5517_v55  ;;  %v1283_v55 = vsel %vm1222_vm6, %v6332_v9, %v1282_v21  ;;  %v1539_v60 = vsel %vm1527_vm5, %v1531_v34, %v7492_v54  ;;  %v1575_v21 = vrot.slane %v6002_v62, 7  ;;  %v5524_v62 = vld [vmem:[%s7451_s3 + $0x220] sm:$0xff]  }
  0xad   : > { %4917 = vmatprep.subr.bf16.mxu1 %v5519_v49  ;;  %v2795_v40 = vsel %vm683_vm1, %v2793_v18, %v2794_v20  ;;  %v2797_v31 = vsel %vm683_vm1, %v2794_v20, %v2796_v19  ;;  %v7494_v18 = vld [vmem:[#allocation6_spill] sm:$0xff] }
  0xae   : > { %v5523_v20 = vld [vmem:[%s7451_s3 + $0x218] sm:$0xff]   ;;  %v1587_v56 = vsel %vm1527_vm5, %v1575_v21, %v1586_v63 }
  0xaf   : > { %5078 = vmatpush3.bf16.msra.mxu0 %v5518_v0  ;;  %v1551_v0 = vrot.slane %v5925_v57, 7 }
  0xb0   : > { %5103 = vmatprep.subr.bf16.mxu0 %v5520_v51  ;;  %4918 = vmatpush3.bf16.msra.mxu1 %v5519_v49  ;;  %v2798_v49 = vrot.slane %v5530_v13, 4  ;;  %v1591_v13 = vrot.slane %v6021_v5, 7 }
  0xb1   : > { %5143 = vmatprep.subr.bf16.mxu1 %v5520_v51  ;;  %4896 = vmatmul.mubr.bf16.gmra.mrb[16].mxu1 %v6337_v36  ;;  %v1554_v61 = vor.u32 %v5918_v53, %v1551_v0  ;;  %v5531_v53 = vld [vmem:[#allocation2 + $0x38] sm:$0xff]  ;;  %v1563_v34 = vsel %vm1527_vm5, %v1551_v0, %v1562_v17  ;;  %v1578_v0 = vor.u32 %v5971_v29, %v1575_v21  ;;  %v1599_v29 = vrot.slane %v6024_v7, 7 }
  0xb2   : > { %5056 = vmatmul.mubr.bf16.gmra.mrb[16].mxu0 %v2530_v52  ;;  %4899 = vmatprep.mubr.bf16.mxu1 %v6341_v10  ;;  %v2799_v57 = vsel %vm683_vm1, %v2796_v19, %v2798_v49  ;;  %v7493_v52 = vrot.slane %v5745_v28, 7  ;;  %v2800_v35 = vrot.slane %v5531_v53, 4  ;;  %v1570_v28 = vor.u32 %v5953_v11, %v1567_v22  ;;  %v5525_v19 = vld [vmem:[%s7451_s3 + $0x228] sm:$0xff]  }
  0xb3   : > { %5059 = vmatprep.mubr.bf16.mxu0 %v7491_v39  ;;  %v5532_v39 = vld [vmem:[#allocation2 + $0x40] sm:$0xff]  ;;  %v1594_v5 = vor.u32 %v6009_v3, %v1591_v13  ;;  %v1607_v53 = vrot.slane %v6048_v24, 7  ;;  %v1615_v3 = vrot.slane %v6054_v58, 7 }
  0xb4   : > { %v1555_v32 = vsel %vm1527_vm5, %v7493_v52, %v1554_v61  ;;  %v2802_v23 = vrot.slane %v5532_v39, 4  ;;  %v2801_v27 = vsel %vm683_vm1, %v2798_v49, %v2800_v35  ;;  %v1571_v11 = vsel %vm1527_vm5, %v1559_v14, %v1570_v28  ;;  %v5535_v61 = vld [vmem:[#allocation2 + $0x58] sm:$0xff]  ;;  %v7495_v14 = vld [vmem:[#allocation4_spill] sm:$0xff] }
  0xb5   : > { %v1579_v49 = vsel %vm1527_vm5, %v1567_v22, %v1578_v0  ;;  %v7496_v22 = vrot.slane %v7495_v14, 4  ;;  %v3053_v39 = vshll.u32 %v6334_v45, 16  ;;  %v1618_v24 = vor.u32 %v6057_v43, %v1615_v3 }
  0xb6   : > { %v2803_v37 = vsel %vm683_vm1, %v2800_v35, %v2802_v23  ;;  %v1595_v35 = vsel %vm1527_vm5, %v1583_v59, %v1594_v5  ;;  %v1623_v28 = vrot.slane %v6060_v38, 7  ;;  %v3089_v59 = vrot.slane %v6054_v58, 4 }
  0xb7   : > { %v3055_v17 = vrot.slane %v3053_v39, 5 }
  0xb8   : > { %v1626_v21 = vor.u32 %v6063_v44, %v1623_v28 }
  0xb9   : > { %4900 = vmatmul.mubr.bf16.gmra.mrb[20].mxu1 %v1283_v55  ;;  %v5534_v55 = vld [vmem:[#allocation2 + $0x50] sm:$0xff] }
  0xba   : > { %5060 = vmatmul.mubr.bf16.gmra.mrb[20].mxu0 %v6201_v30  ;;  %4919 = vmatprep.mubr.bf16.mxu1 %v1539_v60  ;;  %v5521_v30 = vld [vmem:[%s7451_s3 + $0x208] sm:$0xff]   ;;  %v2806_v54 = vrot.slane %v5534_v55, 4 }
  0xbb   : > { %5079 = vmatprep.mubr.bf16.mxu0 %v2795_v40 }
  0xc1   : > { %4920 = vmatmul.mubr.bf16.vlgmr.msra.gmra.mrb[0].mxu1 %v7494_v18 }
  0xc2   : > { %5080 = vmatmul.mubr.bf16.vlgmr.msra.gmra.mrb[0].mxu0 %v2797_v31  ;;  %4923 = vmatprep.mubr.bf16.mxu1 %v1555_v32  ;;  %v2808_v31 = vrot.slane %v5535_v61, 4  ;;  %v5527_v32 = vld [vmem:[%s7451_s3 + $0x238] sm:$0xff]  }
  0xc3   : > { %5104 = vmatpush3.bf16.msra.mxu0 %v5520_v51  ;;  %5083 = vmatprep.mubr.bf16.mxu0 %v2799_v57  ;;  %v1602_v57 = vor.u32 %v6040_v16, %v1599_v29 }
  0xc4   : > { %5105 = vmatprep.subr.bf16.mxu0 %v5521_v30  ;;  %5151 = vmatpush3.bf16.msra.mxu1 %v5520_v51  ;;  %v5533_v51 = vld [vmem:[#allocation2 + $0x48] sm:$0xff]  ;;  %v2809_v7 = vsel %vm683_vm1, %v2806_v54, %v2808_v31  ;;  %v2811_v52 = vsel %vm683_vm1, %v2808_v31, %v7496_v22 }
  0xc5   : > { %5144 = vmatprep.subr.bf16.mxu1 %v5521_v30  ;;  %v2804_v40 = vrot.slane %v5533_v51, 4  ;;  %v1603_v16 = vsel %vm1527_vm5, %v1591_v13, %v1602_v57 }
  0xc7   : > { %5106 = vmatpush3.bf16.msra.mxu0 %v5521_v30  ;;  %v2805_v60 = vsel %vm683_vm1, %v2802_v23, %v2804_v40  ;;  %v2807_v1 = vsel %vm683_vm1, %v2804_v40, %v2806_v54  ;;  %v1610_v23 = vor.u32 %v6051_v42, %v1607_v53 }
  0xc8   : > { %5107 = vmatprep.subr.bf16.mxu0 %v5522_v41  ;;  %5152 = vmatpush3.bf16.msra.mxu1 %v5521_v30  ;;  %v5526_v30 = vld [vmem:[%s7451_s3 + $0x230] sm:$0xff]  }
  0xc9   : > { %5145 = vmatprep.subr.bf16.mxu1 %v5522_v41  ;;  %4924 = vmatmul.mubr.bf16.gmra.mrb[4].mxu1 %v1563_v34 }
  0xca   : > { %5084 = vmatmul.mubr.bf16.gmra.mrb[4].mxu0 %v2801_v27  ;;  %4927 = vmatprep.mubr.bf16.mxu1 %v1571_v11  ;;  %v1611_v27 = vsel %vm1527_vm5, %v1599_v29, %v1610_v23 }
  0xcb   : > { %5108 = vmatpush3.bf16.msra.mxu0 %v5522_v41  ;;  %5087 = vmatprep.mubr.bf16.mxu0 %v2803_v37  ;;  %v1619_v37 = vsel %vm1527_vm5, %v1607_v53, %v1618_v24 }
  0xcc   : > { %5109 = vmatprep.subr.bf16.mxu0 %v5523_v20  ;;  %5153 = vmatpush3.bf16.msra.mxu1 %v5522_v41  ;;  %v3050_v41 = vshrl.u32 %v6334_v45, 16  ;;  %v7497_v45 = vld [vmem:[#allocation8_spill] sm:$0xff] }
  0xcd   : > { %5146 = vmatprep.subr.bf16.mxu1 %v5523_v20 }
  0xce   : > { %v3052_v18 = vrot.slane %v3050_v41, 4 }
  0xcf   : > { %5110 = vmatpush3.bf16.msra.mxu0 %v5523_v20 }
  0xd0   : > { %5111 = vmatprep.subr.bf16.mxu0 %v5524_v62  ;;  %5154 = vmatpush3.bf16.msra.mxu1 %v5523_v20  ;;  %v2816_v20 = vrot.slane %v7497_v45, 4  ;;  %v3056_v42 = vor.u32 %v3055_v17, %v3052_v18 }
  0xd1   : > { %5147 = vmatprep.subr.bf16.mxu1 %v5524_v62  ;;  %4928 = vmatmul.mubr.bf16.gmra.mrb[8].mxu1 %v1579_v49 }
  0xd2   : > { %5088 = vmatmul.mubr.bf16.gmra.mrb[8].mxu0 %v2805_v60  ;;  %4931 = vmatprep.mubr.bf16.mxu1 %v1587_v56  ;;  %v2817_v38 = vsel %vm683_vm1, %v2814_v6, %v2816_v20  ;;  %v3060_v34 = vsel %vm1222_vm6, %v3056_v42, %v6247_v48 }
  0xd3   : > { %5091 = vmatprep.mubr.bf16.mxu0 %v2807_v1  ;;  %5112 = vmatpush3.bf16.msra.mxu0 %v5524_v62 }
  0xd4   : > { %5113 = vmatprep.subr.bf16.mxu0 %v5525_v19  ;;  %5155 = vmatpush3.bf16.msra.mxu1 %v5524_v62 }
  0xd5   : > { %5148 = vmatprep.subr.bf16.mxu1 %v5525_v19 }
  0xd7   : > { %5114 = vmatpush3.bf16.msra.mxu0 %v5525_v19 }
  0xd8   : > { %5115 = vmatprep.subr.bf16.mxu0 %v5526_v30  ;;  %5156 = vmatpush3.bf16.msra.mxu1 %v5525_v19 }
  0xd9   : > { %5149 = vmatprep.subr.bf16.mxu1 %v5526_v30  ;;  %4932 = vmatmul.mubr.bf16.gmra.mrb[12].mxu1 %v1595_v35 }
  0xda   : > { %5092 = vmatmul.mubr.bf16.gmra.mrb[12].mxu0 %v2809_v7  ;;  %4935 = vmatprep.mubr.bf16.mxu1 %v1603_v16 }
  0xdb   : > { %5095 = vmatprep.mubr.bf16.mxu0 %v2811_v52  ;;  %5116 = vmatpush3.bf16.msra.mxu0 %v5526_v30 }
  0xdc   : > { %5117 = vmatprep.subr.bf16.mxu0 %v5527_v32  ;;  %5157 = vmatpush3.bf16.msra.mxu1 %v5526_v30 }
  0xdd   : > { %5150 = vmatprep.subr.bf16.mxu1 %v5527_v32 }
  0xdf   : > { %5118 = vmatpush3.bf16.msra.mxu0 %v5527_v32 }
  0xe0   : > { %5158 = vmatpush3.bf16.msra.mxu1 %v5527_v32 }
  0xe1   : > { %4936 = vmatmul.mubr.bf16.gmra.mrb[16].mxu1 %v1611_v27 }
  0xe2   : > { %5096 = vmatmul.mubr.bf16.gmra.mrb[16].mxu0 %v6181_v46  ;;  %4939 = vmatprep.mubr.bf16.mxu1 %v1619_v37  ;;  %v1627_v46 = vsel %vm1527_vm5, %v1615_v3, %v1626_v21 }
  0xe3   : > { %5099 = vmatprep.mubr.bf16.mxu0 %v6195_v50  ;;  %v3090_v50 = vrot.slane %v6057_v43, 5  ;;  %v3323_v43 = vlaneseq }
  0xe5   : > { %v3091_v44 = vor.u32 %v3090_v50, %v3089_v59  ;;  %v6442_v6 = vshrl.u32 %v3323_v43, 7 }
  0xe7   : > { %v3092_v26 = vsel %vm1222_vm6, %v6332_v9, %v3091_v44  ;;  %v3096_v58 = vsel %vm1222_vm6, %v3091_v44, %v6220_v15  ;;  %v3326_v48 = vadd.s32 16, %v6442_v6  ;;  %v3327_v15 = vadd.s32 24, %v6442_v6 }
  0xe8   : > { %v6472_v60 = vadd.s32 8, %v6442_v6  ;;  %v6478_v29 = vadd.s32 104, %v6442_v6  ;;  %v6485_v5 = vadd.s32 48, %v6442_v6  ;;  %v6488_v14 = vadd.s32 144, %v6442_v6 }
  0xe9   : > { %4940 = vmatmul.mubr.bf16.gmra.mrb[20].mxu1 %v1627_v46  ;;  %v6462_v51 = vmul.u32.u64.low 2863311531, %v3327_v15  ;;  %v6463_v40 = vmul.u32.u64.high 2863311531, %v3327_v15, %v6462_v51  ;;  %v6506_v39 = vadd.s32 32, %v6442_v6  ;;  %v6521_v27 = vadd.s32 128, %v6442_v6 }
  0xea   : > { %5100 = vmatmul.mubr.bf16.gmra.mrb[20].mxu0 %v2817_v38  ;;  %5131 = vmatprep.mubr.bf16.mxu1 %v6337_v36  ;;  %v6481_v31 = vmul.u32.u64.low 2863311531, %v6472_v60  ;;  %v6482_v30 = vmul.u32.u64.high 2863311531, %v6472_v60, %v6481_v31  ;;  %v6493_v32 = vmul.u32.u64.low 2863311531, %v6478_v29  ;;  %v6494_v53 = vmul.u32.u64.high 2863311531, %v6478_v29, %v6493_v32 }
  0xeb   : > { %5119 = vmatprep.mubr.bf16.mxu0 %v3060_v34  ;;  %v3387_v19 = vshrl.u32 %v6463_v40, 4  ;;  %v6502_v16 = vmul.u32.u64.low 2863311531, %v6485_v5  ;;  %v6503_v41 = vmul.u32.u64.high 2863311531, %v6485_v5, %v6502_v16  ;;  %v6618_v40 = vadd.s32 56, %v6442_v6 }
  0xec   : > { %v6513_v18 = vmul.u32.u64.low 2863311531, %v6488_v14  ;;  %v6514_v17 = vmul.u32.u64.high 2863311531, %v6488_v14, %v6513_v18  ;;  %v3365_v38 = vshrl.u32 %v6482_v30, 4  ;;  %v6670_v16 = vadd.s32 64, %v6442_v6 }
  0xed   : > { %v3388_v7 = vmul.u32 24, %v3387_v19 }
  0xef   : > { %v6510_v24 = vsub.s32 %v3327_v15, %v3388_v7 }
  0xf1   : > { %5132 = vmatmul.mubr.bf16.vlgmr.msra.gmra.mrb[24].mxu1 %v6341_v10  ;;  %vm3615_vm0 = vcmp.ne.s32.totalorder %v6510_v24, 0  ;;  %vm3639_vm2 = vcmp.lt.s32.totalorder %v6510_v24, 0 }
  0xf2   : > { %5120 = vmatmul.mubr.bf16.vlgmr.msra.gmra.mrb[0].mxu0 %v6263_v47  ;;  %5135 = vmatprep.mubr.bf16.mxu1 %v3092_v26  ;;  %v3338_v47 = vadd.s32 112, %v6442_v6  ;;  %v3497_v26 = vshrl.u32 %v6494_v53, 4  ;;  %v6666_v32 = vmul.u32.u64.low 2863311531, %v6618_v40  ;;  %v6667_v53 = vmul.u32.u64.high 2863311531, %v6618_v40, %v6666_v32 }
  0xf3   : > { %5123 = vmatprep.mubr.bf16.mxu0 %v6284_v25  ;;  %v3336_v25 = vadd.s32 96, %v6442_v6 }
  0xf4   : > { %v3498_v51 = vmul.u32 24, %v3497_v26 }
  0xf5   : > { %v6459_v10 = vmul.u32.u64.low 2863311531, %v3336_v25  ;;  %v6460_v11 = vmul.u32.u64.high 2863311531, %v3336_v25, %v6459_v10 }
  0xf6   : > { %v3431_v10 = vshrl.u32 %v6667_v53, 4 }
  0xf7   : > { %v3486_v1 = vshrl.u32 %v6460_v11, 4 }
  0xf9   : > { %5136 = vmatmul.mubr.bf16.gmra.mrb[28].mxu1 %v3096_v58  ;;  %v3487_v57 = vmul.u32 24, %v3486_v1 }
  0xfa   : > { %5124 = vmatmul.mubr.bf16.gmra.mrb[4].mxu0 %v6290_v4  ;;  %5139 = vmatprep.mubr.bf16.mxu1 %v6227_v33  ;;  %v3339_v33 = vadd.s32 120, %v6442_v6 }
  0xfb   : > { %5127 = vmatprep.mubr.bf16.mxu0 %v6312_v8  ;;  %v6448_v4 = vmul.u32.u64.low 2863311531, %v3326_v48  ;;  %v6449_v8 = vmul.u32.u64.high 2863311531, %v3326_v48, %v6448_v4  ;;  %v6508_v23 = vsub.s32 %v3336_v25, %v3487_v57  ;;  %v6658_v57 = vadd.s32 176, %v6442_v6 }
  0xfc   : > { %v6465_v55 = vmul.u32.u64.low 2863311531, %v3339_v33  ;;  %v6466_v54 = vmul.u32.u64.high 2863311531, %v3339_v33, %v6465_v55  ;;  %v3366_v4 = vmul.u32 24, %v3365_v38  ;;  %v6678_v38 = vadd.s32 88, %v6442_v6 }
  0xfd   : > { %v3376_v62 = vshrl.u32 %v6449_v8, 4  ;;  %vm3624_vm14 = vcmp.ne.s32.totalorder %v6508_v23, 0  ;;  %vm3648_vm15 = vcmp.lt.s32.totalorder %v6508_v23, 0  ;;  %v6554_v59 = vadd.s32 24, %v6508_v23 }
  0xfe   : > { %v3519_v49 = vshrl.u32 %v6466_v54, 4  ;;  %vm6587_vm6 = vmand %vm3648_vm15, %vm3624_vm14  ;;  %v3420_v8 = vshrl.u32 %v6503_v41, 4  ;;  %v6639_v19 = vsub.s32 %v6472_v60, %v3366_v4 }
  0xff   : > { %v3377_v13 = vmul.u32 24, %v3376_v62  ;;  %v7590_v11 = vsel %vm6587_vm6, %v6554_v59, %v6508_v23 }
 0x100   : > { %v3520_v52 = vmul.u32 24, %v3519_v49  ;;  %v6642_v49 = vadd.s32 136, %v6442_v6  ;;  %v6697_v4 = vadd.s32 24, %v6639_v19 }
 0x101   : > { %5140 = vmatmul.mubr.bf16.gmra.mrb[32].mxu1 %v6242_v12  ;;  %v6456_v12 = vmul.u32.u64.low 2863311531, %v6442_v6  ;;  %v6457_v36 = vmul.u32.u64.high 2863311531, %v6442_v6, %v6456_v12  ;;  %v6490_v22 = vsub.s32 %v3326_v48, %v3377_v13  ;;  %v3421_v13 = vmul.u32 24, %v3420_v8 }
 0x102   : > { %5128 = vmatmul.mubr.bf16.gmra.mrb[8].mxu0 %v6318_v2  ;;  %v6452_v9 = vmul.u32.u64.low 2863311531, %v3338_v47  ;;  %v6453_v2 = vmul.u32.u64.high 2863311531, %v3338_v47, %v6452_v9  ;;  %v6518_v28 = vsub.s32 %v3339_v33, %v3520_v52  ;;  %v3552_v12 = vshrl.u32 %v6514_v17, 4 }
 0x103   : > { %v3354_v63 = vshrl.u32 %v6457_v36, 4  ;;  %vm3614_vm7 = vcmp.ne.s32.totalorder %v6490_v22, 0  ;;  %vm3638_vm8 = vcmp.lt.s32.totalorder %v6490_v22, 0  ;;  %v6526_v45 = vadd.s32 24, %v6490_v22 }
 0x104   : > { %v3508_v0 = vshrl.u32 %v6453_v2, 4  ;;  %vm6547_vm13 = vmand %vm3638_vm8, %vm3614_vm7  ;;  %vm3627_vm3 = vcmp.ne.s32.totalorder %v6518_v28, 0  ;;  %vm3651_vm4 = vcmp.lt.s32.totalorder %v6518_v28, 0  ;;  %v6597_v9 = vadd.s32 24, %v6510_v24 }
 0x105   : > { %v3355_v61 = vmul.u32 24, %v3354_v63  ;;  %v6580_v43 = vmul.u32.u64.low 2863311531, %v6506_v39  ;;  %v6581_v48 = vmul.u32.u64.high 2863311531, %v6506_v39, %v6580_v43  ;;  %vm6592_vm7 = vmand %vm3639_vm2, %vm3615_vm0  ;;  %v6600_v2 = vadd.s32 24, %v6518_v28 }
 0x106   : > { %v3509_v56 = vmul.u32 24, %v3508_v0  ;;  %vm6613_vm8 = vmand %vm3651_vm4, %vm3627_vm3  ;;  %v6631_v0 = vadd.s32 152, %v6442_v6  ;;  %v6634_v63 = vadd.s32 40, %v6442_v6  ;;  %v3553_v30 = vmul.u32 24, %v3552_v12 }
 0x107   : > { %v6499_v35 = vsub.s32 %v6442_v6, %v3355_v61  ;;  %v6663_v52 = vsub.s32 %v6478_v29, %v3498_v51  ;;  %v3398_v41 = vshrl.u32 %v6581_v48, 4  ;;  %v6675_v17 = vadd.s32 160, %v6442_v6 }
 0x108   : > { %v6496_v3 = vsub.s32 %v3338_v47, %v3509_v56  ;;  %v6584_v47 = vmul.u32.u64.low 2863311531, %v6521_v27  ;;  %v6585_v25 = vmul.u32.u64.high 2863311531, %v6521_v27, %v6584_v47  ;;  %v6645_v56 = vadd.s32 80, %v6442_v6 }
 0x109   : > { %vm3612_vm11 = vcmp.ne.s32.totalorder %v6499_v35, 0  ;;  %vm3636_vm12 = vcmp.lt.s32.totalorder %v6499_v35, 0  ;;  %v6538_v21 = vadd.s32 24, %v6499_v35  ;;  %7518 = vst [vmem:[#allocation11_spill] sm:$0xff] %v6663_v52  ;;  %v6682_v29 = vsub.s32 %v6485_v5, %v3421_v13 }
 0x10a   : > { %vm3626_vm9 = vcmp.ne.s32.totalorder %v6496_v3, 0  ;;  %vm3650_vm10 = vcmp.lt.s32.totalorder %v6496_v3, 0  ;;  %v6531_v20 = vadd.s32 24, %v6496_v3  ;;  %vm6575_vm5 = vmand %vm3636_vm12, %vm3612_vm11  ;;  %v3530_v18 = vshrl.u32 %v6585_v25, 4 }
 0x10b   : > { %vm6563_vm1 = vmand %vm3650_vm10, %vm3626_vm9  ;;  %vm3613_vm9 = vcmp.ne.s32.totalorder %v6639_v19, 0  ;;  %v6685_v26 = vmul.u32.u64.low 2863311531, %v6631_v0  ;;  %v6686_v43 = vmul.u32.u64.high 2863311531, %v6631_v0, %v6685_v26  ;;  %vm3637_vm10 = vcmp.lt.s32.totalorder %v6639_v19, 0 }
 0x10c   : > { %v6690_v48 = vsub.s32 %v6488_v14, %v3553_v30  ;;  %v6693_v47 = vmul.u32.u64.low 2863311531, %v6634_v63  ;;  %v6694_v25 = vmul.u32.u64.high 2863311531, %v6634_v63, %v6693_v47  ;;  %vm3625_vm11 = vcmp.ne.s32.totalorder %v6663_v52, 0  ;;  %vm6724_vm0 = vmand %vm3637_vm10, %vm3613_vm9 }
 0x10d   : > { %v6701_v5 = vmul.u32.u64.low 2863311531, %v6642_v49  ;;  %v6702_v8 = vmul.u32.u64.high 2863311531, %v6642_v49, %v6701_v5  ;;  %vm3649_vm12 = vcmp.lt.s32.totalorder %v6663_v52, 0  ;;  %v6708_v14 = vadd.s32 24, %v6663_v52 }
 0x10e   : > { %7519 = vst [vmem:[#allocation12_spill] sm:$0xff] %v6690_v48  ;;  %v3399_v51 = vmul.u32 24, %v3398_v41  ;;  %v3531_v13 = vmul.u32 24, %v3530_v18  ;;  %vm3618_vm14 = vcmp.ne.s32.totalorder %v6682_v29, 0  ;;  %vm3642_vm15 = vcmp.lt.s32.totalorder %v6682_v29, 0  ;;  %vm6740_vm4 = vmand %vm3649_vm12, %vm3625_vm11 }
 0x10f   : > { %v6715_v32 = vmul.u32.u64.low 2863311531, %v6645_v56  ;;  %v6716_v26 = vmul.u32.u64.high 2863311531, %v6645_v56, %v6715_v32  ;;  %vm3630_vm2 = vcmp.ne.s32.totalorder %v6690_v48, 0  ;;  %vm3654_vm3 = vcmp.lt.s32.totalorder %v6690_v48, 0  ;;  %vm6756_vm9 = vmand %vm3642_vm15, %vm3618_vm14 }
 0x110   : > { %v6731_v41 = vmul.u32.u64.low 2863311531, %v6658_v57  ;;  %v6732_v18 = vmul.u32.u64.high 2863311531, %v6658_v57, %v6731_v41  ;;  %v7526_v32 = vmov 0  ;;  %v6745_v60 = vadd.s32 24, %v6682_v29  ;;  %vm6772_vm10 = vmand %vm3654_vm3, %vm3630_vm2 }
 0x111   : > { %v7527_v32 = vsel %vm6740_vm4, 4294967295, %v7526_v32  ;;  %v6749_v31 = vmul.u32.u64.low 2863311531, %v6670_v16  ;;  %v6750_v36 = vmul.u32.u64.high 2863311531, %v6670_v16, %v6749_v31  ;;  %v7528_v41 = vmov 0 }
 0x112   : > { %v7529_v41 = vsel %vm6756_vm9, 4294967295, %v7528_v41  ;;  %v6761_v54 = vadd.s32 24, %v6690_v48  ;;  %v7532_v31 = vmov 0  ;;  %v3464_v52 = vshrl.u32 %v6716_v26, 4 }
 0x113   : > { %7530 = vst [vmem:[#allocation17_spill] sm:$0xff] %v7529_v41  ;;  %v7533_v31 = vsel %vm6772_vm10, 4294967295, %v7532_v31  ;;  %v7560_v58 = vsel %vm6547_vm13, %v6526_v45, %v6490_v22  ;;  %v7581_v5 = vsel %vm6563_vm1, %v6531_v20, %v6496_v3 }
 0x114   : > { %7531 = vst [vmem:[#allocation18_spill] sm:$0xff] %v6761_v54  ;;  %7534 = vst [vmem:[#allocation19_spill] sm:$0xff] %v7533_v31 }
 0x11a   : > { %v7614_v22 = vld [vmem:[#allocation17_spill] sm:$0xff] }
 0x194   : > { %v6523_v37 = vpop.f32.mrb[0].mxu1 }
 0x195   : > { %7498 = vst [vmem:[#allocation5_spill] sm:$0xff] %v6523_v37  ;;  %v6533_v42 = vpop.f32.mrb[1].mxu1 }
 0x196   : > { %7499 = vst [vmem:[#allocation7_spill] sm:$0xff] %v6533_v42  ;;  %v6541_v34 = vpop.f32.mrb[2].mxu1 }
 0x197   : > { %7500 = vst [vmem:[#allocation3_spill] sm:$0xff] %v6541_v34  ;;  %v6557_v50 = vpop.f32.mrb[3].mxu1 }
 0x198   : > { %7503 = vst [vmem:[#allocation6_spill] sm:$0xff] %v6557_v50  ;;  %v6792_v50 = vadd.s32 168, %v6442_v6 }
 0x19c   : > { %v6620_v55 = vpop.f32.mrb[4].mxu1 }
 0x19d   : > { %7514 = vst [vmem:[#allocation4_spill] sm:$0xff] %v6620_v55  ;;  %v6636_v1 = vpop.f32.mrb[5].mxu1  ;;  %v6789_v55 = vadd.s32 72, %v6442_v6 }
 0x19e   : > { %7515 = vst [vmem:[#allocation8_spill] sm:$0xff] %v6636_v1  ;;  %v6647_v61 = vpop.f32.mrb[6].mxu1  ;;  %v6785_v1 = vsub.s32 %v6521_v27, %v3531_v13  ;;  %v3432_v13 = vmul.u32 24, %v3431_v10 }
 0x19f   : > { %7516 = vst [vmem:[#allocation9_spill] sm:$0xff] %v6647_v61  ;;  %v6660_v7 = vpop.f32.mrb[7].mxu1 }
 0x1a0   : > { %7517 = vst [vmem:[#allocation10_spill] sm:$0xff] %v6660_v7  ;;  %v6778_v7 = vmul.u32.u64.low 2863311531, %v6678_v38  ;;  %v6779_v61 = vmul.u32.u64.high 2863311531, %v6678_v38, %v6778_v7  ;;  %vm7540_vm15 = vcmp.ne.s32.totalorder %v6785_v1, 0  ;;  %vm7541_vm10 = vcmp.lt.s32.totalorder %v6785_v1, 0 }
 0x1a1   : > { %v3596_v7 = vshrl.u32 %v6732_v18, 4  ;;  %vm6887_vm9 = vmand %vm7541_vm10, %vm7540_vm15  ;;  %vm7593_vm10 = vnez %v7527_v32 }
 0x1a4   : > { %v6704_v12 = vpop.f32.mrb[8].mxu1 }
 0x1a5   : > { %7520 = vst [vmem:[#allocation13_spill] sm:$0xff] %v6704_v12  ;;  %v6710_v30 = vpop.f32.mrb[9].mxu1  ;;  %v3563_v12 = vshrl.u32 %v6686_v43, 4 }
 0x1a6   : > { %7521 = vst [vmem:[#allocation14_spill] sm:$0xff] %v6710_v30  ;;  %v6718_v47 = vpop.f32.mrb[10].mxu1 }
 0x1a7   : > { %7522 = vst [vmem:[#allocation15_spill] sm:$0xff] %v6718_v47  ;;  %v6734_v62 = vpop.f32.mrb[11].mxu1  ;;  %v6767_v53 = vmul.u32.u64.low 2863311531, %v6675_v17  ;;  %v6768_v47 = vmul.u32.u64.high 2863311531, %v6675_v17, %v6767_v53  ;;  %v3564_v37 = vmul.u32 24, %v3563_v12 }
 0x1a8   : > { %7525 = vst [vmem:[#allocation16_spill] sm:$0xff] %v6734_v62  ;;  %v6764_v62 = vsub.s32 %v6506_v39, %v3399_v51  ;;  %v6782_v39 = vadd.s32 184, %v6442_v6  ;;  %v3409_v53 = vshrl.u32 %v6694_v25, 4  ;;  %v3541_v25 = vshrl.u32 %v6702_v8, 4 }
 0x1a9   : > { %v3574_v26 = vshrl.u32 %v6768_v47, 4  ;;  %v6838_v18 = vsub.s32 %v6631_v0, %v3564_v37 }
 0x1aa   : > { %vm3616_vm11 = vcmp.ne.s32.totalorder %v6764_v62, 0  ;;  %vm3640_vm12 = vcmp.lt.s32.totalorder %v6764_v62, 0  ;;  %v6816_v8 = vadd.s32 24, %v6764_v62  ;;  %v3410_v31 = vmul.u32 24, %v3409_v53 }
 0x1ab   : > { %vm6872_vm3 = vmand %vm3640_vm12, %vm3616_vm11  ;;  %vm7549_vm15 = vcmp.ne.s32.totalorder %v6838_v18, 0 }
 0x1ac   : > { %v4933_v34 = vpop.f32.mrb[12].mxu1 }
 0x1ad   : > { %v5093_v30 = vpop.f32.mrb[12].mxu0  ;;  %v1770_v10 = vpop.f32.mrb[13].mxu1 }
 0x1ae   : > { %v2960_v51 = vpop.f32.mrb[13].mxu0  ;;  %v6813_v27 = vadd.f32 %v5093_v30, %v4933_v34  ;;  %v4934_v6 = vpop.f32.mrb[14].mxu1  ;;  %v6826_v34 = vsub.s32 %v6618_v40, %v3432_v13  ;;  %v3542_v30 = vmul.u32 24, %v3541_v25  ;;  %v3475_v40 = vshrl.u32 %v6779_v61, 4 }
 0x1af   : > { %v5094_v43 = vpop.f32.mrb[14].mxu0  ;;  %v6819_v41 = vadd.f32 %v2960_v51, %v1770_v10  ;;  %v1773_v54 = vpop.f32.mrb[15].mxu1  ;;  %v6833_v51 = vmul.u32.u64.low 2863311531, %v6782_v39  ;;  %v6834_v10 = vmul.u32.u64.high 2863311531, %v6782_v39, %v6833_v51 }
 0x1b0   : > { %v2963_v42 = vpop.f32.mrb[15].mxu0  ;;  %7535 = vst [vmem:[#allocation20_spill] sm:$0xff] %v6813_v27  ;;  %v6823_v48 = vadd.f32 %v5094_v43, %v4934_v6  ;;  %v3442_v27 = vshrl.u32 %v6750_v36, 4  ;;  %v3465_v43 = vmul.u32 24, %v3464_v52  ;;  %v6842_v36 = vsub.s32 %v6634_v63, %v3410_v31 }
 0x1b1   : > { %v6829_v12 = vadd.f32 %v2963_v42, %v1773_v54  ;;  %v3597_v42 = vmul.u32 24, %v3596_v7  ;;  %v6845_v54 = vmul.u32.u64.low 2863311531, %v6789_v55  ;;  %v6846_v47 = vmul.u32.u64.high 2863311531, %v6789_v55, %v6845_v54 }
 0x1b2   : > { %v6849_v6 = vadd.s32 24, %v6785_v1  ;;  %v6853_v37 = vsub.s32 %v6642_v49, %v3542_v30  ;;  %v3443_v0 = vmul.u32 24, %v3442_v27  ;;  %v3575_v63 = vmul.u32 24, %v3574_v26 }
 0x1b3   : > { %7536 = vst [vmem:[#allocation21_spill] sm:$0xff] %v6829_v12  ;;  %v6857_v31 = vmul.u32.u64.low 2863311531, %v6792_v50  ;;  %v6858_v7 = vmul.u32.u64.high 2863311531, %v6792_v50, %v6857_v31  ;;  %v6864_v12 = vsub.s32 %v6645_v56, %v3465_v43  ;;  %v3476_v49 = vmul.u32 24, %v3475_v40  ;;  %v7607_v40 = vld [vmem:[#allocation5_spill] sm:$0xff] }
 0x1b4   : > { %v4937_v61 = vpop.f32.mrb[16].mxu1  ;;  %v7537_v26 = vmov 0  ;;  %vm7545_vm14 = vcmp.ne.s32.totalorder %v6826_v34, 0  ;;  %vm7546_vm2 = vcmp.lt.s32.totalorder %v6826_v34, 0  ;;  %v6973_v46 = vadd.s32 24, %v6842_v36 }
 0x1b5   : > { %v5097_v53 = vpop.f32.mrb[16].mxu0  ;;  %v1786_v54 = vpop.f32.mrb[17].mxu1  ;;  %v7538_v26 = vsel %vm6872_vm3, 4294967295, %v7537_v26  ;;  %vm6902_vm4 = vmand %vm7546_vm2, %vm7545_vm14  ;;  %vm7550_vm14 = vcmp.lt.s32.totalorder %v6838_v18, 0  ;;  %vm7566_vm13 = vcmp.ne.s32.totalorder %v6853_v37, 0  ;;  %v3724_v32 = vsel %vm6887_vm9, %v6849_v6, %v6785_v1 }
 0x1b6   : > { %v2976_v13 = vpop.f32.mrb[17].mxu0  ;;  %v6860_v51 = vadd.f32 %v5097_v53, %v4937_v61  ;;  %v4938_v27 = vpop.f32.mrb[18].mxu1  ;;  %v6879_v53 = vsub.s32 %v6658_v57, %v3597_v42  ;;  %v3607_v61 = vshrl.u32 %v6834_v10, 4  ;;  %vm6919_vm2 = vmand %vm7550_vm14, %vm7549_vm15  ;;  %vm7556_vm15 = vcmp.ne.s32.totalorder %v6842_v36, 0  ;;  %v7608_v42 = vld [vmem:[#allocation7_spill] sm:$0xff] }
 0x1b7   : > { %v5098_v25 = vpop.f32.mrb[18].mxu0  ;;  %v6866_v30 = vadd.f32 %v2976_v13, %v1786_v54  ;;  %v1789_v43 = vpop.f32.mrb[19].mxu1  ;;  %v6894_v13 = vsub.s32 %v6670_v16, %v3443_v0  ;;  %v6938_v54 = vadd.s32 24, %v6826_v34  ;;  %vm7557_vm14 = vcmp.lt.s32.totalorder %v6842_v36, 0 }
 0x1b8   : > { %v2979_v52 = vpop.f32.mrb[19].mxu0  ;;  %v6881_v56 = vadd.f32 %v5098_v25, %v4938_v27  ;;  %v6908_v25 = vsub.s32 %v6675_v17, %v3575_v63  ;;  %v6926_v17 = vsub.s32 %v6678_v38, %v3476_v49  ;;  %v7554_v63 = vmov 0  ;;  %vm6944_vm12 = vmand %vm7557_vm14, %vm7556_vm15 }
 0x1b9   : > { %v6896_v57 = vadd.f32 %v2979_v52, %v1789_v43  ;;  %v7553_v52 = vsel %vm6575_vm5, %v6538_v21, %v6499_v35  ;;  %v7558_v38 = vmov 0  ;;  %v3453_v35 = vshrl.u32 %v6846_v47, 4 }
 0x1ba   : > { %7539 = vst [vmem:[#allocation22_spill] sm:$0xff] %v6881_v56  ;;  %vm6933_vm11 = vcmp.lt.s32.totalorder %v7553_v52, 16  ;;  %v7559_v38 = vsel %vm6944_vm12, 4294967295, %v7558_v38  ;;  %vm6956_vm5 = vcmp.lt.s32.totalorder %v7560_v58, 16  ;;  %v7561_v49 = vmov 0 }
 0x1bb   : > { %7544 = vst [vmem:[#allocation23_spill] sm:$0xff] %v6896_v57  ;;  %v7555_v63 = vsel %vm6933_vm11, 4294967295, %v7554_v63  ;;  %v7562_v49 = vsel %vm6956_vm5, 4294967295, %v7561_v49  ;;  %v7563_v27 = vsel %vm6592_vm7, %v6597_v9, %v6510_v24  ;;  %v7564_v43 = vmov 0 }
 0x1bc   : > { %vm6965_vm15 = vcmp.lt.s32.totalorder %v7563_v27, 16  ;;  %v6970_v47 = vadd.s32 24, %v6838_v18  ;;  %vm7567_vm14 = vcmp.lt.s32.totalorder %v6853_v37, 0  ;;  %vm3620_vm7 = vcmp.ne.s32.totalorder %v6894_v13, 0  ;;  %v4941_v24 = vpop.f32.mrb[20].mxu1 }
 0x1bd   : > { %v5101_v31 = vpop.f32.mrb[20].mxu0  ;;  %v7565_v43 = vsel %vm6965_vm15, 4294967295, %v7564_v43  ;;  %vm6979_vm3 = vmand %vm7567_vm14, %vm7566_vm13  ;;  %vm7570_vm15 = vcmp.ne.s32.totalorder %v6864_v12, 0  ;;  %vm7571_vm5 = vcmp.lt.s32.totalorder %v6864_v12, 0  ;;  %v3608_v9 = vmul.u32 24, %v3607_v61  ;;  %v1802_v27 = vpop.f32.mrb[21].mxu1 }
 0x1be   : > { %v2992_v10 = vpop.f32.mrb[21].mxu0  ;;  %vm6989_vm11 = vmand %vm7571_vm5, %vm7570_vm15  ;;  %v3585_v52 = vshrl.u32 %v6858_v7, 4  ;;  %v6996_v58 = vadd.f32 %v5101_v31, %v4941_v24  ;;  %v7574_v16 = vsel %vm6724_vm0, %v6697_v4, %v6639_v19  ;;  %v7008_v56 = vadd.s32 24, %v6853_v37  ;;  %v4942_v4 = vpop.f32.mrb[22].mxu1 }
 0x1bf   : > { %v5102_v21 = vpop.f32.mrb[22].mxu0  ;;  %vm7003_vm14 = vcmp.lt.s32.totalorder %v7574_v16, 16  ;;  %vm7577_vm5 = vcmp.ne.s32.totalorder %v6879_v53, 0  ;;  %vm7578_vm15 = vcmp.lt.s32.totalorder %v6879_v53, 0  ;;  %v7020_v19 = vadd.f32 %v2992_v10, %v1802_v27  ;;  %v7594_v27 = vld [vmem:[#allocation11_spill] sm:$0xff] }
 0x1c0   : > { %v2995_v45 = vpop.f32.mrb[23].mxu0  ;;  %vm7014_vm13 = vmand %vm7578_vm15, %vm7577_vm5  ;;  %vm7027_vm0 = vcmp.lt.s32.totalorder %v7581_v5, 16  ;;  %v7584_v31 = vsel %vm6613_vm8, %v6600_v2, %v6518_v28  ;;  %v7041_v10 = vadd.s32 24, %v6864_v12  ;;  %v7044_v44 = vadd.s32 24, %v6879_v53  ;;  %v1805_v2 = vpop.f32.mrb[23].mxu1 }
 0x1c1   : > { %vm7036_vm5 = vcmp.lt.s32.totalorder %v7584_v31, 16  ;;  %vm7587_vm1 = vcmp.lt.s32.totalorder %v6894_v13, 0  ;;  %v3454_v20 = vmul.u32 24, %v3453_v35  ;;  %v7054_v28 = vadd.f32 %v5102_v21, %v4942_v4 }
 0x1c2   : > { %vm7050_vm15 = vmand %vm7587_vm1, %vm3620_vm7  ;;  %vm7061_vm8 = vcmp.lt.s32.totalorder %v7590_v11, 16  ;;  %v7595_v5 = vsel %vm7593_vm10, %v6708_v14, %v7594_v27  ;;  %v7075_v35 = vadd.s32 24, %v6894_v13  ;;  %vm7598_vm1 = vcmp.ne.s32.totalorder %v6908_v25, 0 }
 0x1c3   : > { %vm7070_vm7 = vcmp.lt.s32.totalorder %v7595_v5, 16  ;;  %vm7599_vm6 = vcmp.lt.s32.totalorder %v6908_v25, 0  ;;  %v7086_v59 = vadd.s32 24, %v6908_v25  ;;  %v7089_v15 = vadd.s32 24, %v6926_v17  ;;  %v7621_v5 = vld [vmem:[#allocation20_spill] sm:$0xff] }
 0x1c4   : > { %vm7081_vm12 = vmand %vm7599_vm6, %vm7598_vm1  ;;  %v7091_v14 = vadd.f32 %v2995_v45, %v1805_v2  ;;  %vm7602_vm10 = vcmp.ne.s32.totalorder %v6926_v17, 0  ;;  %vm7603_vm1 = vcmp.lt.s32.totalorder %v6926_v17, 0  ;;  %v7106_v4 = vsub.s32 %v6782_v39, %v3608_v9 }
 0x1c5   : > { %vm7101_vm6 = vmand %vm7603_vm1, %vm7602_vm10  ;;  %v3586_v11 = vmul.u32 24, %v3585_v52  ;;  %v5121_v27 = vpop.f32.mrb[0].mxu0  ;;  %v3715_v45 = vsel %vm6902_vm4, %v6938_v54, %v6826_v34  ;;  %v3727_v1 = vsel %vm6919_vm2, %v6970_v47, %v6838_v18  ;;  %vm7606_vm9 = vnez %v7559_v38 }
 0x1c6   : > { %v3713_v6 = vsel %vm7606_vm9, %v6973_v46, %v6842_v36  ;;  %v3725_v39 = vsel %vm6979_vm3, %v7008_v56, %v6853_v37  ;;  %v5159_v9 = vadd.f32 %v5121_v27, %v7607_v40  ;;  %v3204_v52 = vpop.f32.mrb[1].mxu0  ;;  %v3718_v34 = vsel %vm6989_vm11, %v7041_v10, %v6864_v12  ;;  %v7623_v27 = vld [vmem:[#allocation6_spill] sm:$0xff] }
 0x1c7   : > { %v3730_v18 = vsel %vm7014_vm13, %v7044_v44, %v6879_v53  ;;  %v7134_v36 = vsub.s32 %v6789_v55, %v3454_v20  ;;  %v5160_v0 = vadd.f32 %v3204_v52, %v7608_v42  ;;  %v5122_v54 = vpop.f32.mrb[2].mxu0  ;;  %vm7609_vm4 = vnez %v7538_v26 }
 0x1c8   : > { %v7610_v37 = vsel %vm7609_vm4, %v6816_v8, %v6764_v62  ;;  %v3716_v38 = vsel %vm7050_vm15, %v7075_v35, %v6894_v13  ;;  %v3728_v55 = vsel %vm7081_vm12, %v7086_v59, %v6908_v25  ;;  %v3719_v26 = vsel %vm7101_vm6, %v7089_v15, %v6926_v17  ;;  %v5133_v62 = vpop.f32.mrb[24].mxu1  ;;  %v7613_v8 = vld [vmem:[#allocation3_spill] sm:$0xff]  ;;  %v3207_v46 = vpop.f32.mrb[3].mxu0  ;;  %v7666_v17 = vld [vmem:[#allocation22_spill] sm:$0xff] }
 0x1c9   : > { %vm7142_vm3 = vcmp.lt.s32.totalorder %v7610_v37, 16  ;;  %v5161_v47 = vadd.f32 %v5122_v54, %v7613_v8  ;;  %vm7615_vm2 = vnez %v7614_v22  ;;  %vm7168_vm10 = vcmp.lt.s32.totalorder %v3715_v45, 16  ;;  %v7629_v54 = vld [vmem:[#allocation12_spill] sm:$0xff]  ;;  %v7635_v22 = vld [vmem:[#allocation21_spill] sm:$0xff]  ;;  %v7670_v25 = vld [vmem:[#allocation23_spill] sm:$0xff] }
 0x1ca   : > { %v7616_v13 = vsel %vm7615_vm2, %v6745_v60, %v6682_v29  ;;  %v7175_v2 = vsub.s32 %v6792_v50, %v3586_v11  ;;  %v5172_v35 = vadd.f32 %v7621_v5, %v5133_v62  ;;  %vm7622_vm4 = vnez %v7555_v63  ;;  %v3252_v29 = vpop.f32.mrb[25].mxu1  ;;  %v7626_v11 = vld [vmem:[#allocation19_spill] sm:$0xff] }
 0x1cb   : > { %vm7164_vm15 = vcmp.lt.s32.totalorder %v7616_v13, 16  ;;  %v3804_v60 = vsel %vm7622_vm4, %v5160_v0, 0.0  ;;  %v5162_v40 = vadd.f32 %v3207_v46, %v7623_v27  ;;  %v7182_v45 = vadd.s32 24, %v7106_v4  ;;  %v5134_v63 = vpop.f32.mrb[26].mxu1  ;;  %v7628_v0 = vld [vmem:[#allocation18_spill] sm:$0xff] }
 0x1cc   : > { %vm7624_vm2 = vnez %v7562_v49  ;;  %v5174_v42 = vadd.f32 %v6819_v41, %v3252_v29  ;;  %vm7625_vm9 = vnez %v7565_v43  ;;  %vm7627_vm4 = vnez %v7626_v11  ;;  %v3255_v62 = vpop.f32.mrb[27].mxu1  ;;  %v7644_v11 = vld [vmem:[#allocation4_spill] sm:$0xff] }
 0x1cd   : > { %v3806_v52 = vsel %vm7624_vm2, %v5159_v9, 0.0  ;;  %v3807_v50 = vsel %vm7625_vm9, %v5161_v47, 0.0  ;;  %v7630_v37 = vsel %vm7627_vm4, %v7628_v0, %v7629_v54  ;;  %vm7205_vm2 = vcmp.lt.s32.totalorder %v3713_v6, 16  ;;  %v5125_v27 = vpop.f32.mrb[4].mxu0 }
 0x1ce   : > { %vm7201_vm1 = vcmp.lt.s32.totalorder %v7630_v37, 16  ;;  %v4540_v9 = vpack.c.bf16 %v3807_v50, %v3806_v52  ;;  %v5176_v43 = vadd.f32 %v6823_v48, %v5134_v63  ;;  %v7213_v8 = vadd.s32 24, %v7134_v36  ;;  %v5137_v37 = vpop.f32.mrb[28].mxu1 }
 0x1cf   : > { %v3986_v47 = vmul.f32 %v3804_v60, %v3804_v60  ;;  %v3805_v46 = vsel %vm7003_vm14, %v5162_v40, 0.0  ;;  %v5178_v6 = vadd.f32 %v7635_v22, %v3255_v62  ;;  %vm7218_vm4 = vcmp.lt.s32.totalorder %v3727_v1, 16 }
 0x1d0   : > { %v7225_v48 = vsel %vm7027_vm0, %v5172_v35, 0.0  ;;  %4592 = vst [vmem:[%s7192_s9 + $0x8] sm:$0xff] %v4540_v9   ;;  %v7230_v5 = vsel %vm7036_vm5, %v5176_v43, 0.0  ;;  %v4535_v57 = vpack.c.bf16 %v3805_v46, %v3804_v60  ;;  %v3956_v29 = vadd.f32 %v3805_v46, %v3804_v60  ;;  %v3220_v35 = vpop.f32.mrb[5].mxu0  ;;  %v7645_v9 = vld [vmem:[#allocation8_spill] sm:$0xff] }
 0x1d1   : > { %v7234_v1 = vsel %vm7061_vm8, %v5174_v42, 0.0  ;;  %v4570_v40 = vpack.c.bf16 %v7230_v5, %v7225_v48  ;;  %v3987_v63 = vmul.f32 %v3805_v46, %v3805_v46  ;;  %v7240_v61 = vsel %vm7070_vm7, %v5178_v6, 0.0 }
 0x1d2   : > { %vm7242_vm14 = vcmp.lt.s32.totalorder %v3724_v32, 16  ;;  %vm7246_vm0 = vcmp.lt.s32.totalorder %v3725_v39, 16  ;;  %v7640_v60 = vmov 0  ;;  %vm7250_vm5 = vcmp.lt.s32.totalorder %v3716_v38, 16  ;;  %4536 = vst [vmem:[%s7192_s9] sm:$0xff] %v4535_v57   ;;  %v5126_v32 = vpop.f32.mrb[6].mxu0  ;;  %v7646_v38 = vld [vmem:[#allocation9_spill] sm:$0xff] }
 0x1d3   : > { %v7641_v60 = vsel %vm7246_vm0, 4294967295, %v7640_v60  ;;  %v7642_v24 = vmov 0  ;;  %v3957_v42 = vadd.f32 %v3956_v29, %v3806_v52  ;;  %v4565_v31 = vpack.c.bf16 %v7240_v61, %v7234_v1  ;;  %4598 = vst [vmem:[%s7192_s9 + $0x38] sm:$0xff] %v4570_v40   ;;  %v3223_v46 = vpop.f32.mrb[7].mxu0  ;;  %v3268_v57 = vpop.f32.mrb[29].mxu1 }
 0x1d4   : > { %v7643_v24 = vsel %vm7250_vm5, 4294967295, %v7642_v24  ;;  %v5163_v0 = vadd.f32 %v5125_v27, %v7644_v11  ;;  %v3988_v54 = vmul.f32 %v3806_v52, %v3806_v52  ;;  %v4010_v39 = vadd.f32 %v3987_v63, %v3986_v47  ;;  %v7651_v47 = vld [vmem:[#allocation10_spill] sm:$0xff] }
 0x1d5   : > { %v5164_v43 = vadd.f32 %v3220_v35, %v7645_v9  ;;  %v5165_v62 = vadd.f32 %v5126_v32, %v7646_v38  ;;  %vm7647_vm7 = vcmp.ne.s32.totalorder %v7106_v4, 0  ;;  %vm7648_vm12 = vcmp.lt.s32.totalorder %v7106_v4, 0  ;;  %4597 = vst [vmem:[%s7192_s9 + $0x30] sm:$0xff] %v4565_v31   ;;  %v5138_v31 = vpop.f32.mrb[30].mxu1 }
 0x1d6   : > { %vm7266_vm9 = vmand %vm7648_vm12, %vm7647_vm7  ;;  %v5180_v6 = vadd.f32 %v6860_v51, %v5137_v37  ;;  %v3958_v52 = vadd.f32 %v3957_v42, %v3807_v50  ;;  %v5166_v29 = vadd.f32 %v3223_v46, %v7651_v47  ;;  %vm7652_vm8 = vcmp.ne.s32.totalorder %v7134_v36, 0  ;;  %v3271_v10 = vpop.f32.mrb[31].mxu1 }
 0x1d7   : > { %vm7653_vm5 = vcmp.lt.s32.totalorder %v7134_v36, 0  ;;  %v7282_v40 = vadd.s32 24, %v7175_v2  ;;  %v3989_v63 = vmul.f32 %v3807_v50, %v3807_v50  ;;  %v4011_v35 = vadd.f32 %v4010_v39, %v3988_v54  ;;  %v7672_v54 = vld [vmem:[#allocation14_spill] sm:$0xff] }
 0x1d8   : > { %vm7277_vm0 = vmand %vm7653_vm5, %vm7652_vm8  ;;  %v3808_v51 = vsel %vm7142_vm3, %v5164_v43, 0.0  ;;  %v5182_v42 = vadd.f32 %v6866_v30, %v3268_v57  ;;  %vm7292_vm12 = vcmp.lt.s32.totalorder %v3718_v34, 16  ;;  %vm7658_vm5 = vcmp.ne.s32.totalorder %v7175_v2, 0 }
 0x1d9   : > { %vm7659_vm8 = vcmp.lt.s32.totalorder %v7175_v2, 0  ;;  %v3810_v30 = vsel %vm7164_vm15, %v5163_v0, 0.0  ;;  %v3959_v56 = vadd.f32 %v3958_v52, %v3808_v51  ;;  %v3990_v33 = vmul.f32 %v3808_v51, %v3808_v51 }
 0x1da   : > { %vm7300_vm7 = vmand %vm7659_vm8, %vm7658_vm5  ;;  %v3811_v12 = vsel %vm7168_vm10, %v5165_v62, 0.0  ;;  %vm7313_vm11 = vcmp.lt.s32.totalorder %v3730_v18, 16  ;;  %vm7322_vm3 = vcmp.lt.s32.totalorder %v3719_v26, 16  ;;  %v4012_v20 = vadd.f32 %v4011_v35, %v3989_v63  ;;  %v5129_v18 = vpop.f32.mrb[8].mxu0  ;;  %v5141_v62 = vpop.f32.mrb[32].mxu1 }
 0x1db   : > { %v4550_v0 = vpack.c.bf16 %v3811_v12, %v3810_v30  ;;  %v3731_v53 = vsel %vm7266_vm9, %v7182_v45, %v7106_v4  ;;  %v3717_v7 = vsel %vm7277_vm0, %v7213_v8, %v7134_v36  ;;  %v7336_v44 = vsel %vm7201_vm1, %v5180_v6, 0.0  ;;  %v3236_v8 = vpop.f32.mrb[9].mxu0  ;;  %v3284_v57 = vpop.f32.mrb[33].mxu1 }
 0x1dc   : > { %v5184_v15 = vadd.f32 %v7666_v17, %v5138_v31  ;;  %v3809_v21 = vsel %vm7205_vm2, %v5166_v29, 0.0  ;;  %vm7346_vm6 = vcmp.lt.s32.totalorder %v3728_v55, 16  ;;  %v3729_v36 = vsel %vm7300_vm7, %v7282_v40, %v7175_v2  ;;  %v7671_v55 = vld [vmem:[#allocation13_spill] sm:$0xff]  ;;  %v5130_v37 = vpop.f32.mrb[10].mxu0  ;;  %v5142_v40 = vpop.f32.mrb[34].mxu1 }
 0x1dd   : > { %v4013_v26 = vadd.f32 %v4012_v20, %v3990_v33  ;;  %4594 = vst [vmem:[%s7192_s9 + $0x18] sm:$0xff] %v4550_v0   ;;  %v4545_v45 = vpack.c.bf16 %v3809_v21, %v3808_v51  ;;  %v3960_v49 = vadd.f32 %v3959_v56, %v3809_v21  ;;  %v3991_v41 = vmul.f32 %v3809_v21, %v3809_v21  ;;  %v3239_v46 = vpop.f32.mrb[11].mxu0  ;;  %v7680_v33 = vld [vmem:[#allocation16_spill] sm:$0xff] }
 0x1de   : > { %v7357_v23 = vsel %vm7218_vm4, %v5184_v15, 0.0  ;;  %v5186_v59 = vadd.f32 %v7670_v25, %v3271_v10  ;;  %v5167_v32 = vadd.f32 %v5129_v18, %v7671_v55  ;;  %v5168_v39 = vadd.f32 %v3236_v8, %v7672_v54 }
 0x1df   : > { %v3992_v9 = vmul.f32 %v3810_v30, %v3810_v30  ;;  %v4580_v2 = vpack.c.bf16 %v7357_v23, %v7336_v44  ;;  %4593 = vst [vmem:[%s7192_s9 + $0x10] sm:$0xff] %v4545_v45   ;;  %v3961_v43 = vadd.f32 %v3960_v49, %v3810_v30  ;;  %v4014_v38 = vadd.f32 %v4013_v26, %v3991_v41 }
 0x1e0   : > { %v3820_v13 = vsel %vm7242_vm14, %v5182_v42, 0.0  ;;  %vm7673_vm15 = vnez %v7641_v60  ;;  %v5188_v6 = vadd.f32 %v6996_v58, %v5141_v62  ;;  %vm7674_vm10 = vnez %v7643_v24  ;;  %v3287_v24 = vpop.f32.mrb[35].mxu1  ;;  %v7679_v42 = vld [vmem:[#allocation15_spill] sm:$0xff] }
 0x1e1   : > { %v7369_v22 = vsel %vm7673_vm15, %v5186_v59, 0.0  ;;  %v3812_v52 = vsel %vm7674_vm10, %v5168_v39, 0.0  ;;  %v3993_v47 = vmul.f32 %v3811_v12, %v3811_v12  ;;  %4600 = vst [vmem:[%s7192_s9 + $0x48] sm:$0xff] %v4580_v2   ;;  %v4015_v29 = vadd.f32 %v4014_v38, %v3992_v9 }
 0x1e2   : > { %v4575_v27 = vpack.c.bf16 %v7369_v22, %v3820_v13  ;;  %vm7376_vm1 = vcmp.lt.s32.totalorder %v3731_v53, 16  ;;  %v3962_v60 = vadd.f32 %v3961_v43, %v3811_v12  ;;  %v3994_v63 = vmul.f32 %v3812_v52, %v3812_v52 }
 0x1e3   : > { %v5190_v35 = vadd.f32 %v7020_v19, %v3284_v57  ;;  %vm7381_vm2 = vcmp.lt.s32.totalorder %v3717_v7, 16  ;;  %v4016_v51 = vadd.f32 %v4015_v29, %v3993_v47  ;;  %v5169_v31 = vadd.f32 %v5130_v37, %v7679_v42 }
 0x1e4   : > { %4599 = vst [vmem:[%s7192_s9 + $0x40] sm:$0xff] %v4575_v27   ;;  %v5192_v50 = vadd.f32 %v7054_v28, %v5142_v40  ;;  %vm3753_vm9 = vcmp.lt.s32.totalorder %v3729_v36, 16  ;;  %v3814_v30 = vsel %vm7292_vm12, %v5167_v32, 0.0  ;;  %v3963_v56 = vadd.f32 %v3962_v60, %v3812_v52 }
 0x1e5   : > { %v5170_v19 = vadd.f32 %v3239_v46, %v7680_v33  ;;  %v5194_v12 = vadd.f32 %v7091_v14, %v3287_v24  ;;  %v3826_v10 = vsel %vm7313_vm11, %v5188_v6, 0.0  ;;  %v4017_v20 = vadd.f32 %v4016_v51, %v3994_v63 }
 0x1e6   : > { %v3815_v0 = vsel %vm7322_vm3, %v5169_v31, 0.0  ;;  %v3827_v28 = vsel %vm7376_vm1, %v5192_v50, 0.0  ;;  %v3824_v7 = vsel %vm7346_vm6, %v5190_v35, 0.0  ;;  %v3996_v18 = vmul.f32 %v3814_v30, %v3814_v30 }
 0x1e7   : > { %v4560_v53 = vpack.c.bf16 %v3815_v0, %v3814_v30  ;;  %v4590_v11 = vpack.c.bf16 %v3827_v28, %v3826_v10  ;;  %v3813_v14 = vsel %vm7381_vm2, %v5170_v19, 0.0  ;;  %v3825_v17 = vsel %vm3753_vm9, %v5194_v12, 0.0 }
 0x1e8   : > { %v4555_v34 = vpack.c.bf16 %v3813_v14, %v3812_v52  ;;  %v3964_v15 = vadd.f32 %v3963_v56, %v3813_v14  ;;  %v3995_v21 = vmul.f32 %v3813_v14, %v3813_v14  ;;  %v4585_v3 = vpack.c.bf16 %v3825_v17, %v3824_v7 }
 0x1e9   : > { %4596 = vst [vmem:[%s7192_s9 + $0x28] sm:$0xff] %v4560_v53   ;;  %4602 = vst [vmem:[%s7192_s9 + $0x58] sm:$0xff] %v4590_v11   ;;  %v3997_v45 = vmul.f32 %v3815_v0, %v3815_v0  ;;  %v3998_v4 = vmul.f32 %v7234_v1, %v7234_v1  ;;  %v3999_v59 = vmul.f32 %v7240_v61, %v7240_v61 }
 0x1ea   : > { %4595 = vst [vmem:[%s7192_s9 + $0x20] sm:$0xff] %v4555_v34   ;;  %v3965_v36 = vadd.f32 %v3964_v15, %v3814_v30  ;;  %v4018_v26 = vadd.f32 %v4017_v20, %v3995_v21  ;;  %4601 = vst [vmem:[%s7192_s9 + $0x50] sm:$0xff] %v4585_v3   ;;  %v4000_v54 = vmul.f32 %v7225_v48, %v7225_v48 }
 0x1eb   : > { %v4001_v9 = vmul.f32 %v7230_v5, %v7230_v5  ;;  %v4005_v47 = vmul.f32 %v7357_v23, %v7357_v23  ;;  %v4006_v29 = vmul.f32 %v3824_v7, %v3824_v7  ;;  %v4008_v63 = vmul.f32 %v3826_v10, %v3826_v10 }
 0x1ec   : > { %v3966_v49 = vadd.f32 %v3965_v36, %v3815_v0  ;;  %v4019_v41 = vadd.f32 %v4018_v26, %v3996_v18 }
 0x1ee   : > { %v3967_v8 = vadd.f32 %v3966_v49, %v7234_v1  ;;  %v4020_v25 = vadd.f32 %v4019_v41, %v3997_v45  ;;  %v4002_v1 = vmul.f32 %v3820_v13, %v3820_v13 }
 0x1f0   : > { %v3968_v55 = vadd.f32 %v3967_v8, %v7240_v61  ;;  %v4021_v32 = vadd.f32 %v4020_v25, %v3998_v4  ;;  %v4003_v61 = vmul.f32 %v7369_v22, %v7369_v22 }
 0x1f2   : > { %v3969_v39 = vadd.f32 %v3968_v55, %v7225_v48  ;;  %v4022_v37 = vadd.f32 %v4021_v32, %v3999_v59  ;;  %v4004_v48 = vmul.f32 %v7336_v44, %v7336_v44 }
 0x1f4   : > { %v4023_v2 = vadd.f32 %v4022_v37, %v4000_v54  ;;  %v3970_v43 = vadd.f32 %v3969_v39, %v7230_v5 }
 0x1f6   : > { %v3971_v38 = vadd.f32 %v3970_v43, %v3820_v13  ;;  %v4024_v62 = vadd.f32 %v4023_v2, %v4001_v9 }
 0x1f8   : > { %v3972_v46 = vadd.f32 %v3971_v38, %v7369_v22  ;;  %v4025_v6 = vadd.f32 %v4024_v62, %v4002_v1  ;;  %v4007_v22 = vmul.f32 %v3825_v17, %v3825_v17 }
 0x1fa   : > { %v3973_v52 = vadd.f32 %v3972_v46, %v7336_v44  ;;  %v4026_v57 = vadd.f32 %v4025_v6, %v4003_v61  ;;  %v4009_v44 = vmul.f32 %v3827_v28, %v3827_v28 }
 0x1fc   : > { %v3974_v5 = vadd.f32 %v3973_v52, %v7357_v23  ;;  %v4027_v13 = vadd.f32 %v4026_v57, %v4004_v48 }
 0x1fe   : > { %v3975_v27 = vadd.f32 %v3974_v5, %v3824_v7  ;;  %v4028_v40 = vadd.f32 %v4027_v13, %v4005_v47 }
 0x200   : > { %v3976_v16 = vadd.f32 %v3975_v27, %v3825_v17  ;;  %v4029_v60 = vadd.f32 %v4028_v40, %v4006_v29 }
 0x202   : > { %v3977_v35 = vadd.f32 %v3976_v16, %v3826_v10  ;;  %v4030_v58 = vadd.f32 %v4029_v60, %v4007_v22 }
 0x204   : > { %v3978_v24 = vadd.f32 %v3977_v35, %v3827_v28  ;;  %v4031_v51 = vadd.f32 %v4030_v58, %v4008_v63 }
 0x206   : > { %v3979_v42 = vrot.slane %v3978_v24, 4  ;;  %v4032_v31 = vadd.f32 %v4031_v51, %v4009_v44 }
 0x208   : > { %v3980_v23 = vadd.f32 %v3979_v42, %v3978_v24  ;;  %v4033_v50 = vrot.slane %v4032_v31, 4 }
 0x20a   : > { %v3981_v30 = vrot.slane %v3980_v23, 2  ;;  %v4034_v56 = vadd.f32 %v4033_v50, %v4032_v31 }
 0x20c   : > { %v3982_v33 = vadd.f32 %v3981_v30, %v3980_v23  ;;  %v4035_v19 = vrot.slane %v4034_v56, 2 }
 0x20e   : > { %v3983_v12 = vrot.slane %v3982_v33, 1  ;;  %v4036_v20 = vadd.f32 %v4035_v19, %v4034_v56 }
 0x210   : > { %v3984_v10 = vadd.f32 %v3983_v12, %v3982_v33  ;;  %v4037_v0 = vrot.slane %v4036_v20, 1 }
 0x212   : > { %3985 = vst [vmem:[%s467_s14] sm:$0x1] %v3984_v10  ;;  %v4038_v28 = vadd.f32 %v4037_v0, %v4036_v20 }
 0x214   : > { %4039 = vst [vmem:[%s467_s14 + $0x1] sm:$0x1] %v4038_v28 }
 0x215 PF: > { %s18_s28 = sadd.s32 1, %s5574_s28   ;;  %s7681_s24 = smov %s5566_s26 }
 0x216   : > { %p15_p13 = scmp.ge.s32.totalorder %s18_s28, 6   ;;  %s7682_s25 = smov %s5570_s27 }
 0x217   : > { %s7683_s26 = smov %s7686_s4  ;;  %s7684_s27 = smov %s7690_s5 }
 0x218   :  { %17 = sbr.rel (!%p15_p13) target bundleno = 3 (0x3), region = 100 }

// kernel: resblock_forward.4
= control target key start
LH: loop header
LB: loop body
LE: loop exit
PB: predicated region body
PF: predicated region fallthrough
CT: control target
= control target key end

     0   :  { %s5821_s24 = smov 0   ;;  %s5823_s25 = smov 0   ;;  %s7881_s0 = inlined_call_operand.vmem [shape: bf16[2,16,24,128], index: 0, kind: input, shape index: {}, may-alias: {0,1,2}]   ;;  %s7882_s1 = inlined_call_operand.vmem [shape: bf16[2,16,24,128], index: 1, kind: input, shape index: {}, may-alias: {0,1,2}]   ;;  %s7883_s2 = inlined_call_operand.vmem [shape: bf16[2,16,24,128], index: 2, kind: input, shape index: {}, may-alias: {0,1,2}]   ;;  %s7884_s3 = inlined_call_operand.vmem [shape: bf16[9,128,128], index: 3, kind: input, shape index: {}]   ;;  %s7885_s4 = inlined_call_operand.vmem [shape: f32[1,128], index: 4, kind: input, shape index: {}]   ;;  %s7886_s5 = inlined_call_operand.vmem [shape: f32[1,128], index: 5, kind: input, shape index: {}]   ;;  %s7887_s6 = inlined_call_operand.vmem [shape: bf16[2,16,24,128], index: 6, kind: output, shape index: {0}]   ;;  %s7888_s7 = inlined_call_operand.vmem [shape: f32[2,2,2,128], index: 7, kind: output, shape index: {1}]  }
   0x1   :  { %s5825_s26 = smov 0   ;;  %s5827_s27 = smov 0  }
   0x2   :  { %s5829_s28 = smov 0  }
   0x3 LB: > { %s27_s29 = sadd.s32 1, %s5769_s26  ;;  %s30_s30 = sadd.s32 1, %s5773_s27  ;;  %s5777_s28 = sphi %s5829_s28, %s18_s28   ;;  %s5773_s27 = sphi %s5827_s27, %s8163_s27   ;;  %s5769_s26 = sphi %s5825_s26, %s8162_s26   ;;  %s5765_s25 = sphi %s5823_s25, %s8161_s25   ;;  %s5761_s24 = sphi %s5821_s24, %s8160_s24  }
   0x4   : > { %p28_p0 = scmp.ge.s32.totalorder %s27_s29, 2  ;;  %p4436_p1 = scmp.ge.s32.totalorder %s5777_s28, 1 }
   0x5   : > { %p328_p2 = scmp.lt.s32.totalorder %s5777_s28, 5 }
   0x6   : > { %s8165_s29 = smov (%p28_p0, %s27_s29), 0  ;;  %s8167_s30 = smov (!%p28_p0, %s30_s30), %s5773_s27 }
   0x7   : > { %p329_p3 = pnand %p4436_p1, %p328_p2  ;;  %p32_p4 = scmp.ge.s32.totalorder %s8167_s30, 2 }
   0x9   : > { %s8169_s30 = smov (%p32_p4, %s8167_s30), 0  ;;  %332 = sbr.rel (%p329_p3) target bundleno = 532 (0x214), region = 44 }
  0x10   : > { %v5664_v0 = vld [vmem:[%s7884_s3 + $0x100] sm:$0xff]   ;;  %s5857_s10 = sshll.u32 %s5761_s24, 3  ;;  %v5665_v1 = vld [vmem:[%s7884_s3 + $0x108] sm:$0xff]   ;;  %p408_p5 = scmp.lt.s32.totalorder %s5765_s25, 1  ;;  %v5667_v3 = vld [vmem:[%s7884_s3 + $0x110] sm:$0xff]   ;;  %v5779_v15 = vmov 0  }
  0x11   : > { %5162 = vmatprep.subr.bf16.mxu0 %v5664_v0  ;;  %v5666_v2 = vld [vmem:[%s7884_s3 + $0x40] sm:$0xff]   ;;  %p424_p6 = scmp.lt.s32.totalorder %s5857_s10, 15  ;;  %v5668_v4 = vld [vmem:[%s7884_s3 + $0x48] sm:$0xff]   ;;  %v5670_v5 = vld [vmem:[%s7884_s3 + $0x50] sm:$0xff]   ;;  %s4438_s12 = sadd.s32 4294967295, %s5857_s10  ;;  %v5780_v43 = vmov 0.0|0.0  }
  0x12   : > { %5163 = vmatpush3.bf16.msra.mxu0 %v5664_v0  ;;  %s8171_s25 = smov (!%p408_p5, %s5765_s25), 1  ;;  %5002 = vmatprep.subr.bf16.mxu1 %v5666_v2  ;;  %v5669_v6 = vld [vmem:[%s7884_s3 + $0x118] sm:$0xff]   ;;  %p406_p7 = scmp.gt.s32.totalorder %s4438_s12, 0  ;;  %v5671_v8 = vld [vmem:[%s7884_s3 + $0x120] sm:$0xff]   ;;  %v5673_v10 = vld [vmem:[%s7884_s3 + $0x128] sm:$0xff]   ;;  %v5952_v44 = vunpack.c.l.b16 %v5780_v43  ;;  %vm527_vm1 = vcmask 1043456  }
  0x13   : > { %5164 = vmatprep.subr.bf16.mxu0 %v5665_v1  ;;  %s425_s19 = scalar_select %p424_p6, %s5857_s10, 15  ;;  %5003 = vmatpush3.bf16.msra.mxu1 %v5666_v2  ;;  %v5672_v7 = vld [vmem:[%s7884_s3 + $0x58] sm:$0xff]   ;;  %v5674_v9 = vld [vmem:[%s7884_s3 + $0x60] sm:$0xff]   ;;  %478 = vst [vmem:[#allocation2] sm:$0xf] %v5779_v15  ;;  %v5676_v19 = vld [vmem:[%s7884_s3 + $0x68] sm:$0xff]  }
  0x14   : > { %s5876_s20 = smul.u32 48, %s8171_s25  ;;  %5004 = vmatprep.subr.bf16.mxu1 %v5668_v4  ;;  %p4439_p8 = scmp.lt.s32.totalorder %s4438_s12, 15  ;;  %479 = vst [vmem:[#allocation2 + $0x78] sm:$0xf0] %v5779_v15  ;;  %825 = vst [vmem:[#allocation2 + $0x78] sm:$0xf] %v5779_v15 }
  0x15   : > { %s5572_s23 = smul.u32 3, %s425_s19  ;;  %s8173_s12 = smov (!%p406_p7, %s4438_s12), 0  ;;  %v5917_v16 = vld [vmem:[%s7885_s4] ss:$0 sm:$0xff]  ;;  %v5675_v26 = vld [vmem:[%s7884_s3 + $0x130] sm:$0xff]   ;;  %v5677_v46 = vld [vmem:[%s7884_s3 + $0x138] sm:$0xff]  }
  0x16   : > { %5165 = vmatpush3.bf16.msra.mxu0 %v5665_v1  ;;  %s8175_s12 = smov (!%p4439_p8, %s8173_s12), 15  ;;  %p469_p9 = scmp.eq.s32.totalorder %s5761_s24, 0  ;;  %v5928_v22 = vld [vmem:[%s7886_s5] ss:$0 sm:$0xff]  ;;  %v5678_v31 = vld [vmem:[%s7884_s3 + $0x70] sm:$0xff]   ;;  %v5680_v56 = vld [vmem:[%s7884_s3 + $0x78] sm:$0xff]  }
  0x17   : > { %5166 = vmatprep.subr.bf16.mxu0 %v5667_v3  ;;  %s5885_s11 = sadd.s32 %s5572_s23, %s5876_s20  ;;  %5005 = vmatpush3.bf16.msra.mxu1 %v5668_v4  ;;  %s5570_s14 = smul.u32 3, %s8175_s12  ;;  %v5679_v62 = vld [vmem:[%s7884_s3 + $0x140] sm:$0xff]   ;;  %vm2291_vm2 = vsmask.f32 7424  ;;  %vm1100_vm3 = vsmask.f32 4352 }
  0x18   : > { %s4446_s13 = sshll.u32 %s5885_s11, 2  ;;  %5006 = vmatprep.subr.bf16.mxu1 %v5670_v5  ;;  %s4699_s8 = sadd.s32 8, %s5857_s10  ;;  %vm1424_vm5 = vsmask.f32 3328  ;;  %vm1729_vm6 = vsmask.f32 256 }
  0x19   : > { %s5897_s18 = scalar_lea.vmem %s7882_s1, %s4446_s13  ;;  %s414_s12 = sadd.s32 %s5876_s20, %s5570_s14 }
  0x1a   : > { %5167 = vmatpush3.bf16.msra.mxu0 %v5667_v3  ;;  %v4729_v11 = vld [vmem:[%s5897_s18] sm:$0xff]   ;;  %v538_v14 = vld [vmem:[%s5897_s18 + $0xc] sm:$0xff]   ;;  %s4444_s23 = sshll.u32 %s414_s12, 2  ;;  %v4808_v25 = vld [vmem:[%s5897_s18 + $0x18] sm:$0xff]   ;;  %p6081_p10 = scmp.lt.s32.totalorder %s4699_s8, 15 }
  0x1b   : > { %5168 = vmatprep.subr.bf16.mxu0 %v5669_v6  ;;  %5007 = vmatpush3.bf16.msra.mxu1 %v5670_v5  ;;  %v4730_v12 = vunpack.c.l.bf16 %v4729_v11  ;;  %v4731_v13 = vunpack.c.h.bf16 %v4729_v11  ;;  %v562_v17 = vunpack.c.l.bf16 %v538_v14  ;;  %v563_v18 = vunpack.c.h.bf16 %v538_v14  ;;  %s416_s16 = scalar_lea.vmem %s7881_s0, %s4444_s23  ;;  %v544_v30 = vld [vmem:[%s5897_s18 + $0x24] sm:$0xff]   ;;  %p470_p11 = scmp.eq.s32.totalorder %s5761_s24, 1 }
  0x1c   : > { %5008 = vmatprep.subr.bf16.mxu1 %v5672_v7  ;;  %v4734_v29 = vunpack.c.l.bf16 %v4808_v25  ;;  %v4725_v34 = vld [vmem:[%s416_s16] sm:$0xff]   ;;  %s5949_s12 = scalar_select %p469_p9, 1, 0  ;;  %v4735_v35 = vunpack.c.h.bf16 %v4808_v25  ;;  %v568_v36 = vunpack.c.l.bf16 %v544_v30  ;;  %v569_v50 = vunpack.c.h.bf16 %v544_v30  ;;  %v4809_v25 = vld [vmem:[%s5897_s18 + $0x30] sm:$0xff]  }
  0x1d   : > { %v590_v20 = vmul.f32 %v4730_v12, %v5917_v16  ;;  %v591_v21 = vmul.f32 %v4731_v13, %v5917_v16  ;;  %v593_v23 = vmul.f32 %v5917_v16, %v562_v17  ;;  %v594_v24 = vmul.f32 %v5917_v16, %v563_v18  ;;  %v6003_v11 = vld [vmem:[%s7884_s3] sm:$0xff]   ;;  %v5681_v18 = vld [vmem:[%s7884_s3 + $0x148] sm:$0xff]   ;;  %s8177_s8 = smov (!%p6081_p10, %s4699_s8), 15  ;;  %p462_p12 = scmp.lt.s32.totalorder %s5761_s24, 1 }
  0x1e   : > { %5169 = vmatpush3.bf16.msra.mxu0 %v5669_v6  ;;  %v4726_v39 = vunpack.c.l.bf16 %v4725_v34  ;;  %v4727_v40 = vunpack.c.h.bf16 %v4725_v34  ;;  %v596_v45 = vmul.f32 %v4734_v29, %v5917_v16  ;;  %v521_v52 = vstv %s5949_s12  ;;  %s8179_s8 = smov (!%p6081_p10, %s8177_s8), 15  ;;  %s4454_s11 = sshll.u32 %s8171_s25, 1 }
  0x1f   : > { %5170 = vmatprep.subr.bf16.mxu0 %v5671_v8  ;;  %5009 = vmatpush3.bf16.msra.mxu1 %v5672_v7  ;;  %v621_v27 = vadd.f32 %v5928_v22, %v590_v20  ;;  %v622_v28 = vadd.f32 %v5928_v22, %v591_v21  ;;  %v624_v32 = vadd.f32 %v5928_v22, %v593_v23  ;;  %vm5987_vm0 = vcmp.eq.s32.totalorder %v521_v52, 1  ;;  %s5573_s22 = smul.u32 3, %s8179_s8  ;;  %s8181_s24 = smov (!%p462_p12, %s5761_s24), 1 }
  0x20   : > { %5010 = vmatprep.subr.bf16.mxu1 %v5674_v9  ;;  %v625_v33 = vadd.f32 %v5928_v22, %v594_v24  ;;  %v493_v48 = vmul.f32 %v4726_v39, %v5917_v16  ;;  %v494_v49 = vmul.f32 %v4727_v40, %v5917_v16  ;;  %v597_v53 = vmul.f32 %v4735_v35, %v5917_v16  ;;  %s6269_s9 = scalar_select %p470_p11, 1, 0 }
  0x21   : > { %v645_v37 = vmax.f32 %v621_v27, 0.0  ;;  %v646_v38 = vmax.f32 %v622_v28, 0.0  ;;  %v648_v41 = vmax.f32 %v624_v32, 0.0  ;;  %v627_v54 = vadd.f32 %v5928_v22, %v596_v45  ;;  %v550_v28 = vld [vmem:[%s5897_s18 + $0x3c] sm:$0xff]   ;;  %s442_s8 = sadd.s32 %s5573_s22, %s5876_s20 }
  0x22   : > { %5171 = vmatpush3.bf16.msra.mxu0 %v5671_v8  ;;  %v649_v42 = vmax.f32 %v625_v33, 0.0  ;;  %v503_v57 = vadd.f32 %v5928_v22, %v493_v48  ;;  %v504_v58 = vadd.f32 %v5928_v22, %v494_v49  ;;  %v599_v59 = vmul.f32 %v5917_v16, %v568_v36  ;;  %v4810_v33 = vld [vmem:[%s5897_s18 + $0x48] sm:$0xff]   ;;  %s4451_s10 = sshll.u32 %s442_s8, 2 }
  0x23   : > { %5172 = vmatprep.subr.bf16.mxu0 %v5673_v10  ;;  %5011 = vmatpush3.bf16.msra.mxu1 %v5674_v9  ;;  %v5958_v47 = vpack.c.bf16 %v646_v38, %v645_v37  ;;  %v628_v0 = vadd.f32 %v5928_v22, %v597_v53  ;;  %v651_v4 = vmax.f32 %v627_v54, 0.0  ;;  %v529_v12 = vrot.slane %v5779_v15, 4  ;;  %s444_s15 = scalar_lea.vmem %s7883_s2, %s4451_s10 }
  0x24   : > { %5012 = vmatprep.subr.bf16.mxu1 %v5676_v19  ;;  %v695_v51 = vpack.c.bf16 %v649_v42, %v648_v41  ;;  %v506_v2 = vmax.f32 %v503_v57, 0.0  ;;  %v507_v3 = vmax.f32 %v504_v58, 0.0  ;;  %v4738_v34 = vunpack.c.l.bf16 %v4809_v25 }
  0x25   : > { %v5966_v55 = vshrl.u32 %v5958_v47, 16  ;;  %5178 = vmatprep.mubr.bf16.mxu0 %v5958_v47  ;;  %v5976_v60 = vshll.u32 %v5958_v47, 16  ;;  %v652_v7 = vmax.f32 %v628_v0, 0.0  ;;  %v889_v29 = vrot.slane %v5958_v47, 4  ;;  %v5683_v47 = vld [vmem:[%s7884_s3 + $0x158] sm:$0xff]  }
  0x26   : > { %5173 = vmatpush3.bf16.msra.mxu0 %v5673_v10  ;;  %v5979_v61 = vcombine.low %v5780_v43, %v695_v51  ;;  %v729_v63 = vunpack.c.h.b16 %v695_v51  ;;  %v518_v9 = vpack.c.bf16 %v507_v3, %v506_v2  ;;  %v600_v10 = vmul.f32 %v5917_v16, %v569_v50  ;;  %v5685_v3 = vld [vmem:[%s7884_s3 + $0x160] sm:$0xff]  }
  0x27   : > { %5174 = vmatprep.subr.bf16.mxu0 %v5675_v26  ;;  %5013 = vmatpush3.bf16.msra.mxu1 %v5676_v19  ;;  %v7896_v1 = vrot.slane %v5966_v55, 7  ;;  %v6010_v14 = vpack.c.bf16 %v652_v7, %v651_v4  ;;  %v630_v19 = vadd.f32 %v5928_v22, %v599_v59  ;;  %v4739_v35 = vunpack.c.h.bf16 %v4809_v25 }
  0x28   : > { %5014 = vmatprep.subr.bf16.mxu1 %v5678_v31  ;;  %774 = vst [vmem:[#allocation2 + $0x18] sm:$0xff] %v5979_v61  ;;  %v5992_v6 = vpack.c.b16 %v5952_v44, %v729_v63  ;;  %v523_v17 = vsel %vm5987_vm0, 0, %v518_v9  ;;  %v631_v23 = vadd.f32 %v5928_v22, %v600_v10  ;;  %v891_v30 = vrot.slane %v5979_v61, 4  ;;  %v5686_v9 = vld [vmem:[%s7884_s3 + $0x8] sm:$0xff]  }
  0x29   : > { %v5997_v8 = vor.u32 %v5976_v60, %v7896_v1  ;;  %v528_v15 = vrot.slane %v523_v17, 4  ;;  %776 = vst [vmem:[#allocation2 + $0x28] sm:$0xff] %v6010_v14  ;;  %v654_v24 = vmax.f32 %v630_v19, 0.0  ;;  %v574_v38 = vunpack.c.l.bf16 %v550_v28 }
  0x2a   : > { %5175 = vmatpush3.bf16.msra.mxu0 %v5675_v26  ;;  %775 = vst [vmem:[#allocation2 + $0x20] sm:$0xff] %v5992_v6  ;;  %v6008_v13 = vshrl.u32 %v5992_v6, 16  ;;  %v6020_v21 = vshll.u32 %v5992_v6, 16  ;;  %v655_v32 = vmax.f32 %v631_v23, 0.0  ;;  %v575_v39 = vunpack.c.h.bf16 %v550_v28 }
  0x2b   : > { %5176 = vmatprep.subr.bf16.mxu0 %v5677_v46  ;;  %5015 = vmatpush3.bf16.msra.mxu1 %v5678_v31  ;;  %7931 = vst [vmem:[#allocation3_spill] sm:$0xff] %v5997_v8  ;;  %v6028_v26 = vsel %vm527_vm1, %v528_v15, %v529_v12  ;;  %533 = vst [vmem:[#allocation2] sm:$0xf0] %v528_v15  ;;  %v5682_v31 = vld [vmem:[%s7884_s3 + $0x150] sm:$0xff]   ;;  %v602_v40 = vmul.f32 %v4738_v34, %v5917_v16  ;;  %v4742_v42 = vunpack.c.l.bf16 %v4810_v33  ;;  %v5688_v34 = vld [vmem:[%s7884_s3 + $0x168] sm:$0xff]  }
  0x2c   : > { %5016 = vmatprep.subr.bf16.mxu1 %v5680_v56  ;;  %7932 = vst [vmem:[#allocation4_spill] sm:$0xff] %v6008_v13  ;;  %v7890_v20 = vrot.slane %v6008_v13, 7  ;;  %534 = vst [vmem:[#allocation2 + $0x8] sm:$0xff] %v6028_v26  ;;  %v887_v36 = vrot.slane %v6028_v26, 4  ;;  %v699_v37 = vpack.c.bf16 %v655_v32, %v654_v24  ;;  %v603_v41 = vmul.f32 %v4739_v35, %v5917_v16  ;;  %v556_v15 = vld [vmem:[%s5897_s18 + $0x54] sm:$0xff]  }
  0x2d   : > { %v605_v48 = vmul.f32 %v5917_v16, %v574_v38  ;;  %v4743_v49 = vunpack.c.h.bf16 %v4810_v33  ;;  %v892_v50 = vsel %vm527_vm1, %v889_v29, %v891_v30  ;;  %v633_v51 = vadd.f32 %v5928_v22, %v602_v40  ;;  %v5687_v33 = vld [vmem:[%s7884_s3 + $0x10] sm:$0xff]  }
  0x2e   : > { %5177 = vmatpush3.bf16.msra.mxu0 %v5677_v46  ;;  %v6033_v27 = vor.u32 %v6020_v21, %v7890_v20  ;;  %v6048_v45 = vcombine.low %v5780_v43, %v699_v37  ;;  %v735_v46 = vunpack.c.h.b16 %v699_v37  ;;  %v634_v52 = vadd.f32 %v5928_v22, %v603_v41 }
  0x2f   : > { %5202 = vmatprep.subr.bf16.mxu0 %v5679_v62  ;;  %5017 = vmatpush3.bf16.msra.mxu1 %v5680_v56  ;;  %v606_v53 = vmul.f32 %v5917_v16, %v575_v39  ;;  %v890_v56 = vsel %vm527_vm1, %v887_v36, %v889_v29  ;;  %v608_v59 = vmul.f32 %v4742_v42, %v5917_v16  ;;  %v657_v63 = vmax.f32 %v633_v51, 0.0 }
  0x30   : > { %5042 = vmatprep.subr.bf16.mxu1 %v6003_v11  ;;  %7933 = vst [vmem:[#allocation5_spill] sm:$0xff] %v6033_v27  ;;  %777 = vst [vmem:[#allocation2 + $0x30] sm:$0xff] %v6048_v45  ;;  %v6067_v57 = vshrl.u32 %v6048_v45, 16  ;;  %v6070_v58 = vpack.c.b16 %v5952_v44, %v735_v46  ;;  %v658_v0 = vmax.f32 %v634_v52, 0.0  ;;  %v636_v2 = vadd.f32 %v5928_v22, %v605_v48 }
  0x31   : > { %5179 = vmatmul.mubr.bf16.vlgmr.msra.gmra.mrb[0].mxu0 %v5979_v61  ;;  %v6087_v5 = vshll.u32 %v6048_v45, 16  ;;  %v609_v10 = vmul.f32 %v4743_v49, %v5917_v16  ;;  %v639_v28 = vadd.f32 %v5928_v22, %v608_v59  ;;  %v893_v29 = vrot.slane %v5992_v6, 4  ;;  %v5689_v59 = vld [vmem:[%s7884_s3 + $0x18] sm:$0xff]  }
  0x32   : > { %5203 = vmatpush3.bf16.msra.mxu0 %v5679_v62  ;;  %5182 = vmatprep.mubr.bf16.mxu0 %v5992_v6  ;;  %v6061_v54 = vld [vmem:[#allocation2] sm:$0xf0]  ;;  %v7892_v4 = vrot.slane %v6067_v57, 7  ;;  %778 = vst [vmem:[#allocation2 + $0x38] sm:$0xff] %v6070_v58  ;;  %v6091_v7 = vshrl.u32 %v6070_v58, 16  ;;  %v6098_v17 = vpack.c.bf16 %v658_v0, %v657_v63  ;;  %v660_v19 = vmax.f32 %v636_v2, 0.0 }
  0x33   : > { %5204 = vmatprep.subr.bf16.mxu0 %v5681_v18  ;;  %v886_v62 = vrot.slane %v6061_v54, 4  ;;  %v6109_v25 = vshll.u32 %v6070_v58, 16  ;;  %v895_v35 = vrot.slane %v6010_v14, 4  ;;  %v663_v37 = vmax.f32 %v639_v28, 0.0 }
  0x34   : > { %v6105_v23 = vor.u32 %v6087_v5, %v7892_v4  ;;  %v7891_v24 = vrot.slane %v6091_v7, 7  ;;  %779 = vst [vmem:[#allocation2 + $0x40] sm:$0xff] %v6098_v17  ;;  %v6133_v39 = vshll.u32 %v6098_v17, 16  ;;  %v580_v41 = vunpack.c.l.bf16 %v556_v15 }
  0x35   : > { %v888_v12 = vsel %vm527_vm1, %v886_v62, %v887_v36  ;;  %v640_v36 = vadd.f32 %v5928_v22, %v609_v10  ;;  %v581_v46 = vunpack.c.h.bf16 %v556_v15  ;;  %v897_v63 = vrot.slane %v6048_v45, 4  ;;  %v6197_v15 = vld [vmem:[%s7884_s3 + $0x180] sm:$0xff]  }
  0x36   : > { %5205 = vmatpush3.bf16.msra.mxu0 %v5681_v18  ;;  %v637_v18 = vadd.f32 %v5928_v22, %v606_v53  ;;  %5018 = vmatprep.mubr.bf16.mxu1 %v888_v12  ;;  %7935 = vst [vmem:[#allocation6_spill] sm:$0xff] %v6105_v23  ;;  %v6126_v6 = vor.u32 %v6109_v25, %v7891_v24  ;;  %v6204_v28 = vshll.u32 %v5979_v61, 16  ;;  %v1458_v1 = vrot.slane %v6109_v25, 5 }
  0x37   : > { %5206 = vmatprep.subr.bf16.mxu0 %v5682_v31  ;;  %5019 = vmatmul.mubr.bf16.vlgmr.msra.gmra.mrb[0].mxu1 %v890_v56  ;;  %v664_v42 = vmax.f32 %v640_v36, 0.0  ;;  %v611_v49 = vmul.f32 %v5917_v16, %v580_v41  ;;  %v612_v52 = vmul.f32 %v5917_v16, %v581_v46  ;;  %v896_v53 = vsel %vm527_vm1, %v893_v29, %v895_v35  ;;  %v5696_v41 = vld [vmem:[%s7884_s3 + $0x38] sm:$0xff]  }
  0x38   : > { %v661_v32 = vmax.f32 %v637_v18, 0.0  ;;  %5022 = vmatprep.mubr.bf16.mxu1 %v892_v50  ;;  %5043 = vmatpush3.bf16.msra.mxu1 %v6003_v11  ;;  %v894_v50 = vsel %vm527_vm1, %v891_v30, %v893_v29  ;;  %v5690_v30 = vld [vmem:[%s7884_s3 + $0x170] sm:$0xff]   ;;  %v898_v10 = vsel %vm527_vm1, %v895_v35, %v897_v63  ;;  %v901_v29 = vrot.slane %v6098_v17, 4 }
  0x39   : > { %5183 = vmatmul.mubr.bf16.gmra.mrb[4].mxu0 %v6010_v14  ;;  %5044 = vmatprep.subr.bf16.mxu1 %v5686_v9  ;;  %v6149_v51 = vpack.c.bf16 %v664_v42, %v663_v37  ;;  %v642_v16 = vadd.f32 %v5928_v22, %v611_v49  ;;  %v643_v62 = vadd.f32 %v5928_v22, %v612_v52  ;;  %v5691_v22 = vld [vmem:[%s7884_s3 + $0x20] sm:$0xff]   ;;  %v2302_v35 = vrot.slane %v6204_v28, 1 }
  0x3a   : > { %5207 = vmatpush3.bf16.msra.mxu0 %v5682_v31  ;;  %5186 = vmatprep.mubr.bf16.mxu0 %v6048_v45  ;;  %v6115_v31 = vshrl.u32 %v6098_v17, 16  ;;  %v703_v40 = vpack.c.bf16 %v661_v32, %v660_v19  ;;  %v5692_v19 = vld [vmem:[%s7884_s3 + $0x28] sm:$0xff]   ;;  %v2297_v32 = vrot.slane %v5976_v60, 1  ;;  %v6220_v36 = vshrl.u32 %v5979_v61, 16  ;;  %v826_v61 = vld [vmem:[#allocation2] sm:$0xf8] }
  0x3b   : > { %5208 = vmatprep.subr.bf16.mxu0 %v5683_v47  ;;  %782 = vst [vmem:[#allocation2 + $0x58] sm:$0xff] %v6149_v51  ;;  %v666_v0 = vmax.f32 %v642_v16, 0.0  ;;  %v667_v2 = vmax.f32 %v643_v62, 0.0  ;;  %v6223_v37 = vshrl.u32 %v6010_v14, 16  ;;  %v7894_v42 = vshrl.u32 %v6028_v26, 16  ;;  %v6237_v49 = vld [vmem:[%s7884_s3 + $0x80] sm:$0xff]  }
  0x3c   : > { %7936 = vst [vmem:[#allocation7_spill] sm:$0xff] %v6115_v31  ;;  %v7889_v38 = vrot.slane %v6115_v31, 7  ;;  %v741_v48 = vunpack.c.h.b16 %v703_v40  ;;  %5045 = vmatpush3.bf16.msra.mxu1 %v5686_v9  ;;  %v899_v9 = vrot.slane %v6070_v58, 4  ;;  %7937 = vst [vmem:[#allocation8_spill] sm:$0xff] %v6220_v36  ;;  %v6231_v46 = vshll.u32 %v6010_v14, 16 }
  0x3d   : > { %5046 = vmatprep.subr.bf16.mxu1 %v5687_v33  ;;  %v707_v45 = vpack.c.bf16 %v667_v2, %v666_v0  ;;  %v907_v52 = vrot.slane %v6149_v51, 4  ;;  %v1102_v14 = vshrl.u32 %v826_v61, 16  ;;  %v2306_v16 = vor.u32 %v2302_v35, %v6220_v36 }
  0x3e   : > { %5209 = vmatpush3.bf16.msra.mxu0 %v5683_v47  ;;  %v6139_v11 = vor.u32 %v6133_v39, %v7889_v38  ;;  %v6143_v47 = vcombine.low %v5780_v43, %v703_v40  ;;  %v6155_v56 = vpack.c.b16 %v5952_v44, %v741_v48  ;;  %v900_v18 = vsel %vm527_vm1, %v897_v63, %v899_v9  ;;  %v4745_v63 = vld [vmem:[%s444_s15] sm:$0xff]   ;;  %s7562_s15 = scalar_lea.vmem %s7887_s6, %s4446_s13  ;;  %s465_s13 = sadd.s32 %s4454_s11, %s8181_s24 }
  0x3f   : > { %5210 = vmatprep.subr.bf16.mxu0 %v5685_v3  ;;  %5023 = vmatmul.mubr.bf16.gmra.mrb[4].mxu1 %v894_v50  ;;  %v6188_v12 = vcombine.low %v5780_v43, %v707_v45  ;;  %v7893_v48 = vshll.u32 %v6028_v26, 16  ;;  %v1112_v62 = vrot.slane %v7894_v42, 3  ;;  %v5703_v42 = vld [vmem:[%s7884_s3 + $0x90] sm:$0xff]   ;;  %s4455_s12 = sshll.u32 %s465_s13, 1 }
  0x40   : > { %780 = vst [vmem:[#allocation2 + $0x48] sm:$0xff] %v6143_v47  ;;  %781 = vst [vmem:[#allocation2 + $0x50] sm:$0xff] %v6155_v56  ;;  %5026 = vmatprep.mubr.bf16.mxu1 %v896_v53  ;;  %5047 = vmatpush3.bf16.msra.mxu1 %v5687_v33  ;;  %v903_v33 = vrot.slane %v6143_v47, 4  ;;  %v905_v50 = vrot.slane %v6155_v56, 4  ;;  %s467_s23 = scalar_lea.vmem %s7888_s7, %s4455_s12 }
  0x41   : > { %5187 = vmatmul.mubr.bf16.gmra.mrb[8].mxu0 %v6070_v58  ;;  %5048 = vmatprep.subr.bf16.mxu1 %v5689_v59  ;;  %v747_v58 = vunpack.c.h.b16 %v707_v45  ;;  %783 = vst [vmem:[#allocation2 + $0x60] sm:$0xff] %v6188_v12  ;;  %v1115_v2 = vrot.slane %v7893_v48, 4 }
  0x42   : > { %5190 = vmatprep.mubr.bf16.mxu0 %v6098_v17  ;;  %5211 = vmatpush3.bf16.msra.mxu0 %v5685_v3  ;;  %v5693_v3 = vld [vmem:[%s7884_s3 + $0x178] sm:$0xff]   ;;  %v2298_v17 = vor.u32 %v2297_v32, %v5966_v55  ;;  %v904_v40 = vsel %vm527_vm1, %v901_v29, %v903_v33  ;;  %v906_v0 = vsel %vm527_vm1, %v903_v33, %v905_v50  ;;  %v5697_v33 = vld [vmem:[%s7884_s3 + $0x188] sm:$0xff]  }
  0x43   : > { %5212 = vmatprep.subr.bf16.mxu0 %v5688_v34  ;;  %v6201_v43 = vpack.c.b16 %v5952_v44, %v747_v58  ;;  %v5694_v44 = vld [vmem:[%s7884_s3 + $0x30] sm:$0xff]  }
  0x44   : > { %5049 = vmatpush3.bf16.msra.mxu1 %v5689_v59  ;;  %v2303_v53 = vsel %vm2291_vm2, %v2298_v17, %v2302_v35  ;;  %v1105_v59 = vshll.u32 %v826_v61, 16  ;;  %v4747_v17 = vunpack.c.h.bf16 %v4745_v63  ;;  %v7895_v35 = vrot.slane %v6220_v36, 7 }
  0x45   : > { %5050 = vmatprep.subr.bf16.mxu1 %v5691_v22  ;;  %v2326_v61 = vrot.slane %v6087_v5, 1 }
  0x46   : > { %5213 = vmatpush3.bf16.msra.mxu0 %v5688_v34  ;;  %v902_v34 = vsel %vm527_vm1, %v899_v9, %v901_v29  ;;  %v2318_v9 = vrot.slane %v6231_v46, 1  ;;  %v1107_v58 = vrot.slane %v1105_v59, 4  ;;  %v4465_v29 = vld [vmem:[%s7886_s5] ss:$0 sm:$0xff]  ;;  %v1124_v59 = vrot.slane %v5976_v60, 4 }
  0x47   : > { %5214 = vmatprep.subr.bf16.mxu0 %v5690_v30  ;;  %5027 = vmatmul.mubr.bf16.gmra.mrb[8].mxu1 %v898_v10  ;;  %v1104_v10 = vrot.slane %v1102_v14, 3 }
  0x48   : > { %5030 = vmatprep.mubr.bf16.mxu1 %v900_v18  ;;  %5051 = vmatpush3.bf16.msra.mxu1 %v5691_v22  ;;  %v908_v22 = vsel %vm527_vm1, %v905_v50, %v907_v52  ;;  %v6257_v45 = vld [vmem:[#allocation2 + $0x60] sm:$0xf]  ;;  %v1121_v50 = vrot.slane %v5966_v55, 3 }
  0x49   : > { %5191 = vmatmul.mubr.bf16.gmra.mrb[12].mxu0 %v6143_v47  ;;  %5052 = vmatprep.subr.bf16.mxu1 %v5692_v19  ;;  %v4464_v18 = vld [vmem:[%s7885_s4] ss:$0 sm:$0xff]  ;;  %v909_v32 = vrot.slane %v6257_v45, 4 }
  0x4a   : > { %5194 = vmatprep.mubr.bf16.mxu0 %v6155_v56  ;;  %5215 = vmatpush3.bf16.msra.mxu0 %v5690_v30  ;;  %v2310_v30 = vrot.slane %v6020_v21, 1  ;;  %v799_v14 = vmul.f32 %v4747_v17, %v4464_v18  ;;  %v5702_v17 = vld [vmem:[%s7884_s3 + $0x88] sm:$0xff]  }
  0x4b   : > { %5216 = vmatprep.subr.bf16.mxu0 %v5693_v3 }
  0x4c   : > { %5053 = vmatpush3.bf16.msra.mxu1 %v5692_v19  ;;  %v2311_v19 = vsel %vm2291_vm2, %v2306_v16, %v2310_v30  ;;  %v2330_v16 = vor.u32 %v2326_v61, %v6067_v57 }
  0x4d   : > { %5054 = vmatprep.subr.bf16.mxu1 %v5694_v44 }
  0x4e   : > { %5217 = vmatpush3.bf16.msra.mxu0 %v5693_v3  ;;  %v2314_v3 = vor.u32 %v2310_v30, %v6008_v13  ;;  %v2322_v30 = vor.u32 %v2318_v9, %v6223_v37 }
  0x4f   : > { %5242 = vmatprep.subr.bf16.mxu0 %v6197_v15  ;;  %5031 = vmatmul.mubr.bf16.gmra.mrb[12].mxu1 %v902_v34  ;;  %v4746_v34 = vunpack.c.l.bf16 %v4745_v63  ;;  %v910_v63 = vsel %vm527_vm1, %v907_v52, %v909_v32  ;;  %v6299_v52 = vshrl.u32 %v6149_v51, 16 }
  0x50   : > { %5034 = vmatprep.mubr.bf16.mxu1 %v904_v40  ;;  %5055 = vmatpush3.bf16.msra.mxu1 %v5694_v44  ;;  %v2319_v44 = vsel %vm2291_vm2, %v2314_v3, %v2318_v9  ;;  %v1108_v40 = vor.u32 %v1107_v58, %v1104_v10  ;;  %v809_v3 = vadd.f32 %v4465_v29, %v799_v14  ;;  %v1130_v9 = vrot.slane %v6220_v36, 3 }
  0x51   : > { %5195 = vmatmul.mubr.bf16.gmra.mrb[16].mxu0 %v6149_v51  ;;  %5056 = vmatprep.subr.bf16.mxu1 %v5696_v41  ;;  %v1133_v58 = vrot.slane %v6204_v28, 4 }
  0x52   : > { %5198 = vmatprep.mubr.bf16.mxu0 %v6188_v12  ;;  %v812_v32 = vmax.f32 %v809_v3, 0.0  ;;  %v1160_v3 = vrot.slane %v6087_v5, 4 }
  0x54   : > { %5057 = vmatpush3.bf16.msra.mxu1 %v5696_v41  ;;  %v1116_v41 = vor.u32 %v1115_v2, %v1112_v62  ;;  %v2334_v62 = vrot.slane %v6109_v25, 1 }
  0x55   : > { %5082 = vmatprep.subr.bf16.mxu1 %v6237_v49 }
  0x56   : > { %v1117_v10 = vsel %vm1100_vm3, %v1108_v40, %v1116_v41  ;;  %v1125_v40 = vor.u32 %v1124_v59, %v1121_v50  ;;  %v1151_v50 = vrot.slane %v6231_v46, 4  ;;  %v1157_v59 = vrot.slane %v6067_v57, 3 }
  0x57   : > { %5035 = vmatmul.mubr.bf16.gmra.mrb[16].mxu1 %v906_v0  ;;  %v5698_v0 = vld [vmem:[%s7884_s3 + $0x190] sm:$0xff]  }
  0x58   : > { %5038 = vmatprep.mubr.bf16.mxu1 %v908_v22  ;;  %v820_v22 = vstv %s6269_s9 }
  0x59   : > { %5199 = vmatmul.mubr.bf16.gmra.mrb[20].mxu0 %v6201_v43  ;;  %vm6308_vm4 = vcmp.eq.s32.totalorder %v820_v22, 1 }
  0x5a   : > { %5218 = vmatprep.mubr.bf16.mxu0 %v2303_v53  ;;  %v798_v53 = vmul.f32 %v4746_v34, %v4464_v18  ;;  %v6296_v18 = vshll.u32 %v6143_v47, 16  ;;  %v2327_v34 = vsel %vm2291_vm2, %v2322_v30, %v2326_v61  ;;  %v1139_v61 = vrot.slane %v6008_v13, 3 }
  0x5b   : > { %v1142_v30 = vrot.slane %v6020_v21, 4 }
  0x5c   : > { %v808_v2 = vadd.f32 %v4465_v29, %v798_v53  ;;  %v6302_v29 = vshrl.u32 %v6155_v56, 16  ;;  %v2335_v53 = vsel %vm2291_vm2, %v2330_v16, %v2334_v62 }
  0x5d   : > { %v1143_v38 = vor.u32 %v1142_v30, %v1139_v61  ;;  %v5704_v61 = vld [vmem:[%s7884_s3 + $0x1a8] sm:$0xff]   ;;  %v1175_v30 = vrot.slane %v6115_v31, 3 }
  0x5e   : > { %7938 = vst [vmem:[#allocation9_spill] sm:$0xff] %v6302_v29 }
  0x5f   : > { %5039 = vmatmul.mubr.bf16.gmra.mrb[20].mxu1 %v910_v63  ;;  %v2342_v63 = vrot.slane %v6133_v39, 1 }
  0x60   : > { %5058 = vmatprep.mubr.bf16.mxu1 %v1117_v10  ;;  %v2350_v10 = vrot.slane %v6296_v18, 1 }
  0x61   : > { %5219 = vmatmul.mubr.bf16.vlgmr.msra.gmra.mrb[0].mxu0 %v2311_v19  ;;  %v811_v19 = vmax.f32 %v808_v2, 0.0  ;;  %v2338_v2 = vor.u32 %v2334_v62, %v6091_v7  ;;  %v2346_v22 = vor.u32 %v2342_v63, %v6115_v31  ;;  %v1437_v62 = vrot.slane %v5966_v55, 4 }
  0x62   : > { %5243 = vmatpush3.bf16.msra.mxu0 %v6197_v15  ;;  %5222 = vmatprep.mubr.bf16.mxu0 %v2319_v44  ;;  %v6290_v15 = vshrl.u32 %v6143_v47, 16  ;;  %v6305_v44 = vshll.u32 %v6149_v51, 16  ;;  %v6313_v47 = vshll.u32 %v6155_v56, 16  ;;  %v5699_v51 = vld [vmem:[%s7884_s3 + $0x198] sm:$0xff]   ;;  %v1148_v56 = vrot.slane %v6223_v37, 3 }
  0x63   : > { %5244 = vmatprep.subr.bf16.mxu0 %v5697_v33  ;;  %v817_v14 = vpack.c.bf16 %v812_v32, %v811_v19  ;;  %v1438_v19 = vrot.slane %v5976_v60, 5  ;;  %v6346_v32 = vshll.u32 %v6188_v12, 16  ;;  %v2343_v24 = vsel %vm2291_vm2, %v2338_v2, %v2342_v63 }
  0x64   : > { %7939 = vst [vmem:[#allocation10_spill] sm:$0xff] %v6305_v44  ;;  %7942 = vst [vmem:[#allocation11_spill] sm:$0xff] %v6313_v47  ;;  %v1152_v20 = vor.u32 %v1151_v50, %v1148_v56  ;;  %v2351_v4 = vsel %vm2291_vm2, %v2346_v22, %v2350_v10  ;;  %v2358_v48 = vrot.slane %v6313_v47, 1  ;;  %v1441_v63 = vrot.slane %v6220_v36, 4 }
  0x65   : > { %v6329_v16 = vsel %vm6308_vm4, 0, %v817_v14  ;;  %v6356_v14 = vshrl.u32 %v6201_v43, 16  ;;  %v6358_v60 = vor.u32 %v1438_v19, %v1437_v62  ;;  %v1442_v56 = vrot.slane %v6204_v28, 5 }
  0x66   : > { %5245 = vmatpush3.bf16.msra.mxu0 %v5697_v33  ;;  %v6319_v33 = vor.u32 %v1133_v58, %v1130_v9  ;;  %824 = vst [vmem:[#allocation2 + $0x70] sm:$0xff] %v6329_v16  ;;  %v6337_v9 = vshrl.u32 %v6188_v12, 16  ;;  %v1126_v58 = vsel %vm1100_vm3, %v1116_v41, %v1125_v40  ;;  %v1166_v41 = vrot.slane %v6091_v7, 3 }
  0x67   : > { %5246 = vmatprep.subr.bf16.mxu0 %v5698_v0  ;;  %5059 = vmatmul.mubr.bf16.vlgmr.msra.gmra.mrb[0].mxu1 %v1126_v58  ;;  %v2354_v50 = vor.u32 %v2350_v10, %v6290_v15  ;;  %v2366_v2 = vrot.slane %v6305_v44, 1  ;;  %v1187_v22 = vrot.slane %v6296_v18, 4  ;;  %v1443_v58 = vor.u32 %v1442_v56, %v1441_v63  ;;  %v2605_v56 = vld [vmem:[#allocation2 + $0x18] sm:$0xf8] }
  0x68   : > { %5083 = vmatpush3.bf16.msra.mxu1 %v6237_v49  ;;  %v1184_v49 = vrot.slane %v6290_v15, 3  ;;  %v1446_v62 = vrot.slane %v6020_v21, 5  ;;  %v6383_v19 = vor.u32 %v6204_v28, %v7895_v35  ;;  %v2362_v10 = vor.u32 %v2358_v48, %v6302_v29 }
  0x69   : > { %5223 = vmatmul.mubr.bf16.gmra.mrb[4].mxu0 %v2327_v34  ;;  %v1135_v34 = vsel %vm1100_vm3, %v1125_v40, %v6319_v33  ;;  %v1161_v40 = vor.u32 %v1160_v3, %v1157_v59  ;;  %5084 = vmatprep.subr.bf16.mxu1 %v5702_v17  ;;  %v1445_v3 = vrot.slane %v6008_v13, 4  ;;  %v6393_v21 = vsel %vm1424_vm5, %v6358_v60, %v1443_v58 }
  0x6a   : > { %5247 = vmatpush3.bf16.msra.mxu0 %v5698_v0  ;;  %5226 = vmatprep.mubr.bf16.mxu0 %v2335_v53  ;;  %v5701_v0 = vld [vmem:[%s7884_s3 + $0x1a0] sm:$0xff]   ;;  %v1169_v53 = vrot.slane %v6109_v25, 4  ;;  %v7948_v27 = vshll.u32 %v6329_v16, 16 }
  0x6b   : > { %5248 = vmatprep.subr.bf16.mxu0 %v5699_v51  ;;  %5062 = vmatprep.mubr.bf16.mxu1 %v1135_v34  ;;  %v6387_v34 = vshll.u32 %v6201_v43, 16  ;;  %v6399_v28 = vsel %vm1100_vm3, %v1152_v20, %v1161_v40 }
  0x6c   : > { %v1170_v59 = vor.u32 %v1169_v53, %v1166_v41  ;;  %5085 = vmatpush3.bf16.msra.mxu1 %v5702_v17  ;;  %v6395_v41 = vor.u32 %v1446_v62, %v1445_v3  ;;  %v5706_v17 = vld [vmem:[%s7884_s3 + $0x1b0] sm:$0xff]   ;;  %v6421_v3 = vld [vmem:[#allocation2 + $0x20] sm:$0xff]  ;;  %v1193_v62 = vrot.slane %v6302_v29, 3  ;;  %v2739_v8 = vrot.slane %v7948_v27, 4 }
  0x6d   : > { %5086 = vmatprep.subr.bf16.mxu1 %v5703_v42  ;;  %v2273_v25 = vld [vmem:[#allocation2 + $0x70] sm:$0x1] }
  0x6e   : > { %5249 = vmatpush3.bf16.msra.mxu0 %v5699_v51  ;;  %v1178_v51 = vrot.slane %v6133_v39, 4  ;;  %v6409_v63 = vsel %vm1100_vm3, %v1161_v40, %v1170_v59  ;;  %v1454_v40 = vrot.slane %v6087_v5, 5  ;;  %v5707_v5 = vld [vmem:[%s7884_s3 + $0xa0] sm:$0xff]  }
  0x6f   : > { %5250 = vmatprep.subr.bf16.mxu0 %v5701_v0 }
  0x70   : > { %v1179_v53 = vor.u32 %v1178_v51, %v1175_v30  ;;  %v2367_v30 = vsel %vm2291_vm2, %v2362_v10, %v2366_v2  ;;  %v2370_v51 = vor.u32 %v2366_v2, %v6299_v52  ;;  %5087 = vmatpush3.bf16.msra.mxu1 %v5703_v42  ;;  %v2636_v42 = vshrl.u32 %v2605_v56, 16 }
  0x71   : > { %5227 = vmatmul.mubr.bf16.gmra.mrb[8].mxu0 %v2343_v24  ;;  %v1144_v24 = vsel %vm1100_vm3, %v6319_v33, %v1143_v38  ;;  %v5705_v33 = vld [vmem:[%s7884_s3 + $0x98] sm:$0xff]   ;;  %v2639_v10 = vshll.u32 %v2605_v56, 16 }
  0x72   : > { %5230 = vmatprep.mubr.bf16.mxu0 %v2351_v4  ;;  %5251 = vmatpush3.bf16.msra.mxu0 %v5701_v0  ;;  %v1153_v4 = vsel %vm1100_vm3, %v1143_v38, %v1152_v20  ;;  %v2359_v0 = vsel %vm2291_vm2, %v2354_v50, %v2358_v48  ;;  %v2374_v38 = vrot.slane %v6346_v32, 1  ;;  %v6414_v20 = vsel %vm1424_vm5, %v1443_v58, %v6395_v41 }
  0x73   : > { %5252 = vmatprep.subr.bf16.mxu0 %v5704_v61  ;;  %v1453_v48 = vrot.slane %v6067_v57, 4  ;;  %5063 = vmatmul.mubr.bf16.gmra.mrb[4].mxu1 %v1144_v24  ;;  %v6419_v50 = vor.u32 %v1187_v22, %v1184_v49  ;;  %v1196_v58 = vrot.slane %v6313_v47, 4  ;;  %v2382_v24 = vrot.slane %v6387_v34, 1 }
  0x74   : > { %5066 = vmatprep.mubr.bf16.mxu1 %v1153_v4  ;;  %v2378_v35 = vor.u32 %v2374_v38, %v6337_v9  ;;  %v6432_v2 = vsel %vm1100_vm3, %v1170_v59, %v1179_v53  ;;  %5088 = vmatprep.subr.bf16.mxu1 %v5705_v33  ;;  %v1457_v22 = vrot.slane %v6091_v7, 4  ;;  %v1461_v59 = vrot.slane %v6115_v31, 4 }
  0x75   : > { %v6437_v49 = vor.u32 %v1454_v40, %v1453_v48  ;;  %v2375_v23 = vsel %vm2291_vm2, %v2370_v51, %v2374_v38  ;;  %v6446_v13 = vsel %vm1100_vm3, %v1179_v53, %v6419_v50  ;;  %v7898_v48 = vshll.u32 %v6421_v3, 16  ;;  %5089 = vmatpush3.bf16.msra.mxu1 %v5705_v33  ;;  %v5708_v53 = vld [vmem:[%s7884_s3 + $0xa8] sm:$0xff]   ;;  %v6467_v51 = vld [vmem:[#allocation2 + $0x78] sm:$0xf] }
  0x76   : > { %5253 = vmatpush3.bf16.msra.mxu0 %v5704_v61  ;;  %v5709_v61 = vld [vmem:[%s7884_s3 + $0x1b8] sm:$0xff]   ;;  %v1462_v40 = vrot.slane %v6133_v39, 5  ;;  %v2383_v56 = vsel %vm2291_vm2, %v2378_v35, %v2382_v24  ;;  %v1459_v4 = vor.u32 %v1458_v1, %v1457_v22  ;;  %5090 = vmatprep.subr.bf16.mxu1 %v5707_v5  ;;  %v2386_v38 = vor.u32 %v2382_v24, %v6356_v14  ;;  %v6463_v35 = vld [vmem:[%s7884_s3 + $0x1c0] sm:$0xff]   ;;  %v6471_v22 = vld [vmem:[#allocation2 + $0x28] sm:$0xff] }
  0x77   : > { %5254 = vmatprep.subr.bf16.mxu0 %v5706_v17  ;;  %7944 = vst [vmem:[#allocation13_spill] sm:$0xff] %v6467_v51  ;;  %v2638_v1 = vrot.slane %v2636_v42, 3  ;;  %v2388_v39 = vshll.u32 %v2273_v25, 16  ;;  %v2743_v25 = vshrl.u32 %v6467_v51, 16  ;;  %v2746_v31 = vshll.u32 %v6467_v51, 16 }
  0x78   : > { %v6465_v33 = vor.u32 %v1462_v40, %v1461_v59  ;;  %v2649_v59 = vrot.slane %v7898_v48, 4  ;;  %v6480_v40 = vld [vmem:[#allocation2 + $0x30] sm:$0xff]  ;;  %v7949_v36 = vshrl.u32 %v6471_v22, 16 }
  0x79   : > { %5231 = vmatmul.mubr.bf16.gmra.mrb[12].mxu0 %v2359_v0  ;;  %v6450_v0 = vor.u32 %v1196_v58, %v1193_v62  ;;  %v2641_v62 = vrot.slane %v2639_v10, 4  ;;  %v7945_v58 = vshrl.u32 %v6421_v3, 16  ;;  %5091 = vmatpush3.bf16.msra.mxu1 %v5707_v5  ;;  %v5710_v48 = vld [vmem:[%s7884_s3 + $0xb0] sm:$0xff]   ;;  %v2665_v10 = vshll.u32 %v6480_v40, 16 }
  0x7a   : > { %5234 = vmatprep.mubr.bf16.mxu0 %v2367_v30  ;;  %5255 = vmatpush3.bf16.msra.mxu0 %v5706_v17  ;;  %v1205_v17 = vrot.slane %v6305_v44, 4  ;;  %7943 = vst [vmem:[#allocation12_spill] sm:$0xff] %v6465_v33  ;;  %v6475_v30 = vsel %vm1424_vm5, %v6437_v49, %v1459_v4  ;;  %v6484_v42 = vsel %vm1424_vm5, %v1459_v4, %v6465_v33  ;;  %v2390_v4 = vrot.slane %v2388_v39, 1  ;;  %v6506_v33 = vld [vmem:[#allocation2 + $0x38] sm:$0xff] }
  0x7b   : > { %5256 = vmatprep.subr.bf16.mxu0 %v5709_v61  ;;  %v2646_v24 = vrot.slane %v7945_v58, 3  ;;  %5067 = vmatmul.mubr.bf16.gmra.mrb[8].mxu1 %v6399_v28  ;;  %7946 = vst [vmem:[#allocation14_spill] sm:$0xff] %v6484_v42  ;;  %v2727_v58 = vrot.slane %v6356_v14, 3  ;;  %v2730_v28 = vrot.slane %v6387_v34, 4  ;;  %v2745_v42 = vrot.slane %v2743_v25, 3 }
  0x7c   : > { %5070 = vmatprep.mubr.bf16.mxu1 %v6409_v63  ;;  %5092 = vmatprep.subr.bf16.mxu1 %v5708_v53  ;;  %v7947_v63 = vshrl.u32 %v6329_v16, 16  ;;  %v2642_v44 = vor.u32 %v2641_v62, %v2638_v1  ;;  %v2748_v47 = vrot.slane %v2746_v31, 4  ;;  %v2655_v27 = vrot.slane %v7949_v36, 3  ;;  %v5712_v1 = vld [vmem:[%s7884_s3 + $0xb8] sm:$0xff]  }
  0x7d   : > { %5093 = vmatpush3.bf16.msra.mxu1 %v5708_v53  ;;  %v6509_v51 = vor.u32 %v2730_v28, %v2727_v58  ;;  %v1429_v31 = vshll.u32 %v6061_v54, 16  ;;  %v7951_v62 = vshrl.u32 %v6480_v40, 16  ;;  %v2391_v36 = vsel %vm2291_vm2, %v2386_v38, %v2390_v4 }
  0x7e   : > { %5257 = vmatpush3.bf16.msra.mxu0 %v5709_v61  ;;  %v2736_v5 = vrot.slane %v7947_v63, 3  ;;  %v1212_v61 = vshll.u32 %v6257_v45, 16  ;;  %v2650_v63 = vor.u32 %v2649_v59, %v2646_v24  ;;  %5094 = vmatprep.subr.bf16.mxu1 %v5710_v48  ;;  %v2749_v53 = vor.u32 %v2748_v47, %v2745_v42 }
  0x7f   : > { %5282 = vmatprep.subr.bf16.mxu0 %v6463_v35  ;;  %v2664_v24 = vrot.slane %v7951_v62, 3  ;;  %v2671_v59 = vshrl.u32 %v6506_v33, 16  ;;  %v2667_v58 = vrot.slane %v2665_v10, 4  ;;  %v7952_v42 = vrot.slane %v6299_v52, 3 }
  0x80   : > { %v2740_v29 = vor.u32 %v2739_v8, %v2736_v5  ;;  %v2651_v25 = vsel %vm1100_vm3, %v2642_v44, %v2650_v63  ;;  %v7953_v38 = vrot.slane %v5966_v55, 7  ;;  %v6555_v44 = vld [vmem:[%s7884_s3 + $0xc0] sm:$0xff]   ;;  %v1431_v55 = vrot.slane %v1429_v31, 5 }
  0x81   : > { %5235 = vmatmul.mubr.bf16.gmra.mrb[16].mxu0 %v2375_v23  ;;  %v1426_v23 = vshrl.u32 %v6061_v54, 16  ;;  %v2674_v54 = vshll.u32 %v6506_v33, 16  ;;  %v6537_v28 = vor.u32 %v1205_v17, %v7952_v42  ;;  %5095 = vmatpush3.bf16.msra.mxu1 %v5710_v48  ;;  %v7955_v17 = vshrl.u32 %v6028_v26, 16 }
  0x82   : > { %5238 = vmatprep.mubr.bf16.mxu0 %v2383_v56  ;;  %v7950_v56 = vshll.u32 %v6471_v22, 16  ;;  %v6524_v8 = vsel %vm1100_vm3, %v6509_v51, %v2740_v29  ;;  %v6532_v47 = vsel %vm1100_vm3, %v2740_v29, %v2749_v53  ;;  %v6546_v4 = vsel %vm1729_vm6, %v7953_v38, %v6383_v19  ;;  %5096 = vmatprep.subr.bf16.mxu1 %v5712_v1 }
  0x83   : > { %5071 = vmatmul.mubr.bf16.gmra.mrb[12].mxu1 %v6432_v2  ;;  %v6540_v2 = vld [vmem:[#allocation2 + $0x40] sm:$0xff]  ;;  %v7954_v29 = vshrl.u32 %v6257_v45, 16  ;;  %v1433_v53 = vrot.slane %v7955_v17, 4  ;;  %v7956_v19 = vshll.u32 %v6028_v26, 16  ;;  %v2673_v45 = vrot.slane %v2671_v59, 3 }
  0x84   : > { %v2658_v39 = vrot.slane %v7950_v56, 4  ;;  %5074 = vmatprep.mubr.bf16.mxu1 %v6446_v13  ;;  %v1214_v56 = vrot.slane %v1212_v61, 4  ;;  %v1428_v13 = vrot.slane %v1426_v23, 4  ;;  %v2668_v61 = vor.u32 %v2667_v58, %v2664_v24 }
  0x85   : > { %v1211_v5 = vrot.slane %v7954_v29, 3  ;;  %v1434_v62 = vrot.slane %v7956_v19, 5  ;;  %v2676_v23 = vrot.slane %v2674_v54, 4  ;;  %v7912_v42 = vshrl.u32 %v6540_v2, 16  ;;  %5097 = vmatpush3.bf16.msra.mxu1 %v5712_v1 }
  0x86   : > { %v2659_v48 = vor.u32 %v2658_v39, %v2655_v27  ;;  %v7957_v38 = vrot.slane %v6067_v57, 7  ;;  %v6573_v26 = vsel %vm1100_vm3, %v6419_v50, %v6450_v0  ;;  %v7911_v27 = vshll.u32 %v6540_v2, 16  ;;  %5122 = vmatprep.subr.bf16.mxu1 %v6555_v44 }
  0x87   : > { %v7958_v39 = vrot.slane %v6091_v7, 7  ;;  %v6585_v57 = vsel %vm1100_vm3, %v6450_v0, %v6537_v28  ;;  %v7909_v24 = vrot.slane %v6188_v12, 4  ;;  %v3014_v1 = vrot.slane %v6201_v43, 4 }
  0x88   : > { %v2660_v58 = vsel %vm1100_vm3, %v2650_v63, %v2659_v48  ;;  %v1435_v29 = vor.u32 %v1434_v62, %v1433_v53  ;;  %v7910_v7 = vrot.slane %v6329_v16, 4  ;;  %v2677_v17 = vor.u32 %v2676_v23, %v2673_v45  ;;  %v5713_v63 = vld [vmem:[%s7884_s3 + $0x1c8] sm:$0xff]  }
  0x89   : > { %5239 = vmatmul.mubr.bf16.gmra.mrb[20].mxu0 %v2391_v36  ;;  %v6568_v36 = vsel %vm1729_vm6, %v7957_v38, %v6126_v6  ;;  %v6580_v31 = vsel %vm1729_vm6, %v7958_v39, %v6139_v11  ;;  %v1215_v6 = vor.u32 %v1214_v56, %v1211_v5  ;;  %v2669_v11 = vsel %vm1100_vm3, %v2659_v48, %v2668_v61  ;;  %v6596_v5 = vld [vmem:[#allocation2 + $0x18] sm:$0xf0] }
  0x8a   : > { %5258 = vmatprep.mubr.bf16.mxu0 %v2651_v25  ;;  %v1432_v25 = vor.u32 %v1431_v55, %v1428_v13  ;;  %v2682_v0 = vrot.slane %v7912_v42, 3  ;;  %v6601_v43 = vsel %vm527_vm1, %v7909_v24, %v3014_v1  ;;  %v2685_v56 = vrot.slane %v7911_v27, 4 }
  0x8b   : > { %5075 = vmatmul.mubr.bf16.gmra.mrb[16].mxu1 %v6573_v26  ;;  %v6612_v13 = vsel %vm527_vm1, %v3014_v1, %v7910_v7  ;;  %v3252_v53 = vshrl.u32 %v6596_v5, 16  ;;  %v3255_v48 = vshll.u32 %v6596_v5, 16  ;;  %v7959_v55 = vshrl.u32 %v6421_v3, 16 }
  0x8c   : > { %5078 = vmatprep.mubr.bf16.mxu1 %v6585_v57  ;;  %v7960_v62 = vshll.u32 %v6421_v3, 16  ;;  %v7961_v23 = vshrl.u32 %v6471_v22, 16  ;;  %v1216_v39 = vsel %vm1100_vm3, %v6537_v28, %v1215_v6  ;;  %v7962_v7 = vshll.u32 %v6471_v22, 16  ;;  %v5714_v6 = vld [vmem:[%s7884_s3 + $0x1d0] sm:$0xff]  }
  0x8d   : > { %v3259_v19 = vrot.slane %v7959_v55, 4  ;;  %v3254_v24 = vrot.slane %v3252_v53, 4  ;;  %v3257_v1 = vrot.slane %v3255_v48, 5  ;;  %v1436_v42 = vsel %vm1424_vm5, %v1432_v25, %v1435_v29 }
  0x8e   : > { %v3260_v45 = vrot.slane %v7960_v62, 5  ;;  %v3263_v38 = vrot.slane %v7961_v23, 4  ;;  %v3264_v27 = vrot.slane %v7962_v7, 5  ;;  %v1440_v55 = vsel %vm1424_vm5, %v1435_v29, %v6358_v60 }
  0x8f   : > { %v2678_v23 = vsel %vm1100_vm3, %v2668_v61, %v2677_v17  ;;  %v3258_v53 = vor.u32 %v3257_v1, %v3254_v24  ;;  %v3279_v7 = vrot.slane %v6290_v15, 4  ;;  %v3268_v60 = vrot.slane %v2665_v10, 5 }
  0x90   : > { %v3261_v62 = vor.u32 %v3260_v45, %v3259_v19  ;;  %v3265_v48 = vor.u32 %v3264_v27, %v3263_v38  ;;  %v3271_v24 = vrot.slane %v2671_v59, 4  ;;  %v1449_v27 = vrot.slane %v6223_v37, 4  ;;  %v5715_v19 = vld [vmem:[%s7884_s3 + $0x1d8] sm:$0xff]  }
  0x91   : > { %5259 = vmatmul.mubr.bf16.vlgmr.msra.gmra.mrb[0].mxu0 %v2660_v58  ;;  %v2686_v58 = vor.u32 %v2685_v56, %v2682_v0  ;;  %v3272_v56 = vrot.slane %v2674_v54, 5  ;;  %v3295_v45 = vrot.slane %v6356_v14, 4  ;;  %v3296_v59 = vrot.slane %v6387_v34, 5  ;;  %v3233_v38 = vld [vmem:[#allocation2 + $0x78] sm:$0x1f] }
  0x92   : > { %5283 = vmatpush3.bf16.msra.mxu0 %v6463_v35  ;;  %5262 = vmatprep.mubr.bf16.mxu0 %v2669_v11  ;;  %v7963_v35 = vshrl.u32 %v6480_v40, 16  ;;  %v6640_v29 = vsel %vm1424_vm5, %v3258_v53, %v3261_v62  ;;  %v6643_v61 = vsel %vm1424_vm5, %v3261_v62, %v3265_v48  ;;  %v3280_v11 = vrot.slane %v6296_v18, 5 }
  0x93   : > { %5284 = vmatprep.subr.bf16.mxu0 %v5713_v63  ;;  %5079 = vmatmul.mubr.bf16.gmra.mrb[20].mxu1 %v1216_v39  ;;  %v2687_v10 = vsel %vm1100_vm3, %v2677_v17, %v2686_v58  ;;  %v3273_v39 = vor.u32 %v3272_v56, %v3271_v24  ;;  %v7964_v1 = vshrl.u32 %v6540_v2, 16  ;;  %v7966_v53 = vshrl.u32 %v6329_v16, 16 }
  0x94   : > { %v3267_v25 = vrot.slane %v7963_v35, 4  ;;  %5098 = vmatprep.mubr.bf16.mxu1 %v1436_v42  ;;  %v7965_v42 = vshll.u32 %v6540_v2, 16  ;;  %v6664_v17 = vor.u32 %v3280_v11, %v3279_v7  ;;  %v3304_v56 = vshrl.u32 %v3233_v38, 16  ;;  %v5717_v11 = vld [vmem:[%s7884_s3 + $0x1e0] sm:$0xff]  }
  0x95   : > { %v3275_v54 = vrot.slane %v7964_v1, 4  ;;  %v3299_v35 = vrot.slane %v7966_v53, 4  ;;  %v3307_v1 = vshll.u32 %v3233_v38, 16  ;;  %v2718_v53 = vrot.slane %v6337_v9, 3 }
  0x96   : > { %5285 = vmatpush3.bf16.msra.mxu0 %v5713_v63  ;;  %v3269_v0 = vor.u32 %v3268_v60, %v3267_v25  ;;  %v3276_v62 = vrot.slane %v7965_v42, 5  ;;  %v7967_v25 = vshll.u32 %v6329_v16, 16  ;;  %v1450_v42 = vrot.slane %v6231_v46, 5 }
  0x97   : > { %5286 = vmatprep.subr.bf16.mxu0 %v5714_v6  ;;  %v3306_v38 = vrot.slane %v3304_v56, 4 }
  0x98   : > { %v6658_v63 = vsel %vm1424_vm5, %v3265_v48, %v3269_v0  ;;  %v3300_v60 = vrot.slane %v7967_v25, 5  ;;  %v6671_v48 = vsel %vm1424_vm5, %v3269_v0, %v3273_v39  ;;  %v3277_v24 = vor.u32 %v3276_v62, %v3275_v54 }
  0x99   : > { %5263 = vmatmul.mubr.bf16.gmra.mrb[4].mxu0 %v2678_v23  ;;  %v6674_v23 = vor.u32 %v3296_v59, %v3295_v45  ;;  %v3309_v54 = vrot.slane %v3307_v1, 5  ;;  %v2696_v59 = vsel %vm1100_vm3, %v2686_v58, %v6419_v50  ;;  %v1451_v25 = vor.u32 %v1450_v42, %v1449_v27  ;;  %v5719_v50 = vld [vmem:[%s7884_s3 + $0xd0] sm:$0xff]   ;;  %v5721_v58 = vld [vmem:[%s7884_s3 + $0xd8] sm:$0xff]   ;;  %v7969_v1 = vld [vmem:[#allocation11_spill] sm:$0xff] }
  0x9a   : > { %5287 = vmatpush3.bf16.msra.mxu0 %v5714_v6  ;;  %5266 = vmatprep.mubr.bf16.mxu0 %v2687_v10  ;;  %v3301_v7 = vor.u32 %v3300_v60, %v3299_v35  ;;  %v5718_v6 = vld [vmem:[%s7884_s3 + $0xc8] sm:$0xff]   ;;  %v6683_v0 = vsel %vm1424_vm5, %v3273_v39, %v3277_v24  ;;  %v6687_v10 = vsel %vm1424_vm5, %v3277_v24, %v6664_v17  ;;  %v2721_v35 = vrot.slane %v6346_v32, 4  ;;  %v5722_v27 = vld [vmem:[%s7884_s3 + $0x1f0] sm:$0xff]   ;;  %v6735_v60 = vld [vmem:[%s7884_s3 + $0x200] sm:$0xff]  }
  0x9b   : > { %5288 = vmatprep.subr.bf16.mxu0 %v5715_v19  ;;  %5099 = vmatmul.mubr.bf16.vlgmr.msra.gmra.mrb[0].mxu1 %v1440_v55  ;;  %v3310_v62 = vor.u32 %v3309_v54, %v3306_v38  ;;  %v5720_v39 = vld [vmem:[%s7884_s3 + $0x1e8] sm:$0xff]   ;;  %v7968_v24 = vld [vmem:[#allocation9_spill] sm:$0xff]  ;;  %v1470_v42 = vrot.slane %v7969_v1, 5  ;;  %v7971_v38 = vld [vmem:[#allocation10_spill] sm:$0xff] }
  0x9c   : > { %v6691_v45 = vsel %vm1424_vm5, %v6674_v23, %v3301_v7  ;;  %5102 = vmatprep.mubr.bf16.mxu1 %v6393_v21  ;;  %5123 = vmatpush3.bf16.msra.mxu1 %v6555_v44  ;;  %v2722_v21 = vor.u32 %v2721_v35, %v2718_v53  ;;  %v1452_v44 = vsel %vm1424_vm5, %v6395_v41, %v1451_v25  ;;  %v5725_v41 = vld [vmem:[%s7884_s3 + $0x1f8] sm:$0xff]   ;;  %v1469_v56 = vrot.slane %v7968_v24, 4 }
  0x9d   : > { %5124 = vmatprep.subr.bf16.mxu1 %v5718_v6  ;;  %v6706_v55 = vsel %vm1424_vm5, %v3301_v7, %v3310_v62  ;;  %v7970_v7 = vld [vmem:[#allocation12_spill] sm:$0xff]  ;;  %v1474_v54 = vrot.slane %v7971_v38, 5  ;;  %v7972_v62 = vld [vmem:[#allocation14_spill] sm:$0xff] }
  0x9e   : > { %5289 = vmatpush3.bf16.msra.mxu0 %v5715_v19  ;;  %v5723_v19 = vld [vmem:[%s7884_s3 + $0xe0] sm:$0xff]  }
  0x9f   : > { %5290 = vmatprep.subr.bf16.mxu0 %v5717_v11 }
  0xa0   : > { %5125 = vmatpush3.bf16.msra.mxu1 %v5718_v6  ;;  %v1473_v6 = vrot.slane %v6299_v52, 4 }
  0xa1   : > { %5267 = vmatmul.mubr.bf16.gmra.mrb[8].mxu0 %v2696_v59  ;;  %5126 = vmatprep.subr.bf16.mxu1 %v5719_v50  ;;  %v1406_v59 = vld [vmem:[#allocation2 + $0x60] sm:$0x1f] }
  0xa2   : > { %5270 = vmatprep.mubr.bf16.mxu0 %v6573_v26  ;;  %5291 = vmatpush3.bf16.msra.mxu0 %v5717_v11  ;;  %v2723_v26 = vsel %vm1100_vm3, %v6537_v28, %v2722_v21  ;;  %v5724_v28 = vld [vmem:[%s7884_s3 + $0xe8] sm:$0xff]   ;;  %v1468_v11 = vsel %vm1424_vm5, %v7970_v7, %v6664_v17  ;;  %v6759_v35 = vor.u32 %v1474_v54, %v1473_v6  ;;  %v5737_v6 = vld [vmem:[#allocation2 + $0x50] sm:$0xff] }
  0xa3   : > { %5292 = vmatprep.subr.bf16.mxu0 %v5720_v39  ;;  %5103 = vmatmul.mubr.bf16.gmra.mrb[4].mxu1 %v6414_v20  ;;  %v1456_v20 = vsel %vm1424_vm5, %v1451_v25, %v6437_v49  ;;  %v5726_v49 = vld [vmem:[%s7884_s3 + $0xf0] sm:$0xff]   ;;  %v1699_v25 = vld [vmem:[#allocation2 + $0x8] sm:$0x80]  ;;  %v3008_v54 = vrot.slane %v5737_v6, 4 }
  0xa4   : > { %5106 = vmatprep.mubr.bf16.mxu1 %v1452_v44  ;;  %5127 = vmatpush3.bf16.msra.mxu1 %v5719_v50  ;;  %v2998_v50 = vrot.slane %v6471_v22, 4  ;;  %v5736_v7 = vld [vmem:[#allocation2 + $0x48] sm:$0xff] }
  0xa5   : > { %5128 = vmatprep.subr.bf16.mxu1 %v5721_v58 }
  0xa6   : > { %5293 = vmatpush3.bf16.msra.mxu0 %v5720_v39  ;;  %v1478_v39 = vshrl.u32 %v1406_v59, 16 }
  0xa7   : > { %5294 = vmatprep.subr.bf16.mxu0 %v5722_v27 }
  0xa8   : > { %5129 = vmatpush3.bf16.msra.mxu1 %v5721_v58  ;;  %v1480_v44 = vrot.slane %v1478_v39, 4  ;;  %v5732_v39 = vld [vmem:[%s7884_s3 + $0x220] sm:$0xff]  }
  0xa9   : > { %5271 = vmatmul.mubr.bf16.gmra.mrb[12].mxu0 %v6585_v57  ;;  %5130 = vmatprep.subr.bf16.mxu1 %v5723_v19  ;;  %v2732_v57 = vsel %vm1100_vm3, %v2722_v21, %v6509_v51  ;;  %v2995_v51 = vrot.slane %v6596_v5, 4  ;;  %v1471_v5 = vor.u32 %v1470_v42, %v1469_v56  ;;  %v7973_v56 = vld [vmem:[#allocation3_spill] sm:$0xff] }
  0xaa   : > { %5274 = vmatprep.mubr.bf16.mxu0 %v2723_v26  ;;  %5295 = vmatpush3.bf16.msra.mxu0 %v5722_v27  ;;  %v3000_v27 = vrot.slane %v6480_v40, 4 }
  0xab   : > { %5296 = vmatprep.subr.bf16.mxu0 %v5725_v41  ;;  %5107 = vmatmul.mubr.bf16.gmra.mrb[8].mxu1 %v1456_v20  ;;  %v6765_v21 = vsel %vm1424_vm5, %v6664_v17, %v1471_v5  ;;  %v6770_v26 = vsel %vm1424_vm5, %v1471_v5, %v6759_v35  ;;  %v5729_v17 = vld [vmem:[%s7884_s3 + $0x208] sm:$0xff]   ;;  %v3002_v20 = vrot.slane %v6506_v33, 4 }
  0xac   : > { %5110 = vmatprep.mubr.bf16.mxu1 %v6475_v30  ;;  %5131 = vmatpush3.bf16.msra.mxu1 %v5723_v19  ;;  %v2996_v30 = vrot.slane %v6421_v3, 4  ;;  %v1481_v3 = vshll.u32 %v1406_v59, 16  ;;  %v3001_v40 = vsel %vm527_vm1, %v2998_v50, %v3000_v27  ;;  %v7974_v59 = vld [vmem:[#allocation5_spill] sm:$0xff] }
  0xad   : > { %5132 = vmatprep.subr.bf16.mxu1 %v5724_v28 }
  0xae   : > { %5297 = vmatpush3.bf16.msra.mxu0 %v5725_v41  ;;  %v2997_v53 = vsel %vm527_vm1, %v2995_v51, %v2996_v30  ;;  %v1483_v58 = vrot.slane %v1481_v3, 5  ;;  %v1731_v41 = vshrl.u32 %v1699_v25, 16  ;;  %v2999_v22 = vsel %vm527_vm1, %v2996_v30, %v2998_v50  ;;  %v5731_v30 = vld [vmem:[%s7884_s3 + $0x218] sm:$0xff]   ;;  %v5733_v25 = vld [vmem:[%s7884_s3 + $0x228] sm:$0xff]  }
  0xaf   : > { %5322 = vmatprep.subr.bf16.mxu0 %v6735_v60  ;;  %v3003_v51 = vsel %vm527_vm1, %v3000_v27, %v3002_v20  ;;  %v5738_v50 = vld [vmem:[#allocation2 + $0x58] sm:$0xff] }
  0xb0   : > { %5133 = vmatpush3.bf16.msra.mxu1 %v5724_v28  ;;  %v1733_v19 = vrot.slane %v1731_v41, 7  ;;  %v5734_v41 = vld [vmem:[%s7884_s3 + $0x230] sm:$0xff]  }
  0xb1   : > { %5275 = vmatmul.mubr.bf16.gmra.mrb[16].mxu0 %v2732_v57  ;;  %5134 = vmatprep.subr.bf16.mxu1 %v5726_v49  ;;  %v5730_v57 = vld [vmem:[%s7884_s3 + $0x210] sm:$0xff]  }
  0xb2   : > { %5278 = vmatprep.mubr.bf16.mxu0 %v6524_v8  ;;  %v5728_v8 = vld [vmem:[%s7884_s3 + $0xf8] sm:$0xff]   ;;  %v1741_v42 = vsel %vm1729_vm6, %v1733_v19, %v7973_v56  ;;  %v1793_v19 = vrot.slane %v6290_v15, 7  ;;  %v7981_v15 = vld [vmem:[#allocation13_spill] sm:$0xff] }
  0xb3   : > { %5111 = vmatmul.mubr.bf16.gmra.mrb[12].mxu1 %v7972_v62 }
  0xb4   : > { %5114 = vmatprep.mubr.bf16.mxu1 %v1468_v11  ;;  %5135 = vmatpush3.bf16.msra.mxu1 %v5726_v49  ;;  %v3004_v49 = vrot.slane %v6540_v2, 4  ;;  %v3006_v2 = vrot.slane %v5736_v7, 4  ;;  %v1761_v11 = vrot.slane %v6223_v37, 7 }
  0xb5   : > { %5136 = vmatprep.subr.bf16.mxu1 %v5728_v8 }
  0xb6   : > { %v3005_v33 = vsel %vm527_vm1, %v3002_v20, %v3004_v49  ;;  %v3007_v3 = vsel %vm527_vm1, %v3004_v49, %v3006_v2  ;;  %v3009_v37 = vsel %vm527_vm1, %v3006_v2, %v3008_v54  ;;  %v1801_v20 = vrot.slane %v7968_v24, 7  ;;  %v7982_v49 = vld [vmem:[#allocation7_spill] sm:$0xff] }
  0xb7   : > { %v1809_v24 = vrot.slane %v6299_v52, 7  ;;  %v7983_v56 = vrot.slane %v7982_v49, 7 }
  0xb8   : > { %5137 = vmatpush3.bf16.msra.mxu1 %v5728_v8  ;;  %v7975_v8 = vld [vmem:[#allocation8_spill] sm:$0xff] }
  0xb9   : > { %5279 = vmatmul.mubr.bf16.gmra.mrb[20].mxu0 %v6532_v47  ;;  %5362 = vmatprep.subr.bf16.mxu1 %v6735_v60  ;;  %v1484_v47 = vor.u32 %v1483_v58, %v1480_v44  ;;  %v7976_v62 = vrot.slane %v7975_v8, 7  ;;  %v7977_v44 = vld [vmem:[#allocation4_spill] sm:$0xff] }
  0xba   : > { %5298 = vmatprep.mubr.bf16.mxu0 %v2997_v53  ;;  %v1764_v53 = vor.u32 %v6231_v46, %v1761_v11  ;;  %v7978_v58 = vrot.slane %v7977_v44, 7 }
  0xbb   : > { %5115 = vmatmul.mubr.bf16.gmra.mrb[16].mxu1 %v6765_v21  ;;  %v1485_v28 = vsel %vm1424_vm5, %v6759_v35, %v1484_v47  ;;  %v1757_v5 = vsel %vm1729_vm6, %v7976_v62, %v7974_v59  ;;  %v7980_v47 = vrot.slane %v6188_v12, 4  ;;  %v1796_v12 = vor.u32 %v6296_v18, %v1793_v19 }
  0xbc   : > { %5118 = vmatprep.mubr.bf16.mxu1 %v6770_v26  ;;  %v1765_v46 = vsel %vm1729_vm6, %v7978_v58, %v1764_v53  ;;  %v1817_v18 = vrot.slane %v6337_v9, 7 }
  0xbe   : > { %v1820_v52 = vor.u32 %v6346_v32, %v1817_v18 }
  0xc1   : > { %5299 = vmatmul.mubr.bf16.vlgmr.msra.gmra.mrb[0].mxu0 %v2999_v22 }
  0xc2   : > { %5323 = vmatpush3.bf16.msra.mxu0 %v6735_v60  ;;  %5302 = vmatprep.mubr.bf16.mxu0 %v3001_v40 }
  0xc3   : > { %5324 = vmatprep.subr.bf16.mxu0 %v5729_v17  ;;  %5119 = vmatmul.mubr.bf16.gmra.mrb[20].mxu1 %v1485_v28  ;;  %v1804_v28 = vor.u32 %v7969_v1, %v1801_v20  ;;  %v7984_v1 = vrot.slane %v6329_v16, 4 }
  0xc4   : > { %5138 = vmatprep.mubr.bf16.mxu1 %v1741_v42  ;;  %v1825_v42 = vrot.slane %v6356_v14, 7 }
  0xc6   : > { %5325 = vmatpush3.bf16.msra.mxu0 %v5729_v17  ;;  %v1828_v16 = vor.u32 %v6387_v34, %v1825_v42 }
  0xc7   : > { %5326 = vmatprep.subr.bf16.mxu0 %v5730_v57 }
  0xc9   : > { %5303 = vmatmul.mubr.bf16.gmra.mrb[4].mxu0 %v3003_v51 }
  0xca   : > { %5327 = vmatpush3.bf16.msra.mxu0 %v5730_v57  ;;  %5306 = vmatprep.mubr.bf16.mxu0 %v3005_v33  ;;  %v1821_v33 = vsel %vm1729_vm6, %v1809_v24, %v1820_v52 }
  0xcb   : > { %5328 = vmatprep.subr.bf16.mxu0 %v5731_v30  ;;  %5139 = vmatmul.mubr.bf16.vlgmr.msra.gmra.mrb[0].mxu1 %v6546_v4  ;;  %v3010_v4 = vrot.slane %v5738_v50, 4 }
  0xcc   : > { %5142 = vmatprep.mubr.bf16.mxu1 %v1757_v5  ;;  %5370 = vmatpush3.bf16.msra.mxu1 %v6735_v60  ;;  %v7979_v60 = vld [vmem:[#allocation6_spill] sm:$0xff] }
  0xcd   : > { %5363 = vmatprep.subr.bf16.mxu1 %v5729_v17  ;;  %v1773_v27 = vsel %vm1729_vm6, %v1761_v11, %v7979_v60  ;;  %v3011_v22 = vsel %vm527_vm1, %v3008_v54, %v3010_v4  ;;  %v3013_v40 = vsel %vm527_vm1, %v3010_v4, %v7980_v47 }
  0xce   : > { %5329 = vmatpush3.bf16.msra.mxu0 %v5731_v30 }
  0xcf   : > { %5330 = vmatprep.subr.bf16.mxu0 %v5732_v39 }
  0xd0   : > { %5371 = vmatpush3.bf16.msra.mxu1 %v5729_v17  ;;  %v5735_v17 = vld [vmem:[%s7884_s3 + $0x238] sm:$0xff]  }
  0xd1   : > { %5307 = vmatmul.mubr.bf16.gmra.mrb[8].mxu0 %v3007_v3  ;;  %5364 = vmatprep.subr.bf16.mxu1 %v5730_v57 }
  0xd2   : > { %5310 = vmatprep.mubr.bf16.mxu0 %v3009_v37  ;;  %5331 = vmatpush3.bf16.msra.mxu0 %v5732_v39 }
  0xd3   : > { %5332 = vmatprep.subr.bf16.mxu0 %v5733_v25  ;;  %5143 = vmatmul.mubr.bf16.gmra.mrb[4].mxu1 %v1765_v46 }
  0xd4   : > { %5146 = vmatprep.mubr.bf16.mxu1 %v1773_v27  ;;  %5372 = vmatpush3.bf16.msra.mxu1 %v5730_v57  ;;  %v3018_v57 = vrot.slane %v7981_v15, 4 }
  0xd5   : > { %5365 = vmatprep.subr.bf16.mxu1 %v5731_v30 }
  0xd6   : > { %5333 = vmatpush3.bf16.msra.mxu0 %v5733_v25 }
  0xd7   : > { %5334 = vmatprep.subr.bf16.mxu0 %v5734_v41 }
  0xd8   : > { %5373 = vmatpush3.bf16.msra.mxu1 %v5731_v30  ;;  %v3291_v30 = vrot.slane %v6337_v9, 4 }
  0xd9   : > { %5311 = vmatmul.mubr.bf16.gmra.mrb[12].mxu0 %v3011_v22  ;;  %5366 = vmatprep.subr.bf16.mxu1 %v5732_v39 }
  0xda   : > { %5314 = vmatprep.mubr.bf16.mxu0 %v3013_v40  ;;  %5335 = vmatpush3.bf16.msra.mxu0 %v5734_v41 }
  0xdb   : > { %5336 = vmatprep.subr.bf16.mxu0 %v5735_v17  ;;  %5147 = vmatmul.mubr.bf16.gmra.mrb[8].mxu1 %v6568_v36  ;;  %v1797_v36 = vsel %vm1729_vm6, %v7983_v56, %v1796_v12 }
  0xdc   : > { %5150 = vmatprep.mubr.bf16.mxu1 %v6580_v31  ;;  %5374 = vmatpush3.bf16.msra.mxu1 %v5732_v39  ;;  %v1805_v31 = vsel %vm1729_vm6, %v1793_v19, %v1804_v28 }
  0xdd   : > { %5367 = vmatprep.subr.bf16.mxu1 %v5733_v25 }
  0xde   : > { %5337 = vmatpush3.bf16.msra.mxu0 %v5735_v17 }
  0xe0   : > { %5375 = vmatpush3.bf16.msra.mxu1 %v5733_v25 }
  0xe1   : > { %5315 = vmatmul.mubr.bf16.gmra.mrb[16].mxu0 %v6601_v43  ;;  %5368 = vmatprep.subr.bf16.mxu1 %v5734_v41  ;;  %v3019_v43 = vsel %vm527_vm1, %v7984_v1, %v3018_v57 }
  0xe2   : > { %5318 = vmatprep.mubr.bf16.mxu0 %v6612_v13  ;;  %v1812_v13 = vor.u32 %v7971_v38, %v1809_v24  ;;  %v1829_v38 = vsel %vm1729_vm6, %v1817_v18, %v1828_v16 }
  0xe3   : > { %5151 = vmatmul.mubr.bf16.gmra.mrb[12].mxu1 %v1797_v36 }
  0xe4   : > { %5154 = vmatprep.mubr.bf16.mxu1 %v1805_v31  ;;  %5376 = vmatpush3.bf16.msra.mxu1 %v5734_v41  ;;  %v1813_v51 = vsel %vm1729_vm6, %v1801_v20, %v1812_v13 }
  0xe5   : > { %5369 = vmatprep.subr.bf16.mxu1 %v5735_v17 }
  0xe8   : > { %5377 = vmatpush3.bf16.msra.mxu1 %v5735_v17 }
  0xe9   : > { %5319 = vmatmul.mubr.bf16.gmra.mrb[20].mxu0 %v3019_v43 }
  0xea   : > { %5338 = vmatprep.mubr.bf16.mxu0 %v6640_v29  ;;  %v3292_v29 = vrot.slane %v6346_v32, 5  ;;  %v471_v32 = vlaneseq }
  0xeb   : > { %5155 = vmatmul.mubr.bf16.gmra.mrb[16].mxu1 %v1813_v51 }
  0xec   : > { %5158 = vmatprep.mubr.bf16.mxu1 %v1821_v33  ;;  %v3293_v14 = vor.u32 %v3292_v29, %v3291_v30 }
  0xee   : > { %v3294_v34 = vsel %vm1424_vm5, %v6759_v35, %v3293_v14  ;;  %v3298_v9 = vsel %vm1424_vm5, %v3293_v14, %v6674_v23 }
  0xf1   : > { %5339 = vmatmul.mubr.bf16.vlgmr.msra.gmra.mrb[0].mxu0 %v6643_v61  ;;  %v6867_v61 = vshrl.u32 %v471_v32, 7 }
  0xf2   : > { %5342 = vmatprep.mubr.bf16.mxu0 %v6658_v63 }
  0xf3   : > { %5159 = vmatmul.mubr.bf16.gmra.mrb[20].mxu1 %v1829_v38  ;;  %v474_v63 = vadd.s32 16, %v6867_v61  ;;  %v473_v23 = vadd.s32 8, %v6867_v61  ;;  %v3536_v2 = vadd.s32 112, %v6867_v61  ;;  %v3534_v54 = vadd.s32 96, %v6867_v61 }
  0xf4   : > { %5350 = vmatprep.mubr.bf16.mxu1 %v6765_v21  ;;  %v6874_v35 = vmul.u32.u64.low 2863311531, %v6867_v61  ;;  %v6875_v21 = vmul.u32.u64.high 2863311531, %v6867_v61, %v6874_v35  ;;  %v3537_v62 = vadd.s32 120, %v6867_v61  ;;  %v6907_v60 = vadd.s32 48, %v6867_v61 }
  0xf5   : > { %v6889_v59 = vmul.u32.u64.low 2863311531, %v3536_v2  ;;  %v6890_v8 = vmul.u32.u64.high 2863311531, %v3536_v2, %v6889_v59  ;;  %v6895_v37 = vmul.u32.u64.low 2863311531, %v3534_v54  ;;  %v6896_v25 = vmul.u32.u64.high 2863311531, %v3534_v54, %v6895_v37 }
  0xf6   : > { %v3552_v6 = vshrl.u32 %v6875_v21, 4  ;;  %v6898_v50 = vmul.u32.u64.low 2863311531, %v3537_v62  ;;  %v6899_v4 = vmul.u32.u64.high 2863311531, %v3537_v62, %v6898_v50  ;;  %v6910_v27 = vadd.s32 104, %v6867_v61 }
  0xf7   : > { %v6913_v22 = vadd.s32 32, %v6867_v61  ;;  %v3706_v47 = vshrl.u32 %v6890_v8, 4  ;;  %v6917_v40 = vadd.s32 56, %v6867_v61  ;;  %v3684_v57 = vshrl.u32 %v6896_v25, 4 }
  0xf8   : > { %v3553_v39 = vmul.u32 24, %v3552_v6  ;;  %v6925_v19 = vmul.u32.u64.low 2863311531, %v6907_v60  ;;  %v6926_v20 = vmul.u32.u64.high 2863311531, %v6907_v60, %v6925_v19  ;;  %v3717_v56 = vshrl.u32 %v6899_v4, 4 }
  0xf9   : > { %5343 = vmatmul.mubr.bf16.gmra.mrb[4].mxu0 %v6671_v48  ;;  %v6929_v12 = vmul.u32.u64.low 2863311531, %v6910_v27  ;;  %v6930_v28 = vmul.u32.u64.high 2863311531, %v6910_v27, %v6929_v12  ;;  %v6936_v24 = vmul.u32.u64.low 2863311531, %v6913_v22  ;;  %v6937_v49 = vmul.u32.u64.high 2863311531, %v6913_v22, %v6936_v24 }
  0xfa   : > { %5346 = vmatprep.mubr.bf16.mxu0 %v6683_v0  ;;  %v6870_v48 = vmul.u32.u64.low 2863311531, %v474_v63  ;;  %v6871_v0 = vmul.u32.u64.high 2863311531, %v474_v63, %v6870_v48  ;;  %v6904_v58 = vsub.s32 %v6867_v61, %v3553_v39  ;;  %v3707_v31 = vmul.u32 24, %v3706_v47 }
  0xfb   : > { %5351 = vmatmul.mubr.bf16.vlgmr.msra.gmra.mrb[24].mxu1 %v6770_v26  ;;  %v6942_v36 = vmul.u32.u64.low 2863311531, %v6917_v40  ;;  %v6943_v18 = vmul.u32.u64.high 2863311531, %v6917_v40, %v6942_v36  ;;  %v3685_v42 = vmul.u32 24, %v3684_v57  ;;  %v6966_v51 = vadd.s32 40, %v6867_v61 }
  0xfc   : > { %5354 = vmatprep.mubr.bf16.mxu1 %v3294_v34  ;;  %v3574_v11 = vshrl.u32 %v6871_v0, 4  ;;  %vm3810_vm9 = vcmp.ne.s32.totalorder %v6904_v58, 0  ;;  %vm3834_vm10 = vcmp.lt.s32.totalorder %v6904_v58, 0  ;;  %v6953_v13 = vadd.s32 24, %v6904_v58 }
  0xfd   : > { %vm6959_vm14 = vmand %vm3834_vm10, %vm3810_vm9  ;;  %v3718_v33 = vmul.u32 24, %v3717_v56  ;;  %v6969_v16 = vadd.s32 144, %v6867_v61  ;;  %v6981_v14 = vsub.s32 %v3536_v2, %v3707_v31  ;;  %v3695_v48 = vshrl.u32 %v6930_v28, 4 }
  0xfe   : > { %v3575_v5 = vmul.u32 24, %v3574_v11  ;;  %v6999_v35 = vsub.s32 %v3534_v54, %v3685_v42  ;;  %v3596_v21 = vshrl.u32 %v6937_v49, 4  ;;  %v7027_v59 = vadd.s32 128, %v6867_v61 }
  0xff   : > { %7991 = vst [vmem:[#allocation9_spill] sm:$0xff] %v6981_v14  ;;  %vm3824_vm3 = vcmp.ne.s32.totalorder %v6981_v14, 0  ;;  %vm3848_vm4 = vcmp.lt.s32.totalorder %v6981_v14, 0  ;;  %v3696_v39 = vmul.u32 24, %v3695_v48  ;;  %v7045_v50 = vadd.s32 80, %v6867_v61 }
 0x100   : > { %v6901_v44 = vsub.s32 %v474_v63, %v3575_v5  ;;  %v3618_v63 = vshrl.u32 %v6926_v20, 4  ;;  %7994 = vst [vmem:[#allocation11_spill] sm:$0xff] %v6999_v35  ;;  %vm3822_vm5 = vcmp.ne.s32.totalorder %v6999_v35, 0  ;;  %vm3846_vm6 = vcmp.lt.s32.totalorder %v6999_v35, 0  ;;  %vm7105_vm9 = vmand %vm3848_vm4, %vm3824_vm3 }
 0x101   : > { %5347 = vmatmul.mubr.bf16.gmra.mrb[8].mxu0 %v6687_v10  ;;  %v3525_v10 = vadd.s32 24, %v6867_v61  ;;  %v7041_v37 = vadd.s32 24, %v6999_v35  ;;  %v7055_v47 = vadd.s32 64, %v6867_v61  ;;  %v7062_v20 = vsub.s32 %v6910_v27, %v3696_v39 }
 0x102   : > { %vm3812_vm7 = vcmp.ne.s32.totalorder %v6901_v44, 0  ;;  %vm3836_vm8 = vcmp.lt.s32.totalorder %v6901_v44, 0  ;;  %v6950_v43 = vadd.s32 24, %v6901_v44  ;;  %v3619_v5 = vmul.u32 24, %v3618_v63 }
 0x103   : > { %5355 = vmatmul.mubr.bf16.gmra.mrb[28].mxu1 %v3298_v9  ;;  %vm6945_vm11 = vmand %vm3836_vm8, %vm3812_vm7  ;;  %7997 = vst [vmem:[#allocation14_spill] sm:$0xff] %v7041_v37  ;;  %v7065_v12 = vadd.s32 88, %v6867_v61  ;;  %v7094_v63 = vmul.u32.u64.low 2863311531, %v7055_v47  ;;  %v7095_v48 = vmul.u32.u64.high 2863311531, %v7055_v47, %v7094_v63  ;;  %v8015_v54 = vmov 0 }
 0x104   : > { %5358 = vmatprep.mubr.bf16.mxu1 %v6691_v45  ;;  %v6879_v26 = vmul.u32.u64.low 2863311531, %v3525_v10  ;;  %v6880_v45 = vmul.u32.u64.high 2863311531, %v3525_v10, %v6879_v26  ;;  %v7059_v19 = vsub.s32 %v6907_v60, %v3619_v5  ;;  %7998 = vst [vmem:[#allocation3_spill] sm:$0xff] %v7062_v20 }
 0x106   : > { %v3585_v3 = vshrl.u32 %v6880_v45, 4  ;;  %v7008_v45 = vsub.s32 %v3537_v62, %v3718_v33  ;;  %v7033_v62 = vadd.s32 24, %v6981_v14  ;;  %vm3816_vm10 = vcmp.ne.s32.totalorder %v7059_v19, 0 }
 0x108   : > { %v3586_v46 = vmul.u32 24, %v3585_v3  ;;  %7995 = vst [vmem:[#allocation12_spill] sm:$0xff] %v7008_v45  ;;  %7996 = vst [vmem:[#allocation10_spill] sm:$0xff] %v7033_v62  ;;  %v3597_v3 = vmul.u32 24, %v3596_v21  ;;  %vm3825_vm7 = vcmp.ne.s32.totalorder %v7008_v45, 0  ;;  %vm3849_vm8 = vcmp.lt.s32.totalorder %v7008_v45, 0 }
 0x109   : > { %v7126_v5 = vadd.s32 24, %v7008_v45  ;;  %vm7136_vm3 = vmand %vm3849_vm8, %vm3825_vm7 }
 0x10a   : > { %v6922_v17 = vsub.s32 %v3525_v10, %v3586_v46  ;;  %v7048_v4 = vmul.u32.u64.low 2863311531, %v7027_v59  ;;  %v7049_v46 = vmul.u32.u64.high 2863311531, %v7027_v59, %v7048_v4  ;;  %v7070_v57 = vsub.s32 %v6913_v22, %v3597_v3 }
 0x10b   : > { %5359 = vmatmul.mubr.bf16.gmra.mrb[32].mxu1 %v6706_v55  ;;  %v6882_v55 = vmul.u32.u64.low 2863311531, %v473_v23  ;;  %v6883_v7 = vmul.u32.u64.high 2863311531, %v473_v23, %v6882_v55  ;;  %8009 = vst [vmem:[#allocation15_spill] sm:$0xff] %v7126_v5 }
 0x10c   : > { %vm3813_vm12 = vcmp.ne.s32.totalorder %v6922_v17, 0  ;;  %vm3837_vm13 = vcmp.lt.s32.totalorder %v6922_v17, 0  ;;  %v6976_v30 = vadd.s32 24, %v6922_v17  ;;  %v3629_v55 = vshrl.u32 %v6943_v18, 4 }
 0x10d   : > { %v3563_v53 = vshrl.u32 %v6883_v7, 4  ;;  %vm6971_vm1 = vmand %vm3837_vm13, %vm3813_vm12  ;;  %v7012_v7 = vmul.u32.u64.low 2863311531, %v6969_v16  ;;  %v7013_v2 = vmul.u32.u64.high 2863311531, %v6969_v16, %v7012_v7  ;;  %vm3840_vm12 = vcmp.lt.s32.totalorder %v7059_v19, 0 }
 0x10e   : > { %v3630_v25 = vmul.u32 24, %v3629_v55  ;;  %v7084_v18 = vmul.u32.u64.low 2863311531, %v7045_v50  ;;  %v7085_v31 = vmul.u32.u64.high 2863311531, %v7045_v50, %v7084_v18  ;;  %vm7121_vm13 = vmand %vm3846_vm6, %vm3822_vm5  ;;  %vm3814_vm4 = vcmp.ne.s32.totalorder %v7070_v57, 0 }
 0x10f   : > { %v3564_v41 = vmul.u32 24, %v3563_v53  ;;  %v7038_v53 = vadd.s32 152, %v6867_v61  ;;  %v3750_v27 = vshrl.u32 %v7013_v2, 4  ;;  %v8006_v2 = vmov 0  ;;  %vm7151_vm6 = vmand %vm3840_vm12, %vm3816_vm10 }
 0x110   : > { %v7080_v60 = vsub.s32 %v6917_v40, %v3630_v25  ;;  %v8007_v2 = vsel %vm7121_vm13, 4294967295, %v8006_v2  ;;  %v8010_v25 = vmov 0  ;;  %vm3838_vm5 = vcmp.lt.s32.totalorder %v7070_v57, 0 }
 0x111   : > { %v6932_v15 = vsub.s32 %v473_v23, %v3564_v41  ;;  %v7003_v10 = vmul.u32.u64.low 2863311531, %v6966_v51  ;;  %v7004_v23 = vmul.u32.u64.high 2863311531, %v6966_v51, %v7003_v10  ;;  %v7052_v41 = vadd.s32 136, %v6867_v61  ;;  %8008 = vst [vmem:[#allocation7_spill] sm:$0xff] %v8007_v2  ;;  %vm7193_vm12 = vmand %vm3838_vm5, %vm3814_vm4 }
 0x112   : > { %v7074_v49 = vmul.u32.u64.low 2863311531, %v7038_v53  ;;  %v7075_v56 = vmul.u32.u64.high 2863311531, %v7038_v53, %v7074_v49  ;;  %v8003_v10 = vmov 0  ;;  %v8011_v25 = vsel %vm7136_vm3, 4294967295, %v8010_v25 }
 0x113   : > { %vm3811_vm15 = vcmp.ne.s32.totalorder %v6932_v15, 0  ;;  %vm3835_vm0 = vcmp.lt.s32.totalorder %v6932_v15, 0  ;;  %v6979_v29 = vadd.s32 24, %v6932_v15  ;;  %v3607_v24 = vshrl.u32 %v7004_v23, 4  ;;  %8012 = vst [vmem:[#allocation16_spill] sm:$0xff] %v8011_v25 }
 0x114   : > { %vm6991_vm2 = vmand %vm3835_vm0, %vm3811_vm15  ;;  %v7090_v22 = vmul.u32.u64.low 2863311531, %v7052_v41  ;;  %v7091_v33 = vmul.u32.u64.high 2863311531, %v7052_v41, %v7090_v22  ;;  %v8004_v10 = vsel %vm7105_vm9, 4294967295, %v8003_v10  ;;  %vm3823_vm15 = vcmp.ne.s32.totalorder %v7062_v20, 0 }
 0x115   : > { %8005 = vst [vmem:[#allocation13_spill] sm:$0xff] %v8004_v10  ;;  %v7112_v23 = vmul.u32.u64.low 2863311531, %v7065_v12  ;;  %v7113_v55 = vmul.u32.u64.high 2863311531, %v7065_v12, %v7112_v23  ;;  %vm3847_vm0 = vcmp.lt.s32.totalorder %v7062_v20, 0  ;;  %v3608_v39 = vmul.u32 24, %v3607_v24 }
 0x116   : > { %v3751_v4 = vmul.u32 24, %v3750_v27  ;;  %v7143_v49 = vadd.s32 72, %v6867_v61  ;;  %v7156_v22 = vadd.s32 24, %v7059_v19  ;;  %vm3817_vm7 = vcmp.ne.s32.totalorder %v7080_v60, 0  ;;  %vm7173_vm10 = vmand %vm3847_vm0, %vm3823_vm15 }
 0x117   : > { %vm3841_vm8 = vcmp.lt.s32.totalorder %v7080_v60, 0  ;;  %v3728_v27 = vshrl.u32 %v7049_v46, 4  ;;  %v8016_v54 = vsel %vm7173_vm10, 4294967295, %v8015_v54  ;;  %v7178_v46 = vadd.s32 24, %v7062_v20 }
 0x118   : > { %8017 = vst [vmem:[#allocation17_spill] sm:$0xff] %v8016_v54  ;;  %v7181_v6 = vadd.s32 24, %v7070_v57  ;;  %v7198_v9 = vadd.s32 24, %v7080_v60  ;;  %vm7210_vm15 = vmand %vm3841_vm8, %vm3817_vm7  ;;  %v3739_v37 = vshrl.u32 %v7091_v33, 4  ;;  %v3640_v2 = vshrl.u32 %v7095_v48, 4 }
 0x119   : > { %8018 = vst [vmem:[#allocation18_spill] sm:$0xff] %v7178_v46  ;;  %v3729_v35 = vmul.u32 24, %v3728_v27  ;;  %v3673_v27 = vshrl.u32 %v7113_v55, 4  ;;  %v7244_v33 = vadd.s32 176, %v6867_v61  ;;  %v8043_v38 = vsel %vm6991_vm2, %v6979_v29, %v6932_v15 }
 0x11a   : > { %v3641_v46 = vmul.u32 24, %v3640_v2  ;;  %v8075_v34 = vsel %vm7210_vm15, %v7198_v9, %v7080_v60 }
 0x11b   : > { %v3674_v45 = vmul.u32 24, %v3673_v27  ;;  %v7273_v5 = vmul.u32.u64.low 2863311531, %v7244_v33  ;;  %v7274_v25 = vmul.u32.u64.high 2863311531, %v7244_v33, %v7273_v5  ;;  %v7294_v27 = vadd.s32 168, %v6867_v61 }
 0x11d   : > { %v3794_v29 = vshrl.u32 %v7274_v25, 4 }
 0x19e   : > { %v6997_v0 = vpop.f32.mrb[0].mxu1 }
 0x19f   : > { %v7006_v26 = vpop.f32.mrb[1].mxu1 }
 0x1a0   : > { %v7015_v11 = vpop.f32.mrb[2].mxu1 }
 0x1a1   : > { %v7029_v8 = vpop.f32.mrb[3].mxu1 }
 0x1a6   : > { %v7067_v28 = vpop.f32.mrb[4].mxu1 }
 0x1a7   : > { %7999 = vst [vmem:[#allocation5_spill] sm:$0xff] %v7067_v28  ;;  %v7077_v36 = vpop.f32.mrb[5].mxu1  ;;  %v3662_v28 = vshrl.u32 %v7085_v31, 4 }
 0x1a8   : > { %8000 = vst [vmem:[#allocation8_spill] sm:$0xff] %v7077_v36  ;;  %v7087_v42 = vpop.f32.mrb[6].mxu1  ;;  %v7215_v36 = vsub.s32 %v6969_v16, %v3751_v4 }
 0x1a9   : > { %8001 = vst [vmem:[#allocation4_spill] sm:$0xff] %v7087_v42  ;;  %v7097_v21 = vpop.f32.mrb[7].mxu1 }
 0x1aa   : > { %8002 = vst [vmem:[#allocation6_spill] sm:$0xff] %v7097_v21  ;;  %v7201_v21 = vsub.s32 %v6966_v51, %v3608_v39  ;;  %v7219_v51 = vmul.u32.u64.low 2863311531, %v7143_v49  ;;  %v7220_v39 = vmul.u32.u64.high 2863311531, %v7143_v49, %v7219_v51  ;;  %v7270_v54 = vadd.s32 24, %v7215_v36 }
 0x1ab   : > { %v3663_v51 = vmul.u32 24, %v3662_v28  ;;  %vm8040_vm10 = vcmp.lt.s32.totalorder %v7215_v36, 0 }
 0x1ac   : > { %v7099_v40 = vpop.f32.mrb[12].mxu0  ;;  %vm3815_vm0 = vcmp.ne.s32.totalorder %v7201_v21, 0  ;;  %vm3839_vm4 = vcmp.lt.s32.totalorder %v7201_v21, 0  ;;  %v7260_v55 = vadd.s32 24, %v7201_v21  ;;  %v3651_v5 = vshrl.u32 %v7220_v39, 4 }
 0x1ad   : > { %v7115_v7 = vpop.f32.mrb[13].mxu0  ;;  %v7290_v2 = vsub.s32 %v7045_v50, %v3663_v51  ;;  %vm7336_vm7 = vmand %vm3839_vm4, %vm3815_vm0  ;;  %vm8039_vm4 = vcmp.ne.s32.totalorder %v7215_v36, 0 }
 0x1ae   : > { %v7130_v3 = vpop.f32.mrb[14].mxu0  ;;  %v7183_v63 = vpop.f32.mrb[8].mxu1  ;;  %vm7369_vm5 = vmand %vm8040_vm10, %vm8039_vm4 }
 0x1af   : > { %v7145_v18 = vpop.f32.mrb[15].mxu0  ;;  %8019 = vst [vmem:[#allocation19_spill] sm:$0xff] %v7183_v63  ;;  %v3761_v63 = vshrl.u32 %v7075_v56, 4  ;;  %v7204_v42 = vpop.f32.mrb[9].mxu1  ;;  %vm8055_vm2 = vcmp.lt.s32.totalorder %v7290_v2, 0 }
 0x1b0   : > { %8022 = vst [vmem:[#allocation20_spill] sm:$0xff] %v7204_v42  ;;  %v7222_v56 = vpop.f32.mrb[10].mxu1  ;;  %v7267_v42 = vsub.s32 %v7027_v59, %v3729_v35  ;;  %v7284_v35 = vadd.s32 184, %v6867_v61 }
 0x1b1   : > { %8025 = vst [vmem:[#allocation21_spill] sm:$0xff] %v7222_v56  ;;  %v7230_v16 = vpop.f32.mrb[11].mxu1  ;;  %v3762_v31 = vmul.u32 24, %v3761_v63  ;;  %v3740_v63 = vmul.u32 24, %v3739_v37 }
 0x1b2   : > { %8026 = vst [vmem:[#allocation22_spill] sm:$0xff] %v7230_v16  ;;  %v7254_v16 = vadd.s32 160, %v6867_v61  ;;  %v7313_v61 = vadd.s32 24, %v7267_v42  ;;  %vm8046_vm10 = vcmp.ne.s32.totalorder %v7267_v42, 0  ;;  %vm8047_vm4 = vcmp.lt.s32.totalorder %v7267_v42, 0 }
 0x1b3   : > { %v7277_v28 = vsub.s32 %v7038_v53, %v3762_v31  ;;  %vm7393_vm13 = vmand %vm8047_vm4, %vm8046_vm10  ;;  %vm8054_vm4 = vcmp.ne.s32.totalorder %v7290_v2, 0 }
 0x1b4   : > { %v7232_v4 = vpop.f32.mrb[16].mxu0  ;;  %v7280_v62 = vmul.u32.u64.low 2863311531, %v7254_v16  ;;  %v7281_v10 = vmul.u32.u64.high 2863311531, %v7254_v16, %v7280_v62  ;;  %vm7419_vm9 = vmand %vm8055_vm2, %vm8054_vm4  ;;  %v8131_v15 = vsel %vm7393_vm13, %v7313_v61, %v7267_v42 }
 0x1b5   : > { %v7246_v48 = vpop.f32.mrb[17].mxu0  ;;  %v7301_v62 = vsub.s32 %v7052_v41, %v3740_v63  ;;  %v7343_v52 = vadd.s32 24, %v7277_v28 }
 0x1b6   : > { %v7256_v56 = vpop.f32.mrb[18].mxu0  ;;  %v5152_v14 = vpop.f32.mrb[12].mxu1 }
 0x1b7   : > { %v7263_v20 = vpop.f32.mrb[19].mxu0  ;;  %v7287_v59 = vadd.f32 %v7099_v40, %v5152_v14  ;;  %v1972_v37 = vpop.f32.mrb[13].mxu1  ;;  %v7304_v14 = vsub.s32 %v7055_v47, %v3641_v46  ;;  %v8028_v47 = vsel %vm6959_vm14, %v6953_v13, %v6904_v58  ;;  %v8033_v13 = vsel %vm6945_vm11, %v6950_v43, %v6901_v44 }
 0x1b8   : > { %v7297_v53 = vadd.f32 %v7115_v7, %v1972_v37  ;;  %v5153_v31 = vpop.f32.mrb[14].mxu1  ;;  %v7316_v7 = vsub.s32 %v7065_v12, %v3674_v45  ;;  %vm7328_vm8 = vcmp.lt.s32.totalorder %v8028_v47, 16  ;;  %vm7352_vm14 = vcmp.lt.s32.totalorder %v8033_v13, 16 }
 0x1b9   : > { %v7307_v50 = vadd.f32 %v7130_v3, %v5153_v31  ;;  %v1975_v40 = vpop.f32.mrb[15].mxu1  ;;  %v8034_v12 = vmov 0  ;;  %v8037_v46 = vmov 0  ;;  %v7376_v44 = vadd.s32 24, %v7290_v2 }
 0x1ba   : > { %v7319_v41 = vadd.f32 %v7145_v18, %v1975_v40  ;;  %v8035_v12 = vsel %vm7352_vm14, 4294967295, %v8034_v12  ;;  %v8036_v18 = vsel %vm6971_vm1, %v6976_v30, %v6922_v17  ;;  %v3652_v17 = vmul.u32 24, %v3651_v5 }
 0x1bb   : > { %vm7361_vm0 = vcmp.lt.s32.totalorder %v8036_v18, 16  ;;  %vm7385_vm1 = vcmp.lt.s32.totalorder %v8043_v38, 16  ;;  %v8044_v30 = vmov 0  ;;  %vm3827_vm11 = vcmp.ne.s32.totalorder %v7301_v62, 0 }
 0x1bc   : > { %v7309_v39 = vpop.f32.mrb[20].mxu0  ;;  %8027 = vst [vmem:[#allocation23_spill] sm:$0xff] %v7319_v41  ;;  %v8038_v46 = vsel %vm7361_vm0, 4294967295, %v8037_v46  ;;  %v8045_v30 = vsel %vm7385_vm1, 4294967295, %v8044_v30  ;;  %vm3851_vm3 = vcmp.lt.s32.totalorder %v7301_v62, 0  ;;  %vm8050_vm0 = vcmp.ne.s32.totalorder %v7277_v28, 0 }
 0x1bd   : > { %v7321_v51 = vpop.f32.mrb[21].mxu0  ;;  %vm8051_vm1 = vcmp.lt.s32.totalorder %v7277_v28, 0  ;;  %vm3821_vm10 = vcmp.ne.s32.totalorder %v7316_v7, 0  ;;  %v7412_v32 = vmul.u32.u64.low 2863311531, %v7284_v35  ;;  %v7413_v37 = vmul.u32.u64.high 2863311531, %v7284_v35, %v7412_v32 }
 0x1be   : > { %v7345_v58 = vpop.f32.mrb[22].mxu0  ;;  %vm7405_vm14 = vmand %vm8051_vm1, %vm8050_vm0  ;;  %v5156_v5 = vpop.f32.mrb[16].mxu1  ;;  %vm3845_vm0 = vcmp.lt.s32.totalorder %v7316_v7, 0  ;;  %v3772_v40 = vshrl.u32 %v7281_v10, 4  ;;  %v7426_v47 = vmul.u32.u64.low 2863311531, %v7294_v27  ;;  %v7427_v25 = vmul.u32.u64.high 2863311531, %v7294_v27, %v7426_v47 }
 0x1bf   : > { %v7378_v43 = vpop.f32.mrb[23].mxu0  ;;  %v7430_v13 = vadd.f32 %v7232_v4, %v5156_v5  ;;  %v1988_v18 = vpop.f32.mrb[17].mxu1  ;;  %v3911_v38 = vsel %vm7336_vm7, %v7260_v55, %v7201_v21  ;;  %vm7440_vm1 = vmand %vm3851_vm3, %vm3827_vm11  ;;  %v7445_v10 = vadd.s32 24, %v7301_v62  ;;  %v7448_v4 = vsub.s32 %v7143_v49, %v3652_v17 }
 0x1c0   : > { %v7451_v5 = vadd.f32 %v7246_v48, %v1988_v18  ;;  %v5157_v47 = vpop.f32.mrb[18].mxu1  ;;  %vm8062_vm3 = vcmp.ne.s32.totalorder %v7304_v14, 0  ;;  %vm8063_vm7 = vcmp.lt.s32.totalorder %v7304_v14, 0  ;;  %v7466_v49 = vadd.s32 24, %v7304_v14  ;;  %vm7486_vm2 = vmand %vm3845_vm0, %vm3821_vm10 }
 0x1c1   : > { %8058 = vst [vmem:[#allocation24_spill] sm:$0xff] %v7430_v13  ;;  %vm7461_vm11 = vmand %vm8063_vm7, %vm8062_vm3  ;;  %v7469_v48 = vadd.s32 24, %v7316_v7  ;;  %v7472_v45 = vadd.f32 %v7256_v56, %v5157_v47  ;;  %v1991_v17 = vpop.f32.mrb[19].mxu1  ;;  %v3795_v56 = vmul.u32 24, %v3794_v29  ;;  %v8072_v29 = vsel %vm7193_vm12, %v7181_v6, %v7070_v57 }
 0x1c2   : > { %8061 = vst [vmem:[#allocation25_spill] sm:$0xff] %v7451_v5  ;;  %v7491_v47 = vadd.f32 %v7263_v20, %v1991_v17  ;;  %v8069_v5 = vsel %vm7151_vm6, %v7156_v22, %v7059_v19  ;;  %vm7508_vm10 = vcmp.lt.s32.totalorder %v8072_v29, 16  ;;  %v3773_v24 = vmul.u32 24, %v3772_v40  ;;  %v8085_v29 = vld [vmem:[#allocation13_spill] sm:$0xff] }
 0x1c3   : > { %8066 = vst [vmem:[#allocation26_spill] sm:$0xff] %v7472_v45  ;;  %vm7499_vm4 = vcmp.lt.s32.totalorder %v8069_v5, 16  ;;  %vm7522_vm6 = vcmp.lt.s32.totalorder %v8075_v34, 16  ;;  %vm3819_vm12 = vcmp.ne.s32.totalorder %v7448_v4, 0  ;;  %vm3843_vm0 = vcmp.lt.s32.totalorder %v7448_v4, 0  ;;  %v8095_v34 = vld [vmem:[#allocation12_spill] sm:$0xff] }
 0x1c4   : > { %v5340_v18 = vpop.f32.mrb[0].mxu0  ;;  %vm7533_vm3 = vcmp.lt.s32.totalorder %v3911_v38, 16  ;;  %v3914_v9 = vsel %vm7461_vm11, %v7466_v49, %v7304_v14  ;;  %v3917_v60 = vsel %vm7486_vm2, %v7469_v48, %v7316_v7  ;;  %v7546_v5 = vadd.s32 24, %v7448_v4  ;;  %v8137_v42 = vld [vmem:[#allocation23_spill] sm:$0xff] }
 0x1c5   : > { %v5378_v45 = vadd.f32 %v5340_v18, %v6997_v0  ;;  %v3406_v21 = vpop.f32.mrb[1].mxu0  ;;  %v3916_v0 = vsel %vm7419_vm9, %v7376_v44, %v7290_v2  ;;  %v3805_v17 = vshrl.u32 %v7413_v37, 4  ;;  %vm8080_vm15 = vnez %v8035_v12 }
 0x1c6   : > { %v5379_v19 = vadd.f32 %v3406_v21, %v7006_v26  ;;  %v5341_v22 = vpop.f32.mrb[2].mxu0  ;;  %v7552_v21 = vsub.s32 %v7244_v33, %v3795_v56  ;;  %v5160_v55 = vpop.f32.mrb[20].mxu1  ;;  %vm8081_vm7 = vnez %v8038_v46  ;;  %v7575_v33 = vsub.s32 %v7254_v16, %v3773_v24  ;;  %v8088_v24 = vld [vmem:[#allocation9_spill] sm:$0xff] }
 0x1c7   : > { %v5380_v26 = vadd.f32 %v5341_v22, %v7015_v11  ;;  %v3409_v23 = vpop.f32.mrb[3].mxu0  ;;  %v4004_v14 = vsel %vm8080_vm15, %v5378_v45, 0.0  ;;  %v3783_v3 = vshrl.u32 %v7427_v25, 4  ;;  %v7579_v12 = vadd.f32 %v7309_v39, %v5160_v55  ;;  %v2004_v37 = vpop.f32.mrb[21].mxu1  ;;  %v8087_v25 = vld [vmem:[#allocation10_spill] sm:$0xff]  ;;  %v8092_v22 = vld [vmem:[#allocation16_spill] sm:$0xff] }
 0x1c8   : > { %v4002_v11 = vsel %vm7328_vm8, %v5379_v19, 0.0  ;;  %v5381_v38 = vadd.f32 %v3409_v23, %v7029_v8  ;;  %vm7570_vm8 = vmand %vm3843_vm0, %vm3819_vm12  ;;  %vm8084_vm11 = vnez %v8045_v30  ;;  %v7584_v48 = vadd.f32 %v7321_v51, %v2004_v37  ;;  %v5161_v45 = vpop.f32.mrb[22].mxu1  ;;  %v8094_v30 = vld [vmem:[#allocation15_spill] sm:$0xff]  ;;  %v8101_v37 = vld [vmem:[#allocation14_spill] sm:$0xff] }
 0x1c9   : > { %v4005_v7 = vsel %vm8081_vm7, %v5380_v26, 0.0  ;;  %v4184_v46 = vmul.f32 %v4002_v11, %v4002_v11  ;;  %vm8086_vm2 = vnez %v8085_v29  ;;  %vm8093_vm0 = vnez %v8092_v22  ;;  %v8099_v55 = vld [vmem:[#allocation7_spill] sm:$0xff]  ;;  %v8108_v22 = vld [vmem:[#allocation18_spill] sm:$0xff] }
 0x1ca   : > { %v4756_v13 = vpack.c.bf16 %v4005_v7, %v4004_v14  ;;  %v4003_v49 = vsel %vm8084_vm11, %v5381_v38, 0.0  ;;  %v8089_v39 = vsel %vm8086_vm2, %v8087_v25, %v8088_v24  ;;  %v8096_v51 = vsel %vm8093_vm0, %v8094_v30, %v8095_v34  ;;  %v8109_v30 = vld [vmem:[#allocation3_spill] sm:$0xff] }
 0x1cb   : > { %v4751_v18 = vpack.c.bf16 %v4003_v49, %v4002_v11  ;;  %v4154_v16 = vadd.f32 %v4003_v49, %v4002_v11  ;;  %v4185_v56 = vmul.f32 %v4003_v49, %v4003_v49  ;;  %vm7591_vm12 = vcmp.lt.s32.totalorder %v8089_v39, 16  ;;  %v2007_v11 = vpop.f32.mrb[23].mxu1  ;;  %v8102_v49 = vld [vmem:[#allocation11_spill] sm:$0xff]  ;;  %v8106_v39 = vld [vmem:[#allocation17_spill] sm:$0xff] }
 0x1cc   : > { %vm7600_vm15 = vcmp.lt.s32.totalorder %v8096_v51, 16  ;;  %v7605_v23 = vadd.f32 %v7345_v58, %v5161_v45  ;;  %v4186_v38 = vmul.f32 %v4004_v14, %v4004_v14  ;;  %4811 = vst [vmem:[%s7562_s15 + $0x8] sm:$0xff] %v4756_v13   ;;  %vm8100_vm7 = vnez %v8099_v55  ;;  %v5344_v24 = vpop.f32.mrb[4].mxu0 }
 0x1cd   : > { %v8103_v29 = vsel %vm8100_vm7, %v8101_v37, %v8102_v49  ;;  %vm8107_vm2 = vnez %v8106_v39  ;;  %v8111_v58 = vmov 0  ;;  %v3915_v13 = vsel %vm7570_vm8, %v7546_v5, %v7448_v4  ;;  %4752 = vst [vmem:[%s7562_s15] sm:$0xff] %v4751_v18   ;;  %v8113_v49 = vld [vmem:[#allocation5_spill] sm:$0xff]  ;;  %v3422_v39 = vpop.f32.mrb[5].mxu0 }
 0x1ce   : > { %vm7613_vm11 = vcmp.lt.s32.totalorder %v8103_v29, 16  ;;  %v8110_v34 = vsel %vm8107_vm2, %v8108_v22, %v8109_v30  ;;  %v3806_v45 = vmul.u32 24, %v3805_v17  ;;  %v7631_v51 = vadd.f32 %v7378_v43, %v2007_v11  ;;  %v8114_v22 = vld [vmem:[#allocation8_spill] sm:$0xff]  ;;  %v8118_v11 = vld [vmem:[#allocation6_spill] sm:$0xff]  ;;  %v5352_v20 = vpop.f32.mrb[24].mxu1 }
 0x1cf   : > { %vm7622_vm0 = vcmp.lt.s32.totalorder %v8110_v34, 16  ;;  %v4155_v55 = vadd.f32 %v4154_v16, %v4004_v14  ;;  %v4208_v37 = vadd.f32 %v4185_v56, %v4184_v46  ;;  %v5382_v29 = vadd.f32 %v5344_v24, %v8113_v49  ;;  %v5345_v34 = vpop.f32.mrb[6].mxu0  ;;  %v8117_v46 = vld [vmem:[#allocation4_spill] sm:$0xff]  ;;  %v3454_v44 = vpop.f32.mrb[25].mxu1 }
 0x1d0   : > { %v8112_v58 = vsel %vm7622_vm0, 4294967295, %v8111_v58  ;;  %v5383_v30 = vadd.f32 %v3422_v39, %v8114_v22  ;;  %vm7636_vm7 = vcmp.lt.s32.totalorder %v3914_v9, 16  ;;  %v8115_v57 = vmov 0  ;;  %v3425_v9 = vpop.f32.mrb[7].mxu0 }
 0x1d1   : > { %v8116_v57 = vsel %vm7636_vm7, 4294967295, %v8115_v57  ;;  %vm3832_vm2 = vcmp.ne.s32.totalorder %v7552_v21, 0  ;;  %v7643_v43 = vadd.s32 24, %v7552_v21  ;;  %v7646_v4 = vadd.s32 24, %v7575_v33 }
 0x1d2   : > { %v3784_v5 = vmul.u32 24, %v3783_v3  ;;  %v4187_v17 = vmul.f32 %v4005_v7, %v4005_v7  ;;  %v4209_v14 = vadd.f32 %v4208_v37, %v4186_v38  ;;  %v4156_v8 = vadd.f32 %v4155_v55, %v4005_v7 }
 0x1d3   : > { %v5384_v18 = vadd.f32 %v5345_v34, %v8117_v46  ;;  %vm3854_vm7 = vcmp.lt.s32.totalorder %v7575_v33, 0  ;;  %v4008_v16 = vsel %vm7499_vm4, %v5382_v29, 0.0  ;;  %v4006_v56 = vsel %vm7508_vm10, %v5383_v30, 0.0 }
 0x1d4   : > { %v5385_v24 = vadd.f32 %v3425_v9, %v8118_v11  ;;  %vm7661_vm8 = vcmp.lt.s32.totalorder %v3916_v0, 16  ;;  %vm7665_vm0 = vcmp.lt.s32.totalorder %v3917_v60, 16  ;;  %v7670_v41 = vsub.s32 %v7284_v35, %v3806_v45  ;;  %v5353_v45 = vpop.f32.mrb[26].mxu1  ;;  %v8140_v9 = vld [vmem:[#allocation20_spill] sm:$0xff] }
 0x1d5   : > { %v4157_v38 = vadd.f32 %v4156_v8, %v4006_v56  ;;  %v4188_v55 = vmul.f32 %v4006_v56, %v4006_v56  ;;  %v4210_v37 = vadd.f32 %v4209_v14, %v4187_v17  ;;  %v4009_v31 = vsel %vm7522_vm6, %v5384_v18, 0.0  ;;  %v8138_v17 = vld [vmem:[#allocation19_spill] sm:$0xff] }
 0x1d6   : > { %v5391_v2 = vadd.f32 %v7287_v59, %v5352_v20  ;;  %v4766_v0 = vpack.c.bf16 %v4009_v31, %v4008_v16  ;;  %v4007_v60 = vsel %vm7533_vm3, %v5385_v24, 0.0  ;;  %v7678_v49 = vsub.s32 %v7294_v27, %v3784_v5 }
 0x1d7   : > { %v5393_v35 = vadd.f32 %v7297_v53, %v3454_v44  ;;  %v4211_v29 = vadd.f32 %v4210_v37, %v4188_v55  ;;  %v4761_v39 = vpack.c.bf16 %v4007_v60, %v4006_v56  ;;  %v4158_v22 = vadd.f32 %v4157_v38, %v4007_v60  ;;  %v8142_v55 = vld [vmem:[#allocation21_spill] sm:$0xff] }
 0x1d8   : > { %v8123_v59 = vsel %vm7369_vm5, %v7270_v54, %v7215_v36  ;;  %v8126_v27 = vsel %vm7405_vm14, %v7343_v52, %v7277_v28  ;;  %vm7699_vm10 = vcmp.lt.s32.totalorder %v3915_v13, 16  ;;  %v5395_v1 = vadd.f32 %v7307_v50, %v5353_v45  ;;  %v3457_v54 = vpop.f32.mrb[27].mxu1  ;;  %4813 = vst [vmem:[%s7562_s15 + $0x18] sm:$0xff] %v4766_v0   ;;  %v5348_v52 = vpop.f32.mrb[8].mxu0 }
 0x1d9   : > { %vm7686_vm9 = vcmp.lt.s32.totalorder %v8123_v59, 16  ;;  %vm7695_vm4 = vcmp.lt.s32.totalorder %v8126_v27, 16  ;;  %v4189_v36 = vmul.f32 %v4007_v60, %v4007_v60  ;;  %vm7710_vm5 = vcmp.lt.s32.totalorder %v8131_v15, 16  ;;  %4812 = vst [vmem:[%s7562_s15 + $0x10] sm:$0xff] %v4761_v39   ;;  %v3438_v34 = vpop.f32.mrb[9].mxu0  ;;  %v5356_v25 = vpop.f32.mrb[28].mxu1 }
 0x1da   : > { %v8134_v13 = vsel %vm7440_vm1, %v7445_v10, %v7301_v62  ;;  %vm3833_vm6 = vcmp.ne.s32.totalorder %v7670_v41, 0  ;;  %vm3857_vm3 = vcmp.lt.s32.totalorder %v7670_v41, 0  ;;  %v4190_v63 = vmul.f32 %v4008_v16, %v4008_v16  ;;  %v5349_v8 = vpop.f32.mrb[10].mxu0  ;;  %v3470_v0 = vpop.f32.mrb[29].mxu1 }
 0x1db   : > { %vm7719_vm14 = vcmp.lt.s32.totalorder %v8134_v13, 16  ;;  %v5397_v61 = vadd.f32 %v8137_v42, %v3457_v54  ;;  %v4159_v30 = vadd.f32 %v4158_v22, %v4008_v16  ;;  %v7728_v32 = vadd.s32 24, %v7670_v41  ;;  %v3441_v16 = vpop.f32.mrb[11].mxu0  ;;  %v5357_v22 = vpop.f32.mrb[30].mxu1 }
 0x1dc   : > { %v7732_v62 = vsel %vm7591_vm12, %v5391_v2, 0.0  ;;  %v7736_v10 = vsel %vm7600_vm15, %v5395_v1, 0.0  ;;  %v4212_v5 = vadd.f32 %v4211_v29, %v4189_v36  ;;  %v5386_v14 = vadd.f32 %v5348_v52, %v8138_v17  ;;  %v8146_v2 = vld [vmem:[#allocation24_spill] sm:$0xff]  ;;  %v8151_v29 = vld [vmem:[#allocation25_spill] sm:$0xff]  ;;  %v8154_v36 = vld [vmem:[#allocation26_spill] sm:$0xff]  ;;  %v3473_v52 = vpop.f32.mrb[31].mxu1 }
 0x1dd   : > { %v7741_v46 = vsel %vm7613_vm11, %v5393_v35, 0.0  ;;  %v4786_v18 = vpack.c.bf16 %v7736_v10, %v7732_v62  ;;  %vm8139_vm13 = vnez %v8112_v58  ;;  %v5387_v26 = vadd.f32 %v3438_v34, %v8140_v9  ;;  %v8147_v35 = vld [vmem:[#allocation22_spill] sm:$0xff] }
 0x1de   : > { %v7747_v19 = vsel %vm8139_vm13, %v5397_v61, 0.0  ;;  %v4191_v11 = vmul.f32 %v4009_v31, %v4009_v31  ;;  %v4213_v24 = vadd.f32 %v4212_v5, %v4190_v63  ;;  %vm8141_vm12 = vnez %v8116_v57 }
 0x1df   : > { %v4781_v56 = vpack.c.bf16 %v7747_v19, %v7741_v46  ;;  %4817 = vst [vmem:[%s7562_s15 + $0x38] sm:$0xff] %v4786_v18   ;;  %v4010_v20 = vsel %vm8141_vm12, %v5387_v26, 0.0  ;;  %v4160_v38 = vadd.f32 %v4159_v30, %v4009_v31  ;;  %v5388_v58 = vadd.f32 %v5349_v8, %v8142_v55  ;;  %v5360_v8 = vpop.f32.mrb[32].mxu1 }
 0x1e0   : > { %vm8143_vm15 = vcmp.lt.s32.totalorder %v7552_v21, 0  ;;  %vm3855_vm13 = vcmp.lt.s32.totalorder %v7678_v49, 0  ;;  %v5399_v44 = vadd.f32 %v8146_v2, %v5356_v25  ;;  %v4192_v60 = vmul.f32 %v4010_v20, %v4010_v20  ;;  %v3486_v9 = vpop.f32.mrb[33].mxu1 }
 0x1e1   : > { %vm7761_vm11 = vmand %vm8143_vm15, %vm3832_vm2  ;;  %4816 = vst [vmem:[%s7562_s15 + $0x30] sm:$0xff] %v4781_v56   ;;  %v4214_v57 = vadd.f32 %v4213_v24, %v4191_v11  ;;  %v5389_v31 = vadd.f32 %v3441_v16, %v8147_v35  ;;  %vm8148_vm12 = vcmp.ne.s32.totalorder %v7575_v33, 0  ;;  %v5401_v39 = vadd.f32 %v8151_v29, %v3470_v0  ;;  %v5361_v16 = vpop.f32.mrb[34].mxu1 }
 0x1e2   : > { %vm7773_vm1 = vmand %vm3854_vm7, %vm8148_vm12  ;;  %v4012_v59 = vsel %vm7661_vm8, %v5386_v14, 0.0  ;;  %v4161_v27 = vadd.f32 %v4160_v38, %v4010_v20  ;;  %v4013_v1 = vsel %vm7665_vm0, %v5388_v58, 0.0  ;;  %v5403_v15 = vadd.f32 %v8154_v36, %v5357_v22  ;;  %v3489_v25 = vpop.f32.mrb[35].mxu1 }
 0x1e3   : > { %vm7786_vm2 = vmand %vm3857_vm3, %vm3833_vm6  ;;  %v4215_v13 = vadd.f32 %v4214_v57, %v4192_v60  ;;  %v4776_v63 = vpack.c.bf16 %v4013_v1, %v4012_v59  ;;  %v3903_v7 = vadd.s32 24, %v7678_v49  ;;  %v5405_v42 = vadd.f32 %v7491_v47, %v3473_v52 }
 0x1e4   : > { %v3928_v3 = vsel %vm7761_vm11, %v7643_v43, %v7552_v21  ;;  %v3926_v61 = vsel %vm7773_vm1, %v7646_v4, %v7575_v33  ;;  %vm8155_vm0 = vcmp.ne.s32.totalorder %v7678_v49, 0  ;;  %v4020_v47 = vsel %vm7686_vm9, %v5399_v44, 0.0 }
 0x1e5   : > { %vm7805_vm7 = vmand %vm3855_vm13, %vm8155_vm0  ;;  %v7813_v21 = vsel %vm7695_vm4, %v5403_v15, 0.0  ;;  %4815 = vst [vmem:[%s7562_s15 + $0x28] sm:$0xff] %v4776_v63   ;;  %v4011_v33 = vsel %vm7699_vm10, %v5389_v31, 0.0  ;;  %v3929_v43 = vsel %vm7786_vm2, %v7728_v32, %v7670_v41  ;;  %v4018_v4 = vsel %vm7710_vm5, %v5401_v39, 0.0 }
 0x1e6   : > { %v4796_v6 = vpack.c.bf16 %v7813_v21, %v4020_v47  ;;  %v4019_v53 = vsel %vm7719_vm14, %v5405_v42, 0.0  ;;  %v4771_v34 = vpack.c.bf16 %v4011_v33, %v4010_v20  ;;  %v4162_v17 = vadd.f32 %v4161_v27, %v4011_v33 }
 0x1e7   : > { %v4791_v5 = vpack.c.bf16 %v4019_v53, %v4018_v4  ;;  %v4193_v14 = vmul.f32 %v4011_v33, %v4011_v33  ;;  %v3927_v40 = vsel %vm7805_vm7, %v3903_v7, %v7678_v49  ;;  %vm7832_vm8 = vcmp.lt.s32.totalorder %v3928_v3, 16 }
 0x1e8   : > { %4819 = vst [vmem:[%s7562_s15 + $0x48] sm:$0xff] %v4796_v6   ;;  %4814 = vst [vmem:[%s7562_s15 + $0x20] sm:$0xff] %v4771_v34   ;;  %v4194_v28 = vmul.f32 %v4012_v59, %v4012_v59  ;;  %v4163_v32 = vadd.f32 %v4162_v17, %v4012_v59  ;;  %v5407_v18 = vadd.f32 %v7579_v12, %v5360_v8  ;;  %vm3950_vm9 = vcmp.lt.s32.totalorder %v3926_v61, 16 }
 0x1e9   : > { %4818 = vst [vmem:[%s7562_s15 + $0x40] sm:$0xff] %v4791_v5   ;;  %v4216_v50 = vadd.f32 %v4215_v13, %v4193_v14  ;;  %v5409_v26 = vadd.f32 %v7584_v48, %v3486_v9  ;;  %vm3953_vm4 = vcmp.lt.s32.totalorder %v3929_v43, 16  ;;  %vm3951_vm10 = vcmp.lt.s32.totalorder %v3927_v40, 16 }
 0x1ea   : > { %v4195_v49 = vmul.f32 %v4013_v1, %v4013_v1  ;;  %v4164_v56 = vadd.f32 %v4163_v32, %v4013_v1  ;;  %v5411_v24 = vadd.f32 %v7605_v23, %v5361_v16  ;;  %v4196_v20 = vmul.f32 %v7741_v46, %v7741_v46 }
 0x1eb   : > { %v4217_v11 = vadd.f32 %v4216_v50, %v4194_v28  ;;  %v5413_v38 = vadd.f32 %v7631_v51, %v3489_v25  ;;  %v4024_v55 = vsel %vm7832_vm8, %v5407_v18, 0.0  ;;  %v4022_v37 = vsel %vm3950_vm9, %v5409_v26, 0.0 }
 0x1ec   : > { %v4165_v12 = vadd.f32 %v4164_v56, %v7741_v46  ;;  %v4025_v58 = vsel %vm3953_vm4, %v5411_v24, 0.0  ;;  %v4197_v23 = vmul.f32 %v7747_v19, %v7747_v19  ;;  %v4198_v51 = vmul.f32 %v7732_v62, %v7732_v62 }
 0x1ed   : > { %v4218_v48 = vadd.f32 %v4217_v11, %v4195_v49  ;;  %v4806_v2 = vpack.c.bf16 %v4025_v58, %v4024_v55  ;;  %v4023_v44 = vsel %vm3951_vm10, %v5413_v38, 0.0  ;;  %v4199_v31 = vmul.f32 %v7736_v10, %v7736_v10 }
 0x1ee   : > { %v4166_v0 = vadd.f32 %v4165_v12, %v7747_v19  ;;  %v4801_v57 = vpack.c.bf16 %v4023_v44, %v4022_v37  ;;  %v4200_v39 = vmul.f32 %v4018_v4, %v4018_v4  ;;  %v4201_v19 = vmul.f32 %v4019_v53, %v4019_v53 }
 0x1ef   : > { %v4219_v60 = vadd.f32 %v4218_v48, %v4196_v20  ;;  %4821 = vst [vmem:[%s7562_s15 + $0x58] sm:$0xff] %v4806_v2   ;;  %v4202_v54 = vmul.f32 %v4020_v47, %v4020_v47  ;;  %v4205_v61 = vmul.f32 %v4023_v44, %v4023_v44  ;;  %v4206_v30 = vmul.f32 %v4024_v55, %v4024_v55 }
 0x1f0   : > { %v4167_v46 = vadd.f32 %v4166_v0, %v7732_v62  ;;  %4820 = vst [vmem:[%s7562_s15 + $0x50] sm:$0xff] %v4801_v57   ;;  %v4203_v62 = vmul.f32 %v7813_v21, %v7813_v21 }
 0x1f1   : > { %v4220_v35 = vadd.f32 %v4219_v60, %v4197_v23 }
 0x1f2   : > { %v4168_v29 = vadd.f32 %v4167_v46, %v7736_v10  ;;  %v4204_v10 = vmul.f32 %v4022_v37, %v4022_v37 }
 0x1f3   : > { %v4221_v45 = vadd.f32 %v4220_v35, %v4198_v51 }
 0x1f4   : > { %v4169_v22 = vadd.f32 %v4168_v29, %v4018_v4 }
 0x1f5   : > { %v4222_v59 = vadd.f32 %v4221_v45, %v4199_v31 }
 0x1f6   : > { %v4170_v27 = vadd.f32 %v4169_v22, %v4019_v53 }
 0x1f7   : > { %v4223_v1 = vadd.f32 %v4222_v59, %v4200_v39 }
 0x1f8   : > { %v4171_v36 = vadd.f32 %v4170_v27, %v4020_v47  ;;  %v4207_v47 = vmul.f32 %v4025_v58, %v4025_v58 }
 0x1f9   : > { %v4224_v15 = vadd.f32 %v4223_v1, %v4201_v19 }
 0x1fa   : > { %v4172_v52 = vadd.f32 %v4171_v36, %v7813_v21 }
 0x1fb   : > { %v4225_v13 = vadd.f32 %v4224_v15, %v4202_v54 }
 0x1fc   : > { %v4173_v63 = vadd.f32 %v4172_v52, %v4022_v37 }
 0x1fd   : > { %v4226_v7 = vadd.f32 %v4225_v13, %v4203_v62 }
 0x1fe   : > { %v4174_v3 = vadd.f32 %v4173_v63, %v4023_v44 }
 0x1ff   : > { %v4227_v42 = vadd.f32 %v4226_v7, %v4204_v10 }
 0x200   : > { %v4175_v33 = vadd.f32 %v4174_v3, %v4024_v55 }
 0x201   : > { %v4228_v43 = vadd.f32 %v4227_v42, %v4205_v61 }
 0x202   : > { %v4176_v4 = vadd.f32 %v4175_v33, %v4025_v58 }
 0x203   : > { %v4229_v6 = vadd.f32 %v4228_v43, %v4206_v30 }
 0x204   : > { %v4177_v53 = vrot.slane %v4176_v4, 4 }
 0x205   : > { %v4230_v34 = vadd.f32 %v4229_v6, %v4207_v47 }
 0x206   : > { %v4178_v21 = vadd.f32 %v4177_v53, %v4176_v4 }
 0x207   : > { %v4231_v5 = vrot.slane %v4230_v34, 4 }
 0x208   : > { %v4179_v17 = vrot.slane %v4178_v21, 2 }
 0x209   : > { %v4232_v14 = vadd.f32 %v4231_v5, %v4230_v34 }
 0x20a   : > { %v4180_v40 = vadd.f32 %v4179_v17, %v4178_v21 }
 0x20b   : > { %v4233_v8 = vrot.slane %v4232_v14, 2 }
 0x20c   : > { %v4181_v41 = vrot.slane %v4180_v40, 1 }
 0x20d   : > { %v4234_v28 = vadd.f32 %v4233_v8, %v4232_v14 }
 0x20e   : > { %v4182_v32 = vadd.f32 %v4181_v41, %v4180_v40 }
 0x20f   : > { %v4235_v50 = vrot.slane %v4234_v28, 1 }
 0x210   : > { %4183 = vst [vmem:[%s467_s23] sm:$0x1] %v4182_v32 }
 0x211   : > { %v4236_v18 = vadd.f32 %v4235_v50, %v4234_v28 }
 0x213   : > { %4237 = vst [vmem:[%s467_s23 + $0x1] sm:$0x1] %v4236_v18 }
 0x214 PF: > { %s18_s28 = sadd.s32 1, %s5777_s28   ;;  %s8160_s24 = smov %s5769_s26 }
 0x215   : > { %p15_p13 = scmp.ge.s32.totalorder %s18_s28, 6   ;;  %s8161_s25 = smov %s5773_s27 }
 0x216   : > { %s8162_s26 = smov %s8165_s29  ;;  %s8163_s27 = smov %s8169_s30 }
 0x217   :  { %17 = sbr.rel (!%p15_p13) target bundleno = 3 (0x3), region = 100 }

</bundles_post_ra>
